<compile_context>
chip_gen: v5e
topology: v5e:2x2
jax: 0.10.0
libtpu: 0.0.40
codegen_flags: <defaults>
</compile_context>

<pallas_src>
import math
import functools

import jax
import jax.numpy as jnp
from jax import lax
from jax.experimental import pallas as pl
from jax.experimental.pallas import tpu as pltpu


def _round_up(a, b):
    return (a + b - 1) // b * b


def _softplus(x):
    # Overflow-safe softplus: log(1 + exp(x)) = max(x, 0) + log1p(exp(-|x|))
    return jnp.maximum(x, 0.0) + jnp.log1p(jnp.exp(-jnp.abs(x)))


# ---------------------------------------------------------------------------
# Pallas kernels
# ---------------------------------------------------------------------------

def _sample_kernel(wmu_ref, wrho_ref, weps_ref, bmu_ref, brho_ref, beps_ref,
                   w_out_ref, b_out_ref):
    """Tiled Gaussian reparameterization sampling (prologue kernel).

    wmu/wrho/weps : (TK, 128) f32 tile of the (K_pad, Cout_pad) HWIO-flattened params
    bmu/brho/beps : (1, 128)  f32 tile of the bias params
    w_out         : (TK, 128) bf16 sampled weight (MXU-ready, K-major)
    b_out         : (1, 128)  f32  sampled bias
    """
    w_out_ref[...] = (wmu_ref[...] + _softplus(wrho_ref[...]) * weps_ref[...]
                      ).astype(w_out_ref.dtype)
    b_out_ref[...] = bmu_ref[...] + _softplus(brho_ref[...]) * beps_ref[...]


def _conv_kernel(x_ref, w_ref, b_ref, o_ref, *,
                 kh, kw, sh, sw, dh, dw, toh, ow, cin):
    """Fused im2col conv tile: KH*KW shifted matmuls, f32 accumulation.

    x_ref : (1, H_in, W_in, Cin)  bf16  full padded image (resident across oh/cout)
    w_ref : (K_pad, TCO)          bf16  sampled weight tile, row = (i*KW+j)*Cin + ci
    b_ref : (1, TCO)              f32   sampled bias tile
    o_ref : (1, TOH, OW, TCO)     f32   NHWC output tile (lane-dense)
    """
    tco = o_ref.shape[-1]
    tm = toh * ow
    row0 = pl.multiple_of(pl.program_id(1) * (toh * sh), toh * sh)
    span_h = (toh - 1) * sh + 1
    span_w = (ow - 1) * sw + 1

    acc = jnp.zeros((tm, tco), jnp.float32)
    for i in range(kh):
        for j in range(kw):
            xs = x_ref[0, pl.ds(row0 + i * dh, span_h), pl.ds(j * dw, span_w), :]
            if sh > 1:
                xs = xs[::sh]
            if sw > 1:
                xs = xs[:, ::sw]
            xs2 = xs.reshape(tm, cin)                         # (TM, Cin) in VMEM
            w_ij = w_ref[pl.ds((i * kw + j) * cin, cin), :]   # (Cin, TCO), static slice
            acc = acc + jnp.dot(xs2, w_ij, preferred_element_type=jnp.float32)

    out = acc + b_ref[...]                                    # (TM, TCO) + (1, TCO)
    o_ref[...] = out.reshape(1, toh, ow, tco).astype(o_ref.dtype)


def _kl_kernel(mu_q_ref, rho_q_ref, mu_p_ref, rho_p_ref, out_ref, acc_ref):
    """Gaussian.compute_kl(q || p): per-tile elementwise partials accumulated into an
    (8,128) VMEM scratch; single cross-lane reduction + (1,1) store on the last step.

    Inputs are (TR, 128) f32 tiles of the flattened, zero-padded parameters.
    Zero-padded entries (mu=rho=0 on both sides) contribute ~0 (exactly 0 up to
    one reciprocal rounding).
    """
    @pl.when(pl.program_id(0) == 0)
    def _():
        acc_ref[...] = jnp.zeros_like(acc_ref)

    sig_q = _softplus(rho_q_ref[...])
    sig_p = _softplus(rho_p_ref[...])
    inv_p = 1.0 / sig_p                                   # one divide, reused
    d = (mu_q_ref[...] - mu_p_ref[...]) * inv_p
    r = sig_q * inv_p
    # log(s_p^2/s_q^2) = -2*log(r); grouping (r*r - 1) - 2*log(r) keeps KL(q||q) ~ 0.
    elem = d * d + ((r * r - 1.0) - 2.0 * jnp.log(r))
    tr = elem.shape[0]
    acc_ref[...] += elem.reshape(tr // 8, 8, 128).sum(axis=0)

    @pl.when(pl.program_id(0) == pl.num_programs(0) - 1)
    def _():
        out_ref[0, 0] = 0.5 * jnp.sum(acc_ref[...])


# ---------------------------------------------------------------------------
# Wrappers
# ---------------------------------------------------------------------------

@functools.partial(jax.jit, static_argnames=("stride", "padding", "dilation"))
def prob_conv2d_forward(x_nhwc, w_mu, w_rho, w_eps, b_mu, b_rho, b_eps,
                        stride=(1, 1), padding=(1, 1), dilation=(1, 1)):
    """Sampled-weight conv2d, NHWC activations end-to-end.

    x_nhwc : (N, H, W, Cin)
    w_*    : (Cout, Cin, KH, KW)   (PyTorch OIHW parameter layout)
    b_*    : (Cout,)
    returns: (N, OH, OW, Cout) float32
    """
    n, h, w, cin = x_nhwc.shape
    cout, cin_w, kh, kw = w_mu.shape
    assert cin == cin_w, "groups > 1 not supported"
    sh, sw = stride
    ph, pw = padding
    dh, dw = dilation
    oh = (h + 2 * ph - dh * (kh - 1) - 1) // sh + 1
    ow = (w + 2 * pw - dw * (kw - 1) - 1) // sw + 1

    k = kh * kw * cin
    cout_pad = _round_up(cout, 128)                 # lane-dense output columns
    tco = 256 if cout_pad % 256 == 0 else 128       # v6e/v7x MXU-friendly when possible
    # ~512 flattened output rows per grid step (v5e-safe; grow on v6e if desired).
    toh = max(1, min(oh, 512 // max(ow, 1)))
    oh_pad = _round_up(oh, toh)

    # ---- prologue: sample weight & bias once (tiled, bounded VMEM per step) ----
    tks = min(256, _round_up(k, 8))
    k_pad = _round_up(k, tks)

    def prep_w(a):   # (Cout,Cin,KH,KW) -> (K_pad, Cout_pad) f32, row = (i*KW+j)*Cin+ci
        a2 = a.transpose(2, 3, 1, 0).reshape(k, cout).astype(jnp.float32)
        return jnp.pad(a2, ((0, k_pad - k), (0, cout_pad - cout)))

    def prep_b(a):   # (Cout,) -> (1, Cout_pad) f32
        return jnp.pad(a.reshape(1, cout).astype(jnp.float32),
                       ((0, 0), (0, cout_pad - cout)))

    wspec = pl.BlockSpec((tks, 128), lambda i, j: (i, j))
    bspec = pl.BlockSpec((1, 128), lambda i, j: (0, j))
    w_s, b_s = pl.pallas_call(
        _sample_kernel,
        out_shape=(jax.ShapeDtypeStruct((k_pad, cout_pad), jnp.bfloat16),
                   jax.ShapeDtypeStruct((1, cout_pad), jnp.float32)),
        grid_spec=pltpu.PrefetchScalarGridSpec(
            num_scalar_prefetch=0,
            grid=(k_pad // tks, cout_pad // 128),
            in_specs=[wspec, wspec, wspec, bspec, bspec, bspec],
            out_specs=(wspec, bspec),
        ),
        compiler_params=pltpu.CompilerParams(
            dimension_semantics=("arbitrary", "arbitrary")),
    )(prep_w(w_mu), prep_w(w_rho), prep_w(w_eps),
      prep_b(b_mu), prep_b(b_rho), prep_b(b_eps))

    # ---- padded NHWC activation (bf16): conv padding + extra bottom rows so the
    #      last OH tile's reads stay in-bounds when TOH doesn't divide OH --------
    h_need = (oh_pad - 1) * sh + (kh - 1) * dh + 1
    extra_h = max(0, h_need - (h + 2 * ph))
    x_pad = jnp.pad(x_nhwc.astype(jnp.bfloat16),
                    ((0, 0), (ph, ph + extra_h), (pw, pw), (0, 0)))
    h_in, w_in = x_pad.shape[1], x_pad.shape[2]

    # ---- fused im2col conv: grid (N, OH tiles, Cout tiles), all parallel -------
    grid = (n, oh_pad // toh, cout_pad // tco)
    kern = functools.partial(_conv_kernel, kh=kh, kw=kw, sh=sh, sw=sw,
                             dh=dh, dw=dw, toh=toh, ow=ow, cin=cin)

    x_block = h_in * w_in * cin * 2
    w_block = k_pad * tco * 2
    o_block = toh * ow * tco * 4
    need = 2 * (x_block + w_block + tco * 4 + o_block) + o_block + (4 << 20)
    vmem_limit = int(min(max(need, 32 << 20), 64 << 20))    # v7x-safe cap

    cost = pl.CostEstimate(
        flops=2 * n * oh_pad * ow * cout_pad * k,
        transcendentals=0,
        bytes_accessed=(n * h_in * w_in * cin * 2 + k_pad * cout_pad * 2
                        + cout_pad * 4 + n * oh_pad * ow * cout_pad * 4),
    )

    out = pl.pallas_call(
        kern,
        out_shape=jax.ShapeDtypeStruct((n, oh_pad, ow, cout_pad), jnp.float32),
        grid_spec=pltpu.PrefetchScalarGridSpec(
            num_scalar_prefetch=0,
            grid=grid,
            in_specs=[
                # full padded image; block index changes only with n -> one DMA/image
                pl.BlockSpec((1, h_in, w_in, cin), lambda ni, ti, ci: (ni, 0, 0, 0)),
                # sampled weight / bias tiles; constant across n and oh tiles
                pl.BlockSpec((k_pad, tco), lambda ni, ti, ci: (0, ci)),
                pl.BlockSpec((1, tco), lambda ni, ti, ci: (0, ci)),
            ],
            out_specs=pl.BlockSpec((1, toh, ow, tco),
                                   lambda ni, ti, ci: (ni, ti, 0, ci)),
        ),
        compiler_params=pltpu.CompilerParams(
            dimension_semantics=("parallel", "parallel", "parallel"),
            vmem_limit_bytes=vmem_limit),
        cost_estimate=cost,
    )(x_pad, w_s, b_s)

    # Slice off the OH / Cout padding (stays NHWC — no transpose).
    return out[:, :oh, :, :cout]


@jax.jit
def gaussian_kl(mu_q, rho_q, mu_p, rho_p):
    """Sum-KL between two diagonal Gaussians (softplus std), tiled Pallas reduction."""
    n = mu_q.size
    lanes = 128
    rows = _round_up(n, lanes) // lanes
    tr = min(1024, _round_up(rows, 8))              # rows per grid step (multiple of 8)
    rows_pad = _round_up(rows, tr)
    total = rows_pad * lanes

    def prep(a):
        a = a.reshape(-1).astype(jnp.float32)
        return jnp.pad(a, (0, total - n)).reshape(rows_pad, lanes)

    tile = pl.BlockSpec((tr, lanes), lambda i: (i, 0))
    out = pl.pallas_call(
        _kl_kernel,
        out_shape=jax.ShapeDtypeStruct((1, 1), jnp.float32),
        grid_spec=pltpu.PrefetchScalarGridSpec(
            num_scalar_prefetch=0,
            grid=(rows_pad // tr,),
            in_specs=[tile, tile, tile, tile],
            out_specs=pl.BlockSpec((1, 1), lambda i: (0, 0)),
            scratch_shapes=[pltpu.VMEM((8, lanes), jnp.float32)],
        ),
        compiler_params=pltpu.CompilerParams(dimension_semantics=("arbitrary",)),
    )(prep(mu_q), prep(rho_q), prep(mu_p), prep(rho_p))
    return out[0, 0]


# ---------------------------------------------------------------------------
# Main
# ---------------------------------------------------------------------------

if __name__ == "__main__":
    key = jax.random.PRNGKey(0)
    k_x, k_wmu, k_bmu, k_weps, k_beps = jax.random.split(key, 5)

    # Small shapes consistent with the module: Conv2d(4 -> 8, 3x3, stride 1, pad 1)
    N, Cin, H, W = 2, 4, 16, 16
    Cout, KH, KW = 8, 3, 3
    stride, padding, dilation = (1, 1), (1, 1), (1, 1)

    # Deterministic parameter init (PyTorch-like kaiming-uniform bound) + rho prior.
    fan_in = Cin * KH * KW
    bound = 1.0 / math.sqrt(fan_in)
    w_mu = jax.random.uniform(k_wmu, (Cout, Cin, KH, KW), jnp.float32, -bound, bound)
    b_mu = jax.random.uniform(k_bmu, (Cout,), jnp.float32, -bound, bound)
    rho_prior = math.log(math.expm1(0.025))          # PBB-style sigma prior
    w_rho = jnp.full((Cout, Cin, KH, KW), rho_prior, jnp.float32)
    b_rho = jnp.full((Cout,), rho_prior, jnp.float32)

    # Reparameterization noise for Gaussian.sample()
    w_eps = jax.random.normal(k_weps, (Cout, Cin, KH, KW), jnp.float32)
    b_eps = jax.random.normal(k_beps, (Cout,), jnp.float32)

    # Module-boundary conversion: the PyTorch module is NCHW, the kernel is NHWC.
    x_nchw = jax.random.normal(k_x, (N, Cin, H, W), jnp.float32)
    x_nhwc = jnp.transpose(x_nchw, (0, 2, 3, 1))

    # Forward (ProbConv2d.sample() + ProbConv2d.forward conv)
    y = prob_conv2d_forward(x_nhwc, w_mu, w_rho, w_eps, b_mu, b_rho, b_eps,
                            stride=stride, padding=padding, dilation=dilation)
    y = jax.block_until_ready(y)

    # kl_div as in forward() during training: KL(posterior || prior); prior was
    # initialized with identical (mu, rho), so this is ~0 here.
    kl = gaussian_kl(w_mu, w_rho, w_mu, w_rho) + gaussian_kl(b_mu, b_rho, b_mu, b_rho)
    kl = jax.block_until_ready(kl)

    # ---- reference checks -------------------------------------------------
    sp = lambda t: jnp.maximum(t, 0.0) + jnp.log1p(jnp.exp(-jnp.abs(t)))

    # Conv reference with the same sampled (bf16) weights and bf16 activations.
    w_samp = (w_mu + sp(w_rho) * w_eps).astype(jnp.bfloat16)          # OIHW
    b_samp = b_mu + sp(b_rho) * b_eps
    w_hwio = jnp.transpose(w_samp, (2, 3, 1, 0))
    y_ref = lax.conv_general_dilated(
        x_nhwc.astype(jnp.bfloat16), w_hwio, window_strides=stride,
        padding=[(padding[0], padding[0]), (padding[1], padding[1])],
        rhs_dilation=dilation, dimension_numbers=("NHWC", "HWIO", "NHWC"),
        preferred_element_type=jnp.float32,
    ) + b_samp[None, None, None, :]
    assert y.shape == (N, H, W, Cout)
    assert jnp.allclose(y, y_ref, rtol=2e-2, atol=2e-2), float(jnp.max(jnp.abs(y - y_ref)))

    # KL reference checks: (near-)zero case and a non-trivial case.
    assert jnp.allclose(kl, 0.0, atol=1e-5), float(kl)

    def kl_ref(mu_q, rho_q, mu_p, rho_p):
        sq, spd = sp(rho_q), sp(rho_p)
        b1, b0 = sq * sq, spd * spd
        return 0.5 * jnp.sum(jnp.log(b0 / b1) + (mu_q - mu_p) ** 2 / b0 + b1 / b0 - 1.0)

    mu_p2, rho_p2 = 0.9 * w_mu, w_rho + 0.1
    kl2 = jax.block_until_ready(gaussian_kl(w_mu, w_rho, mu_p2, rho_p2))
    assert jnp.allclose(kl2, kl_ref(w_mu, w_rho, mu_p2, rho_p2), rtol=1e-4, atol=1e-4)

    print("KERNEL_OK")
</pallas_src>

<mosaic_0001>
module attributes {stable_mosaic.version = 11 : i64} {
  func.func @_sample_kernel(%arg0: i32, %arg1: i32, %arg2: memref<40x128xf32, #tpu.memory_space<vmem>>, %arg3: memref<40x128xf32, #tpu.memory_space<vmem>>, %arg4: memref<40x128xf32, #tpu.memory_space<vmem>>, %arg5: memref<1x128xf32, #tpu.memory_space<vmem>>, %arg6: memref<1x128xf32, #tpu.memory_space<vmem>>, %arg7: memref<1x128xf32, #tpu.memory_space<vmem>>, %arg8: memref<40x128xbf16, #tpu.memory_space<vmem>>, %arg9: memref<1x128xf32, #tpu.memory_space<vmem>>) attributes {dimension_semantics = [#tpu.dimension_semantics<arbitrary>, #tpu.dimension_semantics<arbitrary>], iteration_bounds = array<i64: 1, 1>, scalar_prefetch = 0 : i64, scratch_operands = 0 : i64, tpu.core_type = #tpu.core_type<tc>, window_params = [{transform_indices = @transform_0, window_bounds = array<i64: 40, 128>}, {transform_indices = @transform_1, window_bounds = array<i64: 40, 128>}, {transform_indices = @transform_2, window_bounds = array<i64: 40, 128>}, {transform_indices = @transform_3, window_bounds = array<i64: 1, 128>}, {transform_indices = @transform_4, window_bounds = array<i64: 1, 128>}, {transform_indices = @transform_5, window_bounds = array<i64: 1, 128>}, {transform_indices = @transform_6, window_bounds = array<i64: 40, 128>}, {transform_indices = @transform_7, window_bounds = array<i64: 1, 128>}]} {
    %c0 = arith.constant 0 : index
    %c0_0 = arith.constant 0 : index
    %0 = vector.load %arg2[%c0, %c0_0] : memref<40x128xf32, #tpu.memory_space<vmem>>, vector<40x128xf32>
    %c0_1 = arith.constant 0 : index
    %c0_2 = arith.constant 0 : index
    %1 = vector.load %arg3[%c0_1, %c0_2] : memref<40x128xf32, #tpu.memory_space<vmem>>, vector<40x128xf32>
    %cst = arith.constant 0.000000e+00 : f32
    %2 = vector.broadcast %cst : f32 to vector<40x128xf32>
    %3 = arith.maximumf %1, %2 : vector<40x128xf32>
    %4 = math.absf %1 : vector<40x128xf32>
    %cst_3 = arith.constant 0.000000e+00 : f32
    %5 = vector.broadcast %cst_3 : f32 to vector<40x128xf32>
    %6 = arith.subf %5, %4 : vector<40x128xf32>
    %7 = math.exp %6 : vector<40x128xf32>
    %8 = math.log1p %7 : vector<40x128xf32>
    %9 = arith.addf %3, %8 : vector<40x128xf32>
    %c0_4 = arith.constant 0 : index
    %c0_5 = arith.constant 0 : index
    %10 = vector.load %arg4[%c0_4, %c0_5] : memref<40x128xf32, #tpu.memory_space<vmem>>, vector<40x128xf32>
    %11 = arith.mulf %9, %10 : vector<40x128xf32>
    %12 = arith.addf %0, %11 : vector<40x128xf32>
    %13 = arith.truncf %12 : vector<40x128xf32> to vector<40x128xbf16>
    %c0_6 = arith.constant 0 : index
    %c0_7 = arith.constant 0 : index
    %14 = vector.load %arg8[%c0_6, %c0_7] : memref<40x128xbf16, #tpu.memory_space<vmem>>, vector<40x128xbf16>
    tpu.vector_store %arg8[%c0_6, %c0_7], %13 {strides = array<i32>} : memref<40x128xbf16, #tpu.memory_space<vmem>>, vector<40x128xbf16>,
    %c0_8 = arith.constant 0 : index
    %c0_9 = arith.constant 0 : index
    %15 = vector.load %arg5[%c0_8, %c0_9] : memref<1x128xf32, #tpu.memory_space<vmem>>, vector<1x128xf32>
    %c0_10 = arith.constant 0 : index
    %c0_11 = arith.constant 0 : index
    %16 = vector.load %arg6[%c0_10, %c0_11] : memref<1x128xf32, #tpu.memory_space<vmem>>, vector<1x128xf32>
    %cst_12 = arith.constant 0.000000e+00 : f32
    %17 = vector.broadcast %cst_12 : f32 to vector<1x128xf32>
    %18 = arith.maximumf %16, %17 : vector<1x128xf32>
    %19 = math.absf %16 : vector<1x128xf32>
    %cst_13 = arith.constant 0.000000e+00 : f32
    %20 = vector.broadcast %cst_13 : f32 to vector<1x128xf32>
    %21 = arith.subf %20, %19 : vector<1x128xf32>
    %22 = math.exp %21 : vector<1x128xf32>
    %23 = math.log1p %22 : vector<1x128xf32>
    %24 = arith.addf %18, %23 : vector<1x128xf32>
    %c0_14 = arith.constant 0 : index
    %c0_15 = arith.constant 0 : index
    %25 = vector.load %arg7[%c0_14, %c0_15] : memref<1x128xf32, #tpu.memory_space<vmem>>, vector<1x128xf32>
    %26 = arith.mulf %24, %25 : vector<1x128xf32>
    %27 = arith.addf %15, %26 : vector<1x128xf32>
    %c0_16 = arith.constant 0 : index
    %c0_17 = arith.constant 0 : index
    %28 = vector.load %arg9[%c0_16, %c0_17] : memref<1x128xf32, #tpu.memory_space<vmem>>, vector<1x128xf32>
    tpu.vector_store %arg9[%c0_16, %c0_17], %27 {strides = array<i32>} : memref<1x128xf32, #tpu.memory_space<vmem>>, vector<1x128xf32>,
    return
  }
  func.func @transform_0(%arg0: i32, %arg1: i32) -> (i32, i32) {
    %c0_i32 = arith.constant 0 : i32
    return %arg0, %arg1 : i32, i32
  }
  func.func @transform_1(%arg0: i32, %arg1: i32) -> (i32, i32) {
    %c0_i32 = arith.constant 0 : i32
    return %arg0, %arg1 : i32, i32
  }
  func.func @transform_2(%arg0: i32, %arg1: i32) -> (i32, i32) {
    %c0_i32 = arith.constant 0 : i32
    return %arg0, %arg1 : i32, i32
  }
  func.func @transform_3(%arg0: i32, %arg1: i32) -> (i32, i32) {
    %c0_i32 = arith.constant 0 : i32
    %c0_i32_0 = arith.constant 0 : i32
    return %c0_i32, %arg1 : i32, i32
  }
  func.func @transform_4(%arg0: i32, %arg1: i32) -> (i32, i32) {
    %c0_i32 = arith.constant 0 : i32
    %c0_i32_0 = arith.constant 0 : i32
    return %c0_i32, %arg1 : i32, i32
  }
  func.func @transform_5(%arg0: i32, %arg1: i32) -> (i32, i32) {
    %c0_i32 = arith.constant 0 : i32
    %c0_i32_0 = arith.constant 0 : i32
    return %c0_i32, %arg1 : i32, i32
  }
  func.func @transform_6(%arg0: i32, %arg1: i32) -> (i32, i32) {
    %c0_i32 = arith.constant 0 : i32
    return %arg0, %arg1 : i32, i32
  }
  func.func @transform_7(%arg0: i32, %arg1: i32) -> (i32, i32) {
    %c0_i32 = arith.constant 0 : i32
    %c0_i32_0 = arith.constant 0 : i32
    return %c0_i32, %arg1 : i32, i32
  }
}

module attributes {stable_mosaic.version = 11 : i64} {
  func.func @_conv_kernel(%arg0: i32, %arg1: i32, %arg2: i32, %arg3: memref<1x18x18x4xbf16, #tpu.memory_space<vmem>>, %arg4: memref<40x128xbf16, #tpu.memory_space<vmem>>, %arg5: memref<1x128xf32, #tpu.memory_space<vmem>>, %arg6: memref<1x16x16x128xf32, #tpu.memory_space<vmem>>) attributes {dimension_semantics = [#tpu.dimension_semantics<parallel>, #tpu.dimension_semantics<parallel>, #tpu.dimension_semantics<parallel>], iteration_bounds = array<i64: 2, 1, 1>, scalar_prefetch = 0 : i64, scratch_operands = 0 : i64, tpu.core_type = #tpu.core_type<tc>, window_params = [{transform_indices = @transform_0, window_bounds = array<i64: 1, 18, 18, 4>}, {transform_indices = @transform_1, window_bounds = array<i64: 40, 128>}, {transform_indices = @transform_2, window_bounds = array<i64: 1, 128>}, {transform_indices = @transform_3, window_bounds = array<i64: 1, 16, 16, 128>}]} {
    %c16_i32 = arith.constant 16 : i32
    %0 = arith.muli %arg1, %c16_i32 : i32
    %1 = tpu.assume_multiple %0, 16 : i32
    %cst = arith.constant 0.000000e+00 : f32
    %2 = vector.broadcast %cst : f32 to vector<256x128xf32>
    %c0_i32 = arith.constant 0 : i32
    %3 = arith.addi %1, %c0_i32 : i32
    %c0 = arith.constant 0 : index
    %4 = arith.index_cast %3 : i32 to index
    %c0_0 = arith.constant 0 : index
    %c0_1 = arith.constant 0 : index
    %5 = vector.load %arg3[%c0, %4, %c0_0, %c0_1] : memref<1x18x18x4xbf16, #tpu.memory_space<vmem>>, vector<1x16x16x4xbf16>
    %6 = vector.shape_cast %5 : vector<1x16x16x4xbf16> to vector<16x16x4xbf16>
    %7 = vector.shape_cast %6 : vector<16x16x4xbf16> to vector<256x4xbf16>
    %c0_2 = arith.constant 0 : index
    %c0_3 = arith.constant 0 : index
    %8 = vector.load %arg4[%c0_2, %c0_3] : memref<40x128xbf16, #tpu.memory_space<vmem>>, vector<4x128xbf16>
    %cst_4 = arith.constant dense<0.000000e+00> : vector<256x128xf32>
    %9 = tpu.matmul %7, %8, %cst_4 {dimension_numbers = #tpu.dot_dimension_numbers<[1], [0], [0], [1], [0, 0, 1, 1], [], []>} : vector<256x4xbf16>, vector<4x128xbf16>, vector<256x128xf32> -> vector<256x128xf32>
    %10 = arith.addf %2, %9 : vector<256x128xf32>
    %c0_i32_5 = arith.constant 0 : i32
    %11 = arith.addi %1, %c0_i32_5 : i32
    %c0_6 = arith.constant 0 : index
    %12 = arith.index_cast %11 : i32 to index
    %c1 = arith.constant 1 : index
    %c0_7 = arith.constant 0 : index
    %13 = vector.load %arg3[%c0_6, %12, %c1, %c0_7] : memref<1x18x18x4xbf16, #tpu.memory_space<vmem>>, vector<1x16x16x4xbf16>
    %14 = vector.shape_cast %13 : vector<1x16x16x4xbf16> to vector<16x16x4xbf16>
    %15 = vector.shape_cast %14 : vector<16x16x4xbf16> to vector<256x4xbf16>
    %c4 = arith.constant 4 : index
    %c0_8 = arith.constant 0 : index
    %16 = vector.load %arg4[%c4, %c0_8] : memref<40x128xbf16, #tpu.memory_space<vmem>>, vector<4x128xbf16>
    %cst_9 = arith.constant dense<0.000000e+00> : vector<256x128xf32>
    %17 = tpu.matmul %15, %16, %cst_9 {dimension_numbers = #tpu.dot_dimension_numbers<[1], [0], [0], [1], [0, 0, 1, 1], [], []>} : vector<256x4xbf16>, vector<4x128xbf16>, vector<256x128xf32> -> vector<256x128xf32>
    %18 = arith.addf %10, %17 : vector<256x128xf32>
    %c0_i32_10 = arith.constant 0 : i32
    %19 = arith.addi %1, %c0_i32_10 : i32
    %c0_11 = arith.constant 0 : index
    %20 = arith.index_cast %19 : i32 to index
    %c2 = arith.constant 2 : index
    %c0_12 = arith.constant 0 : index
    %21 = vector.load %arg3[%c0_11, %20, %c2, %c0_12] : memref<1x18x18x4xbf16, #tpu.memory_space<vmem>>, vector<1x16x16x4xbf16>
    %22 = vector.shape_cast %21 : vector<1x16x16x4xbf16> to vector<16x16x4xbf16>
    %23 = vector.shape_cast %22 : vector<16x16x4xbf16> to vector<256x4xbf16>
    %c8 = arith.constant 8 : index
    %c0_13 = arith.constant 0 : index
    %24 = vector.load %arg4[%c8, %c0_13] : memref<40x128xbf16, #tpu.memory_space<vmem>>, vector<4x128xbf16>
    %cst_14 = arith.constant dense<0.000000e+00> : vector<256x128xf32>
    %25 = tpu.matmul %23, %24, %cst_14 {dimension_numbers = #tpu.dot_dimension_numbers<[1], [0], [0], [1], [0, 0, 1, 1], [], []>} : vector<256x4xbf16>, vector<4x128xbf16>, vector<256x128xf32> -> vector<256x128xf32>
    %26 = arith.addf %18, %25 : vector<256x128xf32>
    %c1_i32 = arith.constant 1 : i32
    %27 = arith.addi %1, %c1_i32 : i32
    %c0_15 = arith.constant 0 : index
    %28 = arith.index_cast %27 : i32 to index
    %c0_16 = arith.constant 0 : index
    %c0_17 = arith.constant 0 : index
    %29 = vector.load %arg3[%c0_15, %28, %c0_16, %c0_17] : memref<1x18x18x4xbf16, #tpu.memory_space<vmem>>, vector<1x16x16x4xbf16>
    %30 = vector.shape_cast %29 : vector<1x16x16x4xbf16> to vector<16x16x4xbf16>
    %31 = vector.shape_cast %30 : vector<16x16x4xbf16> to vector<256x4xbf16>
    %c12 = arith.constant 12 : index
    %c0_18 = arith.constant 0 : index
    %32 = vector.load %arg4[%c12, %c0_18] : memref<40x128xbf16, #tpu.memory_space<vmem>>, vector<4x128xbf16>
    %cst_19 = arith.constant dense<0.000000e+00> : vector<256x128xf32>
    %33 = tpu.matmul %31, %32, %cst_19 {dimension_numbers = #tpu.dot_dimension_numbers<[1], [0], [0], [1], [0, 0, 1, 1], [], []>} : vector<256x4xbf16>, vector<4x128xbf16>, vector<256x128xf32> -> vector<256x128xf32>
    %34 = arith.addf %26, %33 : vector<256x128xf32>
    %c1_i32_20 = arith.constant 1 : i32
    %35 = arith.addi %1, %c1_i32_20 : i32
    %c0_21 = arith.constant 0 : index
    %36 = arith.index_cast %35 : i32 to index
    %c1_22 = arith.constant 1 : index
    %c0_23 = arith.constant 0 : index
    %37 = vector.load %arg3[%c0_21, %36, %c1_22, %c0_23] : memref<1x18x18x4xbf16, #tpu.memory_space<vmem>>, vector<1x16x16x4xbf16>
    %38 = vector.shape_cast %37 : vector<1x16x16x4xbf16> to vector<16x16x4xbf16>
    %39 = vector.shape_cast %38 : vector<16x16x4xbf16> to vector<256x4xbf16>
    %c16 = arith.constant 16 : index
    %c0_24 = arith.constant 0 : index
    %40 = vector.load %arg4[%c16, %c0_24] : memref<40x128xbf16, #tpu.memory_space<vmem>>, vector<4x128xbf16>
    %cst_25 = arith.constant dense<0.000000e+00> : vector<256x128xf32>
    %41 = tpu.matmul %39, %40, %cst_25 {dimension_numbers = #tpu.dot_dimension_numbers<[1], [0], [0], [1], [0, 0, 1, 1], [], []>} : vector<256x4xbf16>, vector<4x128xbf16>, vector<256x128xf32> -> vector<256x128xf32>
    %42 = arith.addf %34, %41 : vector<256x128xf32>
    %c1_i32_26 = arith.constant 1 : i32
    %43 = arith.addi %1, %c1_i32_26 : i32
    %c0_27 = arith.constant 0 : index
    %44 = arith.index_cast %43 : i32 to index
    %c2_28 = arith.constant 2 : index
    %c0_29 = arith.constant 0 : index
    %45 = vector.load %arg3[%c0_27, %44, %c2_28, %c0_29] : memref<1x18x18x4xbf16, #tpu.memory_space<vmem>>, vector<1x16x16x4xbf16>
    %46 = vector.shape_cast %45 : vector<1x16x16x4xbf16> to vector<16x16x4xbf16>
    %47 = vector.shape_cast %46 : vector<16x16x4xbf16> to vector<256x4xbf16>
    %c20 = arith.constant 20 : index
    %c0_30 = arith.constant 0 : index
    %48 = vector.load %arg4[%c20, %c0_30] : memref<40x128xbf16, #tpu.memory_space<vmem>>, vector<4x128xbf16>
    %cst_31 = arith.constant dense<0.000000e+00> : vector<256x128xf32>
    %49 = tpu.matmul %47, %48, %cst_31 {dimension_numbers = #tpu.dot_dimension_numbers<[1], [0], [0], [1], [0, 0, 1, 1], [], []>} : vector<256x4xbf16>, vector<4x128xbf16>, vector<256x128xf32> -> vector<256x128xf32>
    %50 = arith.addf %42, %49 : vector<256x128xf32>
    %c2_i32 = arith.constant 2 : i32
    %51 = arith.addi %1, %c2_i32 : i32
    %c0_32 = arith.constant 0 : index
    %52 = arith.index_cast %51 : i32 to index
    %c0_33 = arith.constant 0 : index
    %c0_34 = arith.constant 0 : index
    %53 = vector.load %arg3[%c0_32, %52, %c0_33, %c0_34] : memref<1x18x18x4xbf16, #tpu.memory_space<vmem>>, vector<1x16x16x4xbf16>
    %54 = vector.shape_cast %53 : vector<1x16x16x4xbf16> to vector<16x16x4xbf16>
    %55 = vector.shape_cast %54 : vector<16x16x4xbf16> to vector<256x4xbf16>
    %c24 = arith.constant 24 : index
    %c0_35 = arith.constant 0 : index
    %56 = vector.load %arg4[%c24, %c0_35] : memref<40x128xbf16, #tpu.memory_space<vmem>>, vector<4x128xbf16>
    %cst_36 = arith.constant dense<0.000000e+00> : vector<256x128xf32>
    %57 = tpu.matmul %55, %56, %cst_36 {dimension_numbers = #tpu.dot_dimension_numbers<[1], [0], [0], [1], [0, 0, 1, 1], [], []>} : vector<256x4xbf16>, vector<4x128xbf16>, vector<256x128xf32> -> vector<256x128xf32>
    %58 = arith.addf %50, %57 : vector<256x128xf32>
    %c2_i32_37 = arith.constant 2 : i32
    %59 = arith.addi %1, %c2_i32_37 : i32
    %c0_38 = arith.constant 0 : index
    %60 = arith.index_cast %59 : i32 to index
    %c1_39 = arith.constant 1 : index
    %c0_40 = arith.constant 0 : index
    %61 = vector.load %arg3[%c0_38, %60, %c1_39, %c0_40] : memref<1x18x18x4xbf16, #tpu.memory_space<vmem>>, vector<1x16x16x4xbf16>
    %62 = vector.shape_cast %61 : vector<1x16x16x4xbf16> to vector<16x16x4xbf16>
    %63 = vector.shape_cast %62 : vector<16x16x4xbf16> to vector<256x4xbf16>
    %c28 = arith.constant 28 : index
    %c0_41 = arith.constant 0 : index
    %64 = vector.load %arg4[%c28, %c0_41] : memref<40x128xbf16, #tpu.memory_space<vmem>>, vector<4x128xbf16>
    %cst_42 = arith.constant dense<0.000000e+00> : vector<256x128xf32>
    %65 = tpu.matmul %63, %64, %cst_42 {dimension_numbers = #tpu.dot_dimension_numbers<[1], [0], [0], [1], [0, 0, 1, 1], [], []>} : vector<256x4xbf16>, vector<4x128xbf16>, vector<256x128xf32> -> vector<256x128xf32>
    %66 = arith.addf %58, %65 : vector<256x128xf32>
    %c2_i32_43 = arith.constant 2 : i32
    %67 = arith.addi %1, %c2_i32_43 : i32
    %c0_44 = arith.constant 0 : index
    %68 = arith.index_cast %67 : i32 to index
    %c2_45 = arith.constant 2 : index
    %c0_46 = arith.constant 0 : index
    %69 = vector.load %arg3[%c0_44, %68, %c2_45, %c0_46] : memref<1x18x18x4xbf16, #tpu.memory_space<vmem>>, vector<1x16x16x4xbf16>
    %70 = vector.shape_cast %69 : vector<1x16x16x4xbf16> to vector<16x16x4xbf16>
    %71 = vector.shape_cast %70 : vector<16x16x4xbf16> to vector<256x4xbf16>
    %c32 = arith.constant 32 : index
    %c0_47 = arith.constant 0 : index
    %72 = vector.load %arg4[%c32, %c0_47] : memref<40x128xbf16, #tpu.memory_space<vmem>>, vector<4x128xbf16>
    %cst_48 = arith.constant dense<0.000000e+00> : vector<256x128xf32>
    %73 = tpu.matmul %71, %72, %cst_48 {dimension_numbers = #tpu.dot_dimension_numbers<[1], [0], [0], [1], [0, 0, 1, 1], [], []>} : vector<256x4xbf16>, vector<4x128xbf16>, vector<256x128xf32> -> vector<256x128xf32>
    %74 = arith.addf %66, %73 : vector<256x128xf32>
    %c0_49 = arith.constant 0 : index
    %c0_50 = arith.constant 0 : index
    %75 = vector.load %arg5[%c0_49, %c0_50] : memref<1x128xf32, #tpu.memory_space<vmem>>, vector<1x128xf32>
    %76 = vector.broadcast %75 : vector<1x128xf32> to vector<256x128xf32>
    %77 = arith.addf %74, %76 : vector<256x128xf32>
    %78 = vector.shape_cast %77 : vector<256x128xf32> to vector<1x16x16x128xf32>
    %c0_51 = arith.constant 0 : index
    %c0_52 = arith.constant 0 : index
    %c0_53 = arith.constant 0 : index
    %c0_54 = arith.constant 0 : index
    %79 = vector.load %arg6[%c0_51, %c0_52, %c0_53, %c0_54] : memref<1x16x16x128xf32, #tpu.memory_space<vmem>>, vector<1x16x16x128xf32>
    tpu.vector_store %arg6[%c0_51, %c0_52, %c0_53, %c0_54], %78 {strides = array<i32>} : memref<1x16x16x128xf32, #tpu.memory_space<vmem>>, vector<1x16x16x128xf32>,
    return
  }
  func.func @transform_0(%arg0: i32, %arg1: i32, %arg2: i32) -> (i32, i32, i32, i32) {
    %c0_i32 = arith.constant 0 : i32
    %c0_i32_0 = arith.constant 0 : i32
    %c0_i32_1 = arith.constant 0 : i32
    %c0_i32_2 = arith.constant 0 : i32
    return %arg0, %c0_i32, %c0_i32_0, %c0_i32_1 : i32, i32, i32, i32
  }
  func.func @transform_1(%arg0: i32, %arg1: i32, %arg2: i32) -> (i32, i32) {
    %c0_i32 = arith.constant 0 : i32
    %c0_i32_0 = arith.constant 0 : i32
    return %c0_i32, %arg2 : i32, i32
  }
  func.func @transform_2(%arg0: i32, %arg1: i32, %arg2: i32) -> (i32, i32) {
    %c0_i32 = arith.constant 0 : i32
    %c0_i32_0 = arith.constant 0 : i32
    return %c0_i32, %arg2 : i32, i32
  }
  func.func @transform_3(%arg0: i32, %arg1: i32, %arg2: i32) -> (i32, i32, i32, i32) {
    %c0_i32 = arith.constant 0 : i32
    %c0_i32_0 = arith.constant 0 : i32
    return %arg0, %arg1, %c0_i32, %arg2 : i32, i32, i32, i32
  }
}

</mosaic_0001>

<bundles_post_ra>
// kernel: prob_conv2d_forward.2
= control target key start
LH: loop header
LB: loop body
LE: loop exit
PB: predicated region body
PF: predicated region fallthrough
CT: control target
= control target key end

     0   :  { %s369_s1 = inlined_call_operand.vmem [shape: f32[40,128], index: 1, kind: input, shape index: {}]   ;;  %s370_s4 = inlined_call_operand.vmem [shape: f32[1,128], index: 4, kind: input, shape index: {}]   ;;  %s371_s2 = inlined_call_operand.vmem [shape: f32[40,128], index: 2, kind: input, shape index: {}]   ;;  %s372_s0 = inlined_call_operand.vmem [shape: f32[40,128], index: 0, kind: input, shape index: {}]   ;;  %s373_s5 = inlined_call_operand.vmem [shape: f32[1,128], index: 5, kind: input, shape index: {}]   ;;  %s374_s6 = inlined_call_operand.vmem [shape: bf16[40,128], index: 6, kind: output, shape index: {0}]   ;;  %s375_s3 = inlined_call_operand.vmem [shape: f32[1,128], index: 3, kind: input, shape index: {}]   ;;  %s376_s7 = inlined_call_operand.vmem [shape: f32[1,128], index: 7, kind: output, shape index: {1}]  }
   0x1   :  { %v242_v0 = vld [vmem:[%s369_s1] sm:$0xff]  ;;  %v247_v1 = vld [vmem:[%s369_s1 + $0x8] sm:$0xff]  ;;  %v254_v4 = vld [vmem:[%s369_s1 + $0x10] sm:$0xff] }
   0x2   :  { %v40_v2 = vand.u32 2147483647, %v242_v0  ;;  %v41_v3 = vand.u32 2147483647, %v247_v1  ;;  %v259_v6 = vld [vmem:[%s369_s1 + $0x18] sm:$0xff]  ;;  %v266_v12 = vld [vmem:[%s369_s1 + $0x20] sm:$0xff] }
   0x3   :  { %v42_v7 = vand.u32 2147483647, %v254_v4  ;;  %v43_v9 = vand.u32 2147483647, %v259_v6  ;;  %v44_v15 = vand.u32 2147483647, %v266_v12 }
   0x4   :  { %v45_v5 = vsub.f32 0.0, %v40_v2  ;;  %v46_v8 = vsub.f32 0.0, %v41_v3  ;;  %v272_v17 = vld [vmem:[%s370_s4] sm:$0x1]  ;;  %v35_v29 = vmax.f32 %v242_v0, 0.0  ;;  %v36_v33 = vmax.f32 %v247_v1, 0.0 }
   0x5   :  { %v47_v11 = vsub.f32 0.0, %v42_v7  ;;  %v48_v14 = vsub.f32 0.0, %v43_v9  ;;  %v49_v19 = vsub.f32 0.0, %v44_v15  ;;  %v138_v20 = vand.u32 2147483647, %v272_v17 }
   0x6   :  { %v50_v10 = vmul.f32 1.442695, %v45_v5  ;;  %v52_v13 = vmul.f32 1.442695, %v46_v8  ;;  %v37_v40 = vmax.f32 %v254_v4, 0.0  ;;  %v38_v41 = vmax.f32 %v259_v6, 0.0 }
   0x7   :  { %v54_v16 = vmul.f32 1.442695, %v47_v11  ;;  %v56_v18 = vmul.f32 1.442695, %v48_v14  ;;  %v58_v21 = vmul.f32 1.442695, %v49_v19 }
   0x8   :  { %175 = vpow2.f32 %v50_v10  ;;  %v139_v22 = vsub.f32 0.0, %v138_v20  ;;  %v39_v46 = vmax.f32 %v266_v12, 0.0  ;;  %v110_v5 = vld [vmem:[%s371_s2] sm:$0xff]  ;;  %v111_v14 = vld [vmem:[%s371_s2 + $0x8] sm:$0xff] }
   0x9   :  { %177 = vpow2.f32 %v52_v13  ;;  %v135_v12 = vld [vmem:[%s375_s3] sm:$0x1] }
   0xa   :  { %179 = vpow2.f32 %v54_v16  ;;  %v140_v24 = vmul.f32 1.442695, %v139_v22  ;;  %v112_v22 = vld [vmem:[%s371_s2 + $0x10] sm:$0xff] }
   0xb   :  { %181 = vpow2.f32 %v56_v18  ;;  %v25_v18 = vld [vmem:[%s372_s0] sm:$0xff] }
   0xc   :  { %183 = vpow2.f32 %v58_v21 }
   0xd   :  { %185 = vpow2.f32 %v140_v24 }
   0xe   :  { %v176_v23 = vpop.eup %175 }
   0xf   :  { %v178_v25 = vpop.eup %177  ;;  %v60_v26 = vadd.f32 1.0, %v176_v23  ;;  %v63_v27 = vmul.f32 -0.5, %v176_v23  ;;  %v66_v34 = vand.u32 2147483647, %v176_v23 }
  0x10   :  { %v180_v28 = vpop.eup %179  ;;  %v69_v30 = vadd.f32 1.0, %v178_v25  ;;  %v72_v31 = vmul.f32 -0.5, %v178_v25  ;;  %v75_v43 = vand.u32 2147483647, %v178_v25 }
  0x11   :  { %v182_v32 = vpop.eup %181  ;;  %187 = vlog2.f32 %v60_v26  ;;  %v78_v35 = vadd.f32 1.0, %v180_v28  ;;  %v64_v36 = vadd.f32 1.0, %v63_v27  ;;  %v81_v38 = vmul.f32 -0.5, %v180_v28 }
  0x12   :  { %189 = vlog2.f32 %v69_v30  ;;  %v73_v37 = vadd.f32 1.0, %v72_v31  ;;  %v184_v39 = vpop.eup %183  ;;  %v87_v42 = vadd.f32 1.0, %v182_v32  ;;  %v90_v45 = vmul.f32 -0.5, %v182_v32  ;;  %v27_v31 = vld [vmem:[%s372_s0 + $0x10] sm:$0xff] }
  0x13   :  { %191 = vlog2.f32 %v78_v35  ;;  %v82_v44 = vadd.f32 1.0, %v81_v38  ;;  %v84_v47 = vand.u32 2147483647, %v180_v28  ;;  %v96_v48 = vadd.f32 1.0, %v184_v39  ;;  %v186_v50 = vpop.eup %185 }
  0x14   :  { %193 = vlog2.f32 %v87_v42  ;;  %v99_v49 = vmul.f32 -0.5, %v184_v39  ;;  %v65_v51 = vmul.f32 %v176_v23, %v64_v36  ;;  %vm280_vm0 = vcmp.lt.f32.partialorder %v66_v34, 0.0004427343  ;;  %v28_v42 = vld [vmem:[%s372_s0 + $0x18] sm:$0xff] }
  0x15   :  { %v74_v53 = vmul.f32 %v178_v25, %v73_v37  ;;  %v91_v54 = vadd.f32 1.0, %v90_v45  ;;  %v93_v56 = vand.u32 2147483647, %v182_v32  ;;  %195 = vlog2.f32 %v96_v48  ;;  %v26_v25 = vld [vmem:[%s372_s0 + $0x8] sm:$0xff] }
  0x16   :  { %v142_v57 = vadd.f32 1.0, %v186_v50  ;;  %v145_v58 = vmul.f32 -0.5, %v186_v50  ;;  %vm284_vm1 = vcmp.lt.f32.partialorder %v75_v43, 0.0004427343  ;;  %v83_v62 = vmul.f32 %v180_v28, %v82_v44  ;;  %v114_v44 = vld [vmem:[%s371_s2 + $0x20] sm:$0xff] }
  0x17   :  { %v188_v55 = vpop.eup %187  ;;  %v100_v63 = vadd.f32 1.0, %v99_v49  ;;  %vm288_vm2 = vcmp.lt.f32.partialorder %v84_v47, 0.0004427343  ;;  %v102_v3 = vand.u32 2147483647, %v184_v39  ;;  %v92_v8 = vmul.f32 %v182_v32, %v91_v54  ;;  %v29_v49 = vld [vmem:[%s372_s0 + $0x20] sm:$0xff] }
  0x18   :  { %v190_v59 = vpop.eup %189  ;;  %v62_v60 = vmul.f32 0.6931472, %v188_v55  ;;  %197 = vlog2.f32 %v142_v57  ;;  %v146_v9 = vadd.f32 1.0, %v145_v58  ;;  %vm302_vm3 = vcmp.lt.f32.partialorder %v93_v56, 0.0004427343 }
  0x19   :  { %v192_v0 = vpop.eup %191  ;;  %v71_v1 = vmul.f32 0.6931472, %v190_v59  ;;  %v148_v16 = vand.u32 2147483647, %v186_v50  ;;  %v101_v23 = vmul.f32 %v184_v39, %v100_v63  ;;  %vm317_vm4 = vcmp.lt.f32.partialorder %v102_v3, 0.0004427343 }
  0x1a   :  { %v68_v4 = vsel %vm280_vm0, %v65_v51, %v62_v60  ;;  %v80_v7 = vmul.f32 0.6931472, %v192_v0  ;;  %v194_v10 = vpop.eup %193  ;;  %v147_v35 = vmul.f32 %v186_v50, %v146_v9  ;;  %v152_v51 = vld [vmem:[%s373_s5] sm:$0x1] }
  0x1b   :  { %v77_v11 = vsel %vm284_vm1, %v74_v53, %v71_v1  ;;  %v105_v13 = vadd.f32 %v68_v4, %v35_v29  ;;  %v89_v21 = vmul.f32 0.6931472, %v194_v10  ;;  %v196_v24 = vpop.eup %195  ;;  %v137_v29 = vmax.f32 %v272_v17, 0.0 }
  0x1c   :  { %v106_v19 = vadd.f32 %v77_v11, %v36_v33  ;;  %v86_v20 = vsel %vm288_vm2, %v83_v62, %v80_v7  ;;  %v113_v33 = vld [vmem:[%s371_s2 + $0x18] sm:$0xff]  ;;  %v98_v34 = vmul.f32 0.6931472, %v196_v24  ;;  %vm332_vm5 = vcmp.lt.f32.partialorder %v148_v16, 0.0004427343 }
  0x1d   :  { %v115_v26 = vmul.f32 %v110_v5, %v105_v13  ;;  %v107_v27 = vadd.f32 %v86_v20, %v37_v40  ;;  %v95_v32 = vsel %vm302_vm3, %v92_v8, %v89_v21 }
  0x1e   :  { %v116_v30 = vmul.f32 %v111_v14, %v106_v19  ;;  %v198_v36 = vpop.eup %197  ;;  %v108_v38 = vadd.f32 %v95_v32, %v38_v41  ;;  %v104_v43 = vsel %vm317_vm4, %v101_v23, %v98_v34 }
  0x1f   :  { %v120_v37 = vadd.f32 %v115_v26, %v25_v18  ;;  %v117_v17 = vmul.f32 %v112_v22, %v107_v27  ;;  %v144_v45 = vmul.f32 0.6931472, %v198_v36  ;;  %v109_v47 = vadd.f32 %v104_v43, %v39_v46 }
  0x20   :  { %v121_v40 = vadd.f32 %v116_v30, %v26_v25  ;;  %v118_v6 = vmul.f32 %v113_v33, %v108_v38 }
  0x21   :  { %v122_v41 = vadd.f32 %v117_v17, %v27_v31  ;;  %v150_v50 = vsel %vm332_vm5, %v147_v35, %v144_v45  ;;  %v119_v53 = vmul.f32 %v114_v44, %v109_v47 }
  0x22   :  { %v167_v48 = vpack.c.bf16 %v121_v40, %v120_v37  ;;  %v123_v52 = vadd.f32 %v118_v6, %v28_v42  ;;  %v151_v54 = vadd.f32 %v150_v50, %v137_v29 }
  0x23   :  { %v124_v55 = vadd.f32 %v119_v53, %v29_v49 }
  0x24   :  { %168 = vst [vmem:[%s374_s6] sm:$0xff] %v167_v48   ;;  %v172_v46 = vpack.c.bf16 %v123_v52, %v122_v41  ;;  %v153_v56 = vmul.f32 %v152_v51, %v151_v54 }
  0x25   :  { %v129_v57 = vpack.c.bf16 %v124_v55, %v124_v55 }
  0x26   :  { %174 = vst [vmem:[%s374_s6 + $0x8] sm:$0xff] %v172_v46   ;;  %v154_v58 = vadd.f32 %v153_v56, %v135_v12 }
  0x27   :  { %134 = vst [vmem:[%s374_s6 + $0x10] sm:$0xf] %v129_v57 }
  0x28   :  { %155 = vst [vmem:[%s376_s7] sm:$0x1] %v154_v58 }

// kernel: prob_conv2d_forward.3
= control target key start
LH: loop header
LB: loop body
LE: loop exit
PB: predicated region body
PF: predicated region fallthrough
CT: control target
= control target key end

     0   :  { %s5138_s12 = smov 0   ;;  %s5140_s13 = smov 0   ;;  %s6555_s0 = inlined_call_operand.vmem [shape: bf16[2,18,18,4], index: 0, kind: input, shape index: {}]   ;;  %s6556_s1 = inlined_call_operand.vmem [shape: bf16[40,128], index: 1, kind: input, shape index: {}]   ;;  %s6557_s2 = inlined_call_operand.vmem [shape: f32[1,128], index: 2, kind: input, shape index: {}]   ;;  %s6558_s3 = inlined_call_operand.vmem [shape: f32[2,16,16,128], index: 3, kind: output, shape index: {}]  }
   0x1   :  { %s5142_s14 = smov 0  }
   0x2 LB: > { %s32_s15 = sadd.s32 1, %s5112_s13  ;;  %p4383_p0 = scmp.ge.s32.totalorder %s5116_s14, 1  ;;  %s5116_s14 = sphi %s5142_s14, %s13_s14   ;;  %s5112_s13 = sphi %s5140_s13, %s6570_s13   ;;  %s5108_s12 = sphi %s5138_s12, %s6569_s12  }
   0x3   : > { %p34_p1 = scmp.ge.s32.totalorder %s32_s15, 2  ;;  %p177_p2 = scmp.lt.s32.totalorder %s5116_s14, 3 }
   0x5   : > { %s6572_s15 = smov (%p34_p1, %s32_s15), 0  ;;  %p178_p3 = pnand %p4383_p0, %p177_p2 }
   0x7   : > { %181 = sbr.rel (%p178_p3) target bundleno = 758 (0x2f6), region = 32 }
   0xc   : > { %v683_v0 = vld [vmem:[%s6556_s1] sm:$0xc]  ;;  %p216_p4 = scmp.lt.s32.totalorder %s5108_s12, 1  ;;  %v1261_v3 = vld [vmem:[%s6556_s1 + $0x4] sm:$0x3]  ;;  %vm785_vm0 = vcmask 1041408  }
   0xd   : > { %v733_v1 = vunpack.c.l.b16 %v683_v0  ;;  %v279_v4 = vld [vmem:[%s6556_s1] sm:$0x3]  ;;  %v2207_v5 = vld [vmem:[%s6556_s1 + $0x8] sm:$0x3]  ;;  %vm296_vm1 = vsmask.f32 3328 }
   0xe   : > { %s6574_s12 = smov (!%p216_p4, %s5108_s12), 1  ;;  %vm297_vm2 = vsmask.f32 7440  ;;  %v1359_v7 = vsel %vm785_vm0, %v1261_v3, 0  ;;  %v1518_v8 = vld [vmem:[%s6556_s1 + $0x4] sm:$0xc] }
   0xf   : > { %v734_v2 = vpack.c.b16 %v733_v1, %v733_v1  ;;  %s5017_s22 = smul.u32 216, %s6574_s12  ;;  %v1007_v9 = vsel %vm785_vm0, %v279_v4, 0  ;;  %v2305_v13 = vsel %vm785_vm0, %v2207_v5, 0  ;;  %v1600_v22 = vunpack.c.l.b16 %v1518_v8  ;;  %vm5193_vm4 = vmor %vm296_vm1, %vm297_vm2  ;;  %s4965_s11 = sshll.u32 %s6574_s12, 8 }
  0x10   : > { %vm736_vm3 = vcmask 31744   ;;  %vm1146_vm5 = vcmask 1042432   ;;  %vm1147_vm6 = vcmask 1046532   ;;  %s6241_s19 = scalar_lea.vmem %s6558_s3, %s4965_s11 }
  0x11   : > { %v735_v6 = vrot.slane %v734_v2, 2  ;;  %s5174_s27 = scalar_lea.vmem %s6555_s0, %s5017_s22  ;;  %v1601_v42 = vpack.c.b16 %v1600_v22, %v1600_v22  ;;  %vm5368_vm7 = vmor %vm1146_vm5, %vm1147_vm6 }
  0x12   : > { %v255_v11 = vld [vmem:[%s5174_s27 + $0x30] sm:$0xf]  ;;  %v256_v12 = vld [vmem:[%s5174_s27 + $0x34] sm:$0xf]  ;;  %v284_v14 = vld [vmem:[%s5174_s27 + $0x38] sm:$0x1] }
  0x13   : > { %v787_v10 = vsel %vm785_vm0, %v735_v6, 0  ;;  %v396_v15 = vshrl.u32 %v255_v11, 16  ;;  %v399_v16 = vshll.u32 %v255_v11, 16  ;;  %v405_v17 = vshll.u32 %v256_v12, 16  ;;  %v263_v20 = vld [vmem:[%s5174_s27 + $0x60] sm:$0xf] }
  0x14   : > { %5014 = vmatpush.bf16.msra.mxu1 %v787_v10  ;;  %5015 = vmatpush.bf16.msra.mxu2 %v787_v10  ;;  %v409_v18 = vshrl.u32 %v256_v12, 16  ;;  %v415_v19 = vshll.u32 %v284_v14, 16  ;;  %v264_v21 = vld [vmem:[%s5174_s27 + $0x64] sm:$0xf]  ;;  %v288_v27 = vld [vmem:[%s5174_s27 + $0x68] sm:$0x1] }
  0x15   : > { %5016 = vmatpush.bf16.msra.mxu3 %v787_v10  ;;  %796 = vmatpush.bf16.msra.mxu0 %v787_v10  ;;  %v398_v23 = vrot.slane %v396_v15, 4  ;;  %v401_v24 = vrot.slane %v399_v16, 5  ;;  %v407_v25 = vrot.slane %v405_v17, 5  ;;  %v492_v29 = vshrl.u32 %v263_v20, 16  ;;  %v271_v36 = vld [vmem:[%s5174_s27 + $0x90] sm:$0xf] }
  0x16   : > { %v411_v26 = vrot.slane %v409_v18, 4  ;;  %v417_v28 = vrot.slane %v415_v19, 5  ;;  %v495_v30 = vshll.u32 %v263_v20, 16  ;;  %v501_v31 = vshll.u32 %v264_v21, 16  ;;  %v272_v37 = vld [vmem:[%s5174_s27 + $0x94] sm:$0xf] }
  0x17   : > { %v402_v32 = vor.u32 %v401_v24, %v398_v23  ;;  %v505_v34 = vshrl.u32 %v264_v21, 16  ;;  %v511_v35 = vshll.u32 %v288_v27, 16  ;;  %v494_v39 = vrot.slane %v492_v29, 4  ;;  %v292_v54 = vld [vmem:[%s5174_s27 + $0x98] sm:$0x1] }
  0x18   : > { %1368 = vmatpush.bf16.msrb.mxu2 %v1359_v7  ;;  %1016 = vmatpush.bf16.msrb.mxu1 %v1007_v9  ;;  %v412_v33 = vor.u32 %v411_v26, %v407_v25  ;;  %v497_v40 = vrot.slane %v495_v30, 5  ;;  %v503_v41 = vrot.slane %v501_v31, 5  ;;  %v588_v48 = vshrl.u32 %v271_v36, 16  ;;  %v247_v0 = vld [vmem:[%s5174_s27] sm:$0xf] }
  0x19   : > { %2314 = vmatpush.bf16.msrb.mxu0 %v2305_v13  ;;  %v403_v43 = vrot.slane %v402_v32, 4  ;;  %v507_v45 = vrot.slane %v505_v34, 4  ;;  %v513_v46 = vrot.slane %v511_v35, 5  ;;  %v591_v49 = vshll.u32 %v271_v36, 16  ;;  %v5206_v4 = vld [vmem:[%s5174_s27 + $0x4] sm:$0xf] }
  0x1a   : > { %v413_v44 = vrot.slane %v412_v33, 4  ;;  %v498_v47 = vor.u32 %v497_v40, %v494_v39  ;;  %v597_v50 = vshll.u32 %v272_v37, 16  ;;  %v601_v55 = vshrl.u32 %v272_v37, 16  ;;  %v5211_v10 = vld [vmem:[%s5174_s27 + $0x8] sm:$0x1] }
  0x1b   : > { %v408_v51 = vsel %vm5193_vm4, %v403_v43, %v407_v25  ;;  %v508_v53 = vor.u32 %v507_v45, %v503_v41  ;;  %v590_v59 = vrot.slane %v588_v48, 4  ;;  %v593_v61 = vrot.slane %v591_v49, 5  ;;  %v257_v23 = vld [vmem:[%s5174_s27 + $0x3c] sm:$0xf]  ;;  %v5227_v32 = vld [vmem:[%s5174_s27 + $0x44] sm:$0x1] }
  0x1c   : > { %v418_v52 = vsel %vm5193_vm4, %v413_v44, %v417_v28  ;;  %v692_v56 = vunpack.c.l.b16 %v408_v51  ;;  %v499_v58 = vrot.slane %v498_v47, 4  ;;  %v599_v62 = vrot.slane %v597_v50, 5  ;;  %v5223_v28 = vld [vmem:[%s5174_s27 + $0x40] sm:$0xf]  ;;  %v265_v37 = vld [vmem:[%s5174_s27 + $0x6c] sm:$0xf] }
  0x1d   : > { %v693_v57 = vunpack.c.l.b16 %v418_v52  ;;  %v509_v60 = vrot.slane %v508_v53, 4  ;;  %v603_v63 = vrot.slane %v601_v55, 4  ;;  %v607_v3 = vshll.u32 %v292_v54, 16  ;;  %v266_v47 = vld [vmem:[%s5174_s27 + $0x70] sm:$0xf] }
  0x1e   : > { %v504_v2 = vsel %vm5193_vm4, %v499_v58, %v503_v41  ;;  %v1602_v5 = vrot.slane %v1601_v42, 2  ;;  %v594_v8 = vor.u32 %v593_v61, %v590_v59  ;;  %v300_v13 = vshrl.u32 %v247_v0, 16  ;;  %v289_v51 = vld [vmem:[%s5174_s27 + $0x74] sm:$0x1] }
  0x1f   : > { %v720_v1 = vpack.c.b16 %v693_v57, %v692_v56  ;;  %v514_v6 = vsel %vm5193_vm4, %v509_v60, %v513_v46  ;;  %v700_v7 = vunpack.c.l.b16 %v504_v2  ;;  %v604_v9 = vor.u32 %v603_v63, %v599_v62 }
  0x20   : > { %v701_v11 = vunpack.c.l.b16 %v514_v6  ;;  %v609_v12 = vrot.slane %v607_v3, 5  ;;  %v303_v14 = vshll.u32 %v247_v0, 16  ;;  %v595_v15 = vrot.slane %v594_v8, 4  ;;  %v274_v6 = vld [vmem:[%s5174_s27 + $0xa0] sm:$0xf] }
  0x21   : > { %4391 = vmatmul.msk.bf16.vlgmr.msra.gmra.mxu1 %vm736_vm3, %v720_v1  ;;  %v605_v16 = vrot.slane %v604_v9, 4  ;;  %v309_v17 = vshll.u32 %v5206_v4, 16  ;;  %v313_v18 = vshrl.u32 %v5206_v4, 16  ;;  %v302_v20 = vrot.slane %v300_v13, 4  ;;  %v273_v1 = vld [vmem:[%s5174_s27 + $0x9c] sm:$0xf] }
  0x22   : > { %v724_v19 = vpack.c.b16 %v701_v11, %v700_v7  ;;  %v305_v21 = vrot.slane %v303_v14, 5  ;;  %v319_v22 = vshll.u32 %v5211_v10, 16  ;;  %v600_v24 = vsel %vm5193_vm4, %v595_v15, %v599_v62  ;;  %v293_v14 = vld [vmem:[%s5174_s27 + $0xa4] sm:$0x1] }
  0x23   : > { %v610_v25 = vsel %vm5193_vm4, %v605_v16, %v609_v12  ;;  %v311_v26 = vrot.slane %v309_v17, 5  ;;  %v315_v27 = vrot.slane %v313_v18, 4  ;;  %v708_v29 = vunpack.c.l.b16 %v600_v24 }
  0x24   : > { %4395 = vmatmul.msk.bf16.vlgmr.msra.gmra.mxu2 %vm736_vm3, %v724_v19  ;;  %v709_v30 = vunpack.c.l.b16 %v610_v25  ;;  %v306_v31 = vor.u32 %v305_v21, %v302_v20  ;;  %v321_v34 = vrot.slane %v319_v22, 5  ;;  %v1652_v35 = vsel %vm785_vm0, %v1602_v5, 0 }
  0x25   : > { %v316_v33 = vor.u32 %v315_v27, %v311_v26  ;;  %v420_v36 = vshrl.u32 %v257_v23, 16  ;;  %1661 = vmatpush.bf16.msrb.mxu3 %v1652_v35  ;;  %v423_v41 = vshll.u32 %v257_v23, 16  ;;  %v429_v42 = vshll.u32 %v5223_v28, 16  ;;  %v5253_v35 = vld [vmem:[%s5174_s27 + $0x10] sm:$0xf] }
  0x26   : > { %v728_v39 = vpack.c.b16 %v709_v30, %v708_v29  ;;  %v307_v40 = vrot.slane %v306_v31, 4  ;;  %v433_v45 = vshrl.u32 %v5223_v28, 16  ;;  %v439_v46 = vshll.u32 %v5227_v32, 16  ;;  %v249_v30 = vld [vmem:[%s5174_s27 + $0xc] sm:$0xf] }
  0x27   : > { %v317_v43 = vrot.slane %v316_v33, 4  ;;  %v422_v44 = vrot.slane %v420_v36, 4  ;;  %v425_v49 = vrot.slane %v423_v41, 5  ;;  %v431_v50 = vrot.slane %v429_v42, 5  ;;  %v5256_v36 = vld [vmem:[%s5174_s27 + $0x14] sm:$0x1] }
  0x28   : > { %4399 = vmatmul.msk.bf16.vlgmr.msra.gmra.mxu3 %vm736_vm3, %v728_v39  ;;  %v312_v48 = vsel %vm5193_vm4, %v307_v40, %v311_v26  ;;  %v516_v52 = vshrl.u32 %v265_v37, 16  ;;  %v435_v55 = vrot.slane %v433_v45, 4  ;;  %v441_v56 = vrot.slane %v439_v46, 5 }
  0x29   : > { %v322_v53 = vsel %vm5193_vm4, %v317_v43, %v321_v34  ;;  %v684_v54 = vunpack.c.l.b16 %v312_v48  ;;  %v426_v58 = vor.u32 %v425_v49, %v422_v44  ;;  %v519_v60 = vshll.u32 %v265_v37, 16 }
  0x2a   : > { %v685_v57 = vunpack.c.l.b16 %v322_v53  ;;  %v518_v59 = vrot.slane %v516_v52, 4  ;;  %v436_v61 = vor.u32 %v435_v55, %v431_v50  ;;  %v525_v62 = vshll.u32 %v266_v47, 16  ;;  %v5268_v55 = vld [vmem:[%s5174_s27 + $0x4c] sm:$0xf] }
  0x2b   : > { %v529_v63 = vshrl.u32 %v266_v47, 16  ;;  %v535_v0 = vshll.u32 %v289_v51, 16  ;;  %v427_v3 = vrot.slane %v426_v58, 4  ;;  %v521_v5 = vrot.slane %v519_v60, 5 }
  0x2c   : > { %v716_v2 = vpack.c.b16 %v685_v57, %v684_v54  ;;  %v437_v7 = vrot.slane %v436_v61, 4  ;;  %v527_v8 = vrot.slane %v525_v62, 5  ;;  %v612_v15 = vshrl.u32 %v273_v1, 16  ;;  %v5272_v62 = vld [vmem:[%s5174_s27 + $0x50] sm:$0x1] }
  0x2d   : > { %v531_v9 = vrot.slane %v529_v63, 4  ;;  %v537_v11 = vrot.slane %v535_v0, 5  ;;  %v432_v12 = vsel %vm5193_vm4, %v427_v3, %v431_v50  ;;  %v522_v13 = vor.u32 %v521_v5, %v518_v59  ;;  %v259_v50 = vld [vmem:[%s5174_s27 + $0x48] sm:$0xf] }
  0x2e   : > { %4387 = vmatmul.msk.bf16.vlgmr.msra.gmra.mxu0 %vm736_vm3, %v716_v2  ;;  %v615_v16 = vshll.u32 %v273_v1, 16  ;;  %v442_v17 = vsel %vm5193_vm4, %v437_v7, %v441_v56  ;;  %v694_v18 = vunpack.c.l.b16 %v432_v12  ;;  %v621_v20 = vshll.u32 %v274_v6, 16 }
  0x2f   : > { %v532_v19 = vor.u32 %v531_v9, %v527_v8  ;;  %v695_v21 = vunpack.c.l.b16 %v442_v17  ;;  %v523_v22 = vrot.slane %v522_v13, 4  ;;  %v614_v23 = vrot.slane %v612_v15, 4 }
  0x30   : > { %v617_v24 = vrot.slane %v615_v16, 5  ;;  %v623_v26 = vrot.slane %v621_v20, 5  ;;  %v625_v27 = vshrl.u32 %v274_v6, 16  ;;  %v631_v29 = vshll.u32 %v293_v14, 16  ;;  %v267_v6 = vld [vmem:[%s5174_s27 + $0x78] sm:$0xf] }
  0x31   : > { %v533_v25 = vrot.slane %v532_v19, 4  ;;  %v721_v31 = vpack.c.b16 %v695_v21, %v694_v18  ;;  %v528_v33 = vsel %vm5193_vm4, %v523_v22, %v527_v8  ;;  %v324_v44 = vshrl.u32 %v249_v30, 16  ;;  %v268_v19 = vld [vmem:[%s5174_s27 + $0x7c] sm:$0xf]  ;;  %v290_v20 = vld [vmem:[%s5174_s27 + $0x80] sm:$0x1] }
  0x32   : > { %v618_v34 = vor.u32 %v617_v24, %v614_v23  ;;  %v702_v39 = vunpack.c.l.b16 %v528_v33  ;;  %v627_v40 = vrot.slane %v625_v27, 4  ;;  %v633_v41 = vrot.slane %v631_v29, 5 }
  0x33   : > { %v538_v37 = vsel %vm5193_vm4, %v533_v25, %v537_v11  ;;  %4392 = vmatmul.msk.bf16.gmra.mxu1 %vm736_vm3, %v721_v31  ;;  %v327_v45 = vshll.u32 %v249_v30, 16  ;;  %v333_v47 = vshll.u32 %v5253_v35, 16  ;;  %v337_v48 = vshrl.u32 %v5253_v35, 16 }
  0x34   : > { %v703_v42 = vunpack.c.l.b16 %v538_v37  ;;  %v619_v43 = vrot.slane %v618_v34, 4  ;;  %v628_v46 = vor.u32 %v627_v40, %v623_v26  ;;  %v343_v49 = vshll.u32 %v5256_v36, 16 }
  0x35   : > { %v326_v53 = vrot.slane %v324_v44, 4  ;;  %v329_v54 = vrot.slane %v327_v45, 5  ;;  %v335_v58 = vrot.slane %v333_v47, 5  ;;  %v339_v59 = vrot.slane %v337_v48, 4  ;;  %v294_v48 = vld [vmem:[%s5174_s27 + $0xb0] sm:$0x1] }
  0x36   : > { %v725_v51 = vpack.c.b16 %v703_v42, %v702_v39  ;;  %v624_v52 = vsel %vm5193_vm4, %v619_v43, %v623_v26  ;;  %v629_v56 = vrot.slane %v628_v46, 4  ;;  %v345_v61 = vrot.slane %v343_v49, 5  ;;  %v275_v39 = vld [vmem:[%s5174_s27 + $0xa8] sm:$0xf]  ;;  %v276_v43 = vld [vmem:[%s5174_s27 + $0xac] sm:$0xf] }
  0x37   : > { %v710_v57 = vunpack.c.l.b16 %v624_v52  ;;  %v330_v60 = vor.u32 %v329_v54, %v326_v53  ;;  %v444_v63 = vshrl.u32 %v259_v50, 16  ;;  %v447_v0 = vshll.u32 %v259_v50, 16 }
  0x38   : > { %4396 = vmatmul.msk.bf16.gmra.mxu2 %vm736_vm3, %v725_v51  ;;  %v634_v1 = vsel %vm5193_vm4, %v629_v56, %v633_v41  ;;  %v340_v2 = vor.u32 %v339_v59, %v335_v58  ;;  %v453_v3 = vshll.u32 %v5268_v55, 16  ;;  %v457_v5 = vshrl.u32 %v5268_v55, 16 }
  0x39   : > { %v711_v7 = vunpack.c.l.b16 %v634_v1  ;;  %v331_v8 = vrot.slane %v330_v60, 4  ;;  %v446_v9 = vrot.slane %v444_v63, 4  ;;  %v449_v11 = vrot.slane %v447_v0, 5 }
  0x3a   : > { %v341_v12 = vrot.slane %v340_v2, 4  ;;  %v455_v13 = vrot.slane %v453_v3, 5  ;;  %v459_v14 = vrot.slane %v457_v5, 4  ;;  %v463_v15 = vshll.u32 %v5272_v62, 16  ;;  %v5297_v5 = vld [vmem:[%s5174_s27 + $0x1c] sm:$0xf] }
  0x3b   : > { %v729_v16 = vpack.c.b16 %v711_v7, %v710_v57  ;;  %v336_v17 = vsel %vm5193_vm4, %v331_v8, %v335_v58  ;;  %v450_v18 = vor.u32 %v449_v11, %v446_v9  ;;  %v540_v21 = vshrl.u32 %v267_v6, 16  ;;  %v251_v58 = vld [vmem:[%s5174_s27 + $0x18] sm:$0xf]  ;;  %v5303_v8 = vld [vmem:[%s5174_s27 + $0x20] sm:$0x1] }
  0x3c   : > { %v346_v22 = vsel %vm5193_vm4, %v341_v12, %v345_v61  ;;  %v686_v23 = vunpack.c.l.b16 %v336_v17  ;;  %v460_v24 = vor.u32 %v459_v14, %v455_v13  ;;  %v465_v25 = vrot.slane %v463_v15, 5  ;;  %v261_v15 = vld [vmem:[%s5174_s27 + $0x54] sm:$0xf] }
  0x3d   : > { %4400 = vmatmul.msk.bf16.gmra.mxu3 %vm736_vm3, %v729_v16  ;;  %v687_v26 = vunpack.c.l.b16 %v346_v22  ;;  %v451_v27 = vrot.slane %v450_v18, 4  ;;  %v542_v29 = vrot.slane %v540_v21, 4  ;;  %v543_v30 = vshll.u32 %v267_v6, 16 }
  0x3e   : > { %v461_v31 = vrot.slane %v460_v24, 4  ;;  %v549_v33 = vshll.u32 %v268_v19, 16  ;;  %v553_v34 = vshrl.u32 %v268_v19, 16  ;;  %v559_v37 = vshll.u32 %v290_v20, 16 }
  0x3f   : > { %v717_v40 = vpack.c.b16 %v687_v26, %v686_v23  ;;  %v456_v41 = vsel %vm5193_vm4, %v451_v27, %v455_v13  ;;  %v545_v42 = vrot.slane %v543_v30, 5  ;;  %v636_v52 = vshrl.u32 %v275_v39, 16  ;;  %v5312_v27 = vld [vmem:[%s5174_s27 + $0x58] sm:$0xf] }
  0x40   : > { %v466_v44 = vsel %vm5193_vm4, %v461_v31, %v465_v25  ;;  %v696_v45 = vunpack.c.l.b16 %v456_v41  ;;  %v551_v46 = vrot.slane %v549_v33, 5  ;;  %v555_v47 = vrot.slane %v553_v34, 4 }
  0x41   : > { %4388 = vmatmul.msk.bf16.gmra.mxu0 %vm736_vm3, %v717_v40  ;;  %v697_v49 = vunpack.c.l.b16 %v466_v44  ;;  %v546_v50 = vor.u32 %v545_v42, %v542_v29  ;;  %v561_v51 = vrot.slane %v559_v37, 5  ;;  %v639_v54 = vshll.u32 %v275_v39, 16  ;;  %v5319_v37 = vld [vmem:[%s5174_s27 + $0x5c] sm:$0x1]  ;;  %v269_v39 = vld [vmem:[%s5174_s27 + $0x84] sm:$0xf] }
  0x42   : > { %v556_v53 = vor.u32 %v555_v47, %v551_v46  ;;  %v645_v56 = vshll.u32 %v276_v43, 16  ;;  %v649_v57 = vshrl.u32 %v276_v43, 16  ;;  %v638_v61 = vrot.slane %v636_v52, 4 }
  0x43   : > { %v722_v59 = vpack.c.b16 %v697_v49, %v696_v45  ;;  %v547_v60 = vrot.slane %v546_v50, 4  ;;  %v655_v63 = vshll.u32 %v294_v48, 16  ;;  %v641_v1 = vrot.slane %v639_v54, 5 }
  0x44   : > { %v557_v0 = vrot.slane %v556_v53, 4  ;;  %v647_v2 = vrot.slane %v645_v56, 5  ;;  %v651_v3 = vrot.slane %v649_v57, 4  ;;  %v348_v9 = vshrl.u32 %v251_v58, 16  ;;  %v270_v57 = vld [vmem:[%s5174_s27 + $0x88] sm:$0xf] }
  0x45   : > { %4393 = vmatmul.msk.bf16.gmra.mxu1 %vm736_vm3, %v722_v59  ;;  %v552_v6 = vsel %vm5193_vm4, %v547_v60, %v551_v46  ;;  %v657_v7 = vrot.slane %v655_v63, 5  ;;  %v642_v13 = vor.u32 %v641_v1, %v638_v61  ;;  %v351_v18 = vshll.u32 %v251_v58, 16  ;;  %v291_v60 = vld [vmem:[%s5174_s27 + $0x8c] sm:$0x1] }
  0x46   : > { %v562_v11 = vsel %vm5193_vm4, %v557_v0, %v561_v51  ;;  %v704_v12 = vunpack.c.l.b16 %v552_v6  ;;  %v652_v14 = vor.u32 %v651_v3, %v647_v2  ;;  %v350_v17 = vrot.slane %v348_v9, 4 }
  0x47   : > { %v705_v16 = vunpack.c.l.b16 %v562_v11  ;;  %v357_v19 = vshll.u32 %v5297_v5, 16  ;;  %v643_v20 = vrot.slane %v642_v13, 4  ;;  %v361_v22 = vshrl.u32 %v5297_v5, 16 }
  0x48   : > { %v653_v21 = vrot.slane %v652_v14, 4  ;;  %v367_v23 = vshll.u32 %v5303_v8, 16  ;;  %v353_v25 = vrot.slane %v351_v18, 5  ;;  %v468_v29 = vshrl.u32 %v261_v15, 16 }
  0x49   : > { %v726_v24 = vpack.c.b16 %v705_v16, %v704_v12  ;;  %v359_v26 = vrot.slane %v357_v19, 5  ;;  %v648_v30 = vsel %vm5193_vm4, %v643_v20, %v647_v2  ;;  %v363_v33 = vrot.slane %v361_v22, 4  ;;  %v277_v12 = vld [vmem:[%s5174_s27 + $0xb4] sm:$0xf]  ;;  %v278_v20 = vld [vmem:[%s5174_s27 + $0xb8] sm:$0xf] }
  0x4a   : > { %v658_v31 = vsel %vm5193_vm4, %v653_v21, %v657_v7  ;;  %v369_v34 = vrot.slane %v367_v23, 5  ;;  %v712_v40 = vunpack.c.l.b16 %v648_v30  ;;  %v354_v42 = vor.u32 %v353_v25, %v350_v17 }
  0x4b   : > { %4397 = vmatmul.msk.bf16.gmra.mxu2 %vm736_vm3, %v726_v24  ;;  %v713_v41 = vunpack.c.l.b16 %v658_v31  ;;  %v470_v43 = vrot.slane %v468_v29, 4  ;;  %v364_v44 = vor.u32 %v363_v33, %v359_v26  ;;  %v471_v45 = vshll.u32 %v261_v15, 16  ;;  %v295_v24 = vld [vmem:[%s5174_s27 + $0xbc] sm:$0x1] }
  0x4c   : > { %v477_v46 = vshll.u32 %v5312_v27, 16  ;;  %v481_v47 = vshrl.u32 %v5312_v27, 16  ;;  %v355_v49 = vrot.slane %v354_v42, 4  ;;  %v487_v50 = vshll.u32 %v5319_v37, 16 }
  0x4d   : > { %v730_v48 = vpack.c.b16 %v713_v41, %v712_v40  ;;  %v564_v51 = vshrl.u32 %v269_v39, 16  ;;  %v365_v52 = vrot.slane %v364_v44, 4  ;;  %v473_v53 = vrot.slane %v471_v45, 5  ;;  %v253_v41 = vld [vmem:[%s5174_s27 + $0x24] sm:$0xf] }
  0x4e   : > { %v479_v54 = vrot.slane %v477_v46, 5  ;;  %v483_v56 = vrot.slane %v481_v47, 4  ;;  %v360_v58 = vsel %vm5193_vm4, %v355_v49, %v359_v26  ;;  %v489_v59 = vrot.slane %v487_v50, 5  ;;  %v5345_v46 = vld [vmem:[%s5174_s27 + $0x28] sm:$0xf] }
  0x4f   : > { %4401 = vmatmul.msk.bf16.gmra.mxu3 %vm736_vm3, %v730_v48  ;;  %v566_v61 = vrot.slane %v564_v51, 4  ;;  %v567_v63 = vshll.u32 %v269_v39, 16  ;;  %v370_v0 = vsel %vm5193_vm4, %v365_v52, %v369_v34  ;;  %v688_v1 = vunpack.c.l.b16 %v360_v58  ;;  %v5348_v51 = vld [vmem:[%s5174_s27 + $0x2c] sm:$0x1] }
  0x50   : > { %v474_v2 = vor.u32 %v473_v53, %v470_v43  ;;  %v484_v3 = vor.u32 %v483_v56, %v479_v54  ;;  %v689_v6 = vunpack.c.l.b16 %v370_v0  ;;  %v573_v9 = vshll.u32 %v270_v57, 16 }
  0x51   : > { %v569_v7 = vrot.slane %v567_v63, 5  ;;  %v577_v11 = vshrl.u32 %v270_v57, 16  ;;  %v583_v15 = vshll.u32 %v291_v60, 16  ;;  %v660_v25 = vshrl.u32 %v277_v12, 16 }
  0x52   : > { %v475_v13 = vrot.slane %v474_v2, 4  ;;  %v485_v14 = vrot.slane %v484_v3, 4  ;;  %v718_v16 = vpack.c.b16 %v689_v6, %v688_v1  ;;  %v575_v18 = vrot.slane %v573_v9, 5  ;;  %v4627_v9 = vld [vmem:[%s5174_s27 + $0xc] sm:$0xf] }
  0x53   : > { %v570_v17 = vor.u32 %v569_v7, %v566_v61  ;;  %v579_v19 = vrot.slane %v577_v11, 4  ;;  %v585_v23 = vrot.slane %v583_v15, 5  ;;  %v662_v33 = vrot.slane %v660_v25, 4 }
  0x54   : > { %v480_v21 = vsel %vm5193_vm4, %v475_v13, %v479_v54  ;;  %v490_v22 = vsel %vm5193_vm4, %v485_v14, %v489_v59  ;;  %4389 = vmatmul.msk.bf16.gmra.mxu0 %vm736_vm3, %v718_v16  ;;  %v663_v34 = vshll.u32 %v277_v12, 16  ;;  %v669_v39 = vshll.u32 %v278_v20, 16  ;;  %v2865_v14 = vld [vmem:[%s6556_s1 + $0xc] sm:$0x3] }
  0x55   : > { %v698_v26 = vunpack.c.l.b16 %v480_v21  ;;  %v699_v29 = vunpack.c.l.b16 %v490_v22  ;;  %v571_v30 = vrot.slane %v570_v17, 4  ;;  %v580_v31 = vor.u32 %v579_v19, %v575_v18 }
  0x56   : > { %v673_v40 = vshrl.u32 %v278_v20, 16  ;;  %v679_v45 = vshll.u32 %v295_v24, 16  ;;  %v665_v48 = vrot.slane %v663_v34, 5  ;;  %v671_v49 = vrot.slane %v669_v39, 5 }
  0x57   : > { %v723_v42 = vpack.c.b16 %v699_v29, %v698_v26  ;;  %v576_v43 = vsel %vm5193_vm4, %v571_v30, %v575_v18  ;;  %v581_v44 = vrot.slane %v580_v31, 4  ;;  %v1154_v52 = vrot.slane %v5211_v10, 5  ;;  %v1098_v10 = vld [vmem:[%s5174_s27] sm:$0xe]  ;;  %v4628_v18 = vld [vmem:[%s5174_s27 + $0x10] sm:$0xf] }
  0x58   : > { %v706_v47 = vunpack.c.l.b16 %v576_v43  ;;  %v675_v50 = vrot.slane %v673_v40, 4  ;;  %v681_v54 = vrot.slane %v679_v45, 5  ;;  %v372_v56 = vshrl.u32 %v253_v41, 16 }
  0x59   : > { %4394 = vmatmul.msk.bf16.gmra.mxu1 %vm736_vm3, %v723_v42  ;;  %v586_v53 = vsel %vm5193_vm4, %v581_v44, %v585_v23  ;;  %v666_v58 = vor.u32 %v665_v48, %v662_v33  ;;  %v375_v60 = vshll.u32 %v253_v41, 16  ;;  %v381_v63 = vshll.u32 %v5345_v46, 16  ;;  %v4629_v42 = vld [vmem:[%s5174_s27 + $0x14] sm:$0x1]  ;;  %v3550_v48 = vld [vmem:[%s6556_s1 + $0xc] sm:$0xc] }
  0x5a   : > { %v707_v57 = vunpack.c.l.b16 %v586_v53  ;;  %v676_v59 = vor.u32 %v675_v50, %v671_v49  ;;  %v374_v61 = vrot.slane %v372_v56, 4  ;;  %v385_v0 = vshrl.u32 %v5345_v46, 16  ;;  %v4966_v56 = vld [vmem:[%s5174_s27] sm:$0xff] }
  0x5b   : > { %v391_v1 = vshll.u32 %v5348_v51, 16  ;;  %v667_v3 = vrot.slane %v666_v58, 4  ;;  %v377_v7 = vrot.slane %v375_v60, 5  ;;  %v383_v11 = vrot.slane %v381_v63, 5  ;;  %v2604_v60 = vld [vmem:[%s6556_s1 + $0x8] sm:$0xc] }
  0x5c   : > { %v727_v2 = vpack.c.b16 %v707_v57, %v706_v47  ;;  %v677_v6 = vrot.slane %v676_v59, 4  ;;  %v387_v12 = vrot.slane %v385_v0, 4  ;;  %v4483_v23 = vrot.slane %v1098_v10, 9 }
  0x5d   : > { %v393_v13 = vrot.slane %v391_v1, 5  ;;  %v672_v15 = vsel %vm5193_vm4, %v667_v3, %v671_v49  ;;  %v378_v17 = vor.u32 %v377_v7, %v374_v61  ;;  %v1151_v25 = vrot.slane %v5206_v4, 5  ;;  %v3951_v61 = vld [vmem:[%s6556_s1 + $0x10] sm:$0x3] }
  0x5e   : > { %4398 = vmatmul.msk.bf16.gmra.mxu2 %vm736_vm3, %v727_v2  ;;  %v682_v16 = vsel %vm5193_vm4, %v677_v6, %v681_v54  ;;  %v714_v19 = vunpack.c.l.b16 %v672_v15  ;;  %v388_v21 = vor.u32 %v387_v12, %v383_v11  ;;  %v2995_v26 = vsel %vm785_vm0, %v2865_v14, 0 }
  0x5f   : > { %v715_v20 = vunpack.c.l.b16 %v682_v16  ;;  %v379_v24 = vrot.slane %v378_v17, 4  ;;  %v1824_v29 = vshrl.u32 %v4627_v9, 16  ;;  %3004 = vmatpush.bf16.msra.mxu2 %v2995_v26  ;;  %v1827_v33 = vshll.u32 %v4627_v9, 16  ;;  %v4631_v16 = vld [vmem:[%s5174_s27 + $0x1c] sm:$0xf] }
  0x60   : > { %v389_v31 = vrot.slane %v388_v21, 4  ;;  %v1833_v34 = vshll.u32 %v4628_v18, 16  ;;  %v1152_v40 = vsel %vm5368_vm7, %v4483_v23, %v1151_v25  ;;  %v1153_v41 = vrot.slane %v1151_v25, 4 }
  0x61   : > { %v731_v30 = vpack.c.b16 %v715_v20, %v714_v19  ;;  %v384_v39 = vsel %vm5193_vm4, %v379_v24, %v383_v11  ;;  %v1826_v43 = vrot.slane %v1824_v29, 4  ;;  %v1262_v45 = vunpack.c.l.b16 %v1152_v40  ;;  %v4630_v11 = vld [vmem:[%s5174_s27 + $0x18] sm:$0xf]  ;;  %v1099_v19 = vld [vmem:[%s5174_s27 + $0xc] sm:$0xe] }
  0x62   : > { %v394_v4 = vsel %vm5193_vm4, %v389_v31, %v393_v13  ;;  %v690_v44 = vunpack.c.l.b16 %v384_v39  ;;  %v1829_v47 = vrot.slane %v1827_v33, 5  ;;  %v1155_v50 = vsel %vm5368_vm7, %v1153_v41, %v1154_v52  ;;  %v4982_v29 = vld [vmem:[%s5174_s27 + $0xc] sm:$0xff] }
  0x63   : > { %4402 = vmatmul.msk.bf16.gmra.mxu3 %vm736_vm3, %v731_v30  ;;  %v691_v49 = vunpack.c.l.b16 %v394_v4  ;;  %v1835_v53 = vrot.slane %v1833_v34, 5  ;;  %v1837_v54 = vshrl.u32 %v4628_v18, 16  ;;  %v1263_v57 = vunpack.c.l.b16 %v1155_v50  ;;  %v4632_v4 = vld [vmem:[%s5174_s27 + $0x20] sm:$0x1] }
  0x64   : > { %v1830_v58 = vor.u32 %v1829_v47, %v1826_v43  ;;  %v1843_v59 = vshll.u32 %v4629_v42, 16  ;;  %v3600_v1 = vunpack.c.l.b16 %v3550_v48  ;;  %v2654_v3 = vunpack.c.l.b16 %v2604_v60  ;;  %v4967_v48 = vld [vmem:[%s5174_s27 + $0xc] sm:$0xff]  ;;  %v4634_v60 = vld [vmem:[%s5174_s27 + $0x28] sm:$0xf] }
  0x65   : > { %v719_v63 = vpack.c.b16 %v691_v49, %v690_v44  ;;  %v1839_v0 = vrot.slane %v1837_v54, 4  ;;  %v1294_v52 = vpack.c.b16 %v1263_v57, %v1262_v45  ;;  %v4049_v6 = vsel %vm785_vm0, %v3951_v61, 0  ;;  %v4633_v57 = vld [vmem:[%s5174_s27 + $0x24] sm:$0xf] }
  0x66   : > { %v3601_v2 = vpack.c.b16 %v3600_v1, %v3600_v1  ;;  %v1831_v7 = vrot.slane %v1830_v58, 4  ;;  %v1845_v9 = vrot.slane %v1843_v59, 5  ;;  %4058 = vmatpush.bf16.msra.mxu0 %v4049_v6  ;;  %v2655_v14 = vpack.c.b16 %v2654_v3, %v2654_v3 }
  0x67   : > { %4390 = vmatmul.msk.bf16.gmra.mxu0 %vm736_vm3, %v719_v63  ;;  %v1840_v10 = vor.u32 %v1839_v0, %v1835_v53  ;;  %v1158_v15 = vrot.slane %v5253_v35, 5  ;;  %v1848_v20 = vshrl.u32 %v4630_v11, 16  ;;  %v1851_v21 = vshll.u32 %v4630_v11, 16  ;;  %v1100_v63 = vld [vmem:[%s5174_s27 + $0x18] sm:$0xe] }
  0x68   : > { %v3602_v13 = vrot.slane %v3601_v2, 2  ;;  %v2656_v18 = vrot.slane %v2655_v14, 2  ;;  %v1836_v23 = vsel %vm5193_vm4, %v1831_v7, %v1835_v53  ;;  %v1857_v35 = vshll.u32 %v4631_v16, 16 }
  0x69   : > { %4467 = vmatmul.msk.bf16.vlgmr.msrb.gmra.mxu1 %vm736_vm3, %v4966_v56  ;;  %v1841_v12 = vrot.slane %v1840_v10, 4  ;;  %v1861_v26 = vshrl.u32 %v4631_v16, 16  ;;  %v4484_v30 = vrot.slane %v1099_v19, 9  ;;  %v1160_v31 = vrot.slane %v1158_v15, 4 }
  0x6a   : > { %v3652_v17 = vsel %vm785_vm0, %v3602_v13, 0  ;;  %v2706_v25 = vsel %vm785_vm0, %v2656_v18, 0  ;;  %v1161_v33 = vrot.slane %v5256_v36, 5  ;;  %v2208_v34 = vunpack.c.l.b16 %v1836_v23  ;;  %v4635_v18 = vld [vmem:[%s5174_s27 + $0x2c] sm:$0x1] }
  0x6b   : > { %v1846_v24 = vsel %vm5193_vm4, %v1841_v12, %v1845_v9  ;;  %3661 = vmatpush.bf16.msra.mxu3 %v3652_v17  ;;  %2715 = vmatpush.bf16.msra.mxu1 %v2706_v25  ;;  %v1850_v40 = vrot.slane %v1848_v20, 4  ;;  %v1853_v41 = vrot.slane %v1851_v21, 5  ;;  %v1859_v42 = vrot.slane %v1857_v35, 5  ;;  %v4983_v9 = vld [vmem:[%s5174_s27 + $0x18] sm:$0xff] }
  0x6c   : > { %v2209_v39 = vunpack.c.l.b16 %v1846_v24  ;;  %v1863_v43 = vrot.slane %v1861_v26, 4  ;;  %v1159_v44 = vsel %vm5368_vm7, %v4484_v30, %v1158_v15  ;;  %v1162_v45 = vsel %vm5368_vm7, %v1160_v31, %v1161_v33  ;;  %v4968_v25 = vld [vmem:[%s5174_s27 + $0x18] sm:$0xff] }
  0x6d   : > { %v1854_v36 = vor.u32 %v1853_v41, %v1850_v40  ;;  %v1867_v50 = vshll.u32 %v4632_v4, 16  ;;  %v1264_v53 = vunpack.c.l.b16 %v1159_v44  ;;  %v1265_v54 = vunpack.c.l.b16 %v1162_v45 }
  0x6e   : > { %4499 = vmatmul.msk.bf16.vlgmr.msrb.gmra.mxu2 %vm736_vm3, %v1294_v52  ;;  %v2240_v47 = vpack.c.b16 %v2209_v39, %v2208_v34  ;;  %v1864_v49 = vor.u32 %v1863_v43, %v1859_v42  ;;  %v1165_v0 = vrot.slane %v5297_v5, 5  ;;  %v1872_v1 = vshrl.u32 %v4633_v57, 16  ;;  %v4636_v34 = vld [vmem:[%s5174_s27 + $0x30] sm:$0xf]  ;;  %v4637_v39 = vld [vmem:[%s5174_s27 + $0x34] sm:$0xf] }
  0x6f   : > { %v1855_v56 = vrot.slane %v1854_v36, 4  ;;  %v1869_v59 = vrot.slane %v1867_v50, 5  ;;  %v1295_v61 = vpack.c.b16 %v1265_v54, %v1264_v53  ;;  %v1875_v10 = vshll.u32 %v4633_v57, 16  ;;  %v1101_v43 = vld [vmem:[%s5174_s27 + $0x24] sm:$0xe] }
  0x70   : > { %v1865_v58 = vrot.slane %v1864_v49, 4  ;;  %v1881_v2 = vshll.u32 %v4634_v60, 16  ;;  %v1885_v3 = vshrl.u32 %v4634_v60, 16  ;;  %v4485_v7 = vrot.slane %v1100_v63, 9  ;;  %v4984_v36 = vld [vmem:[%s5174_s27 + $0x24] sm:$0xff] }
  0x71   : > { %v1860_v52 = vsel %vm5193_vm4, %v1855_v56, %v1859_v42  ;;  %v1167_v12 = vrot.slane %v1165_v0, 4  ;;  %v1168_v5 = vrot.slane %v5303_v8, 5  ;;  %v1874_v13 = vrot.slane %v1872_v1, 4 }
  0x72   : > { %v1870_v6 = vsel %vm5193_vm4, %v1865_v58, %v1869_v59  ;;  %v2210_v11 = vunpack.c.l.b16 %v1860_v52  ;;  %v1877_v15 = vrot.slane %v1875_v10, 5  ;;  %v1883_v16 = vrot.slane %v1881_v2, 5  ;;  %v4638_v59 = vld [vmem:[%s5174_s27 + $0x38] sm:$0x1] }
  0x73   : > { %4611 = vmatmul.msk.bf16.vlgmr.msrb.gmra.mxu3 %vm736_vm3, %v4982_v29  ;;  %v2211_v14 = vunpack.c.l.b16 %v1870_v6  ;;  %v1887_v17 = vrot.slane %v1885_v3, 4  ;;  %v1166_v19 = vsel %vm5368_vm7, %v4485_v7, %v1165_v0  ;;  %v1169_v20 = vsel %vm5368_vm7, %v1167_v12, %v1168_v5  ;;  %v4639_v3 = vld [vmem:[%s5174_s27 + $0x3c] sm:$0xf]  ;;  %v4640_v6 = vld [vmem:[%s5174_s27 + $0x40] sm:$0xf] }
  0x74   : > { %v1878_v23 = vor.u32 %v1877_v15, %v1874_v13  ;;  %v1891_v8 = vshll.u32 %v4635_v18, 16  ;;  %v1266_v35 = vunpack.c.l.b16 %v1166_v19  ;;  %v1267_v26 = vunpack.c.l.b16 %v1169_v20  ;;  %v5043_v5 = vld [vmem:[%s5174_s27 + $0x34] sm:$0xf] }
  0x75   : > { %v2241_v21 = vpack.c.b16 %v2211_v14, %v2210_v11  ;;  %v1888_v24 = vor.u32 %v1887_v17, %v1883_v16  ;;  %v1172_v40 = vrot.slane %v5345_v46, 5  ;;  %v1896_v4 = vshrl.u32 %v4636_v34, 16  ;;  %v1102_v14 = vld [vmem:[%s5174_s27 + $0x30] sm:$0xe] }
  0x76   : > { %v1879_v29 = vrot.slane %v1878_v23, 4  ;;  %v1893_v31 = vrot.slane %v1891_v8, 5  ;;  %v1296_v33 = vpack.c.b16 %v1267_v26, %v1266_v35  ;;  %v1899_v44 = vshll.u32 %v4636_v34, 16  ;;  %v5044_v8 = vld [vmem:[%s5174_s27 + $0x38] sm:$0x1]  ;;  %v4985_v35 = vld [vmem:[%s5174_s27 + $0x30] sm:$0xff] }
  0x77   : > { %4675 = vmatmul.msk.bf16.vlgmr.msrb.gmra.mxu0 %vm736_vm3, %v2240_v47  ;;  %v1889_v30 = vrot.slane %v1888_v24, 4  ;;  %v1905_v45 = vshll.u32 %v4637_v39, 16  ;;  %v1909_v47 = vshrl.u32 %v4637_v39, 16  ;;  %v1174_v49 = vrot.slane %v1172_v40, 4  ;;  %v4641_v39 = vld [vmem:[%s5174_s27 + $0x44] sm:$0x1] }
  0x78   : > { %v1884_v41 = vsel %vm5193_vm4, %v1879_v29, %v1883_v16  ;;  %v1175_v46 = vrot.slane %v5348_v51, 5  ;;  %v1898_v54 = vrot.slane %v1896_v4, 4  ;;  %v1901_v56 = vrot.slane %v1899_v44, 5  ;;  %v4969_v51 = vld [vmem:[%s5174_s27 + $0x24] sm:$0xff] }
  0x79   : > { %4468 = vmatmul.msk.bf16.gmra.mxu1 %vm736_vm3, %v4967_v48  ;;  %v1894_v42 = vsel %vm5193_vm4, %v1889_v30, %v1893_v31  ;;  %v4486_v48 = vrot.slane %v1101_v43, 9  ;;  %v2212_v50 = vunpack.c.l.b16 %v1884_v41  ;;  %v1907_v57 = vrot.slane %v1905_v45, 5  ;;  %v4970_v45 = vld [vmem:[%s5174_s27 + $0x30] sm:$0xff] }
  0x7a   : > { %v2213_v53 = vunpack.c.l.b16 %v1894_v42  ;;  %v1911_v58 = vrot.slane %v1909_v47, 4  ;;  %v1902_v0 = vor.u32 %v1901_v56, %v1898_v54  ;;  %v1915_v52 = vshll.u32 %v4638_v59, 16  ;;  %v4642_v54 = vld [vmem:[%s5174_s27 + $0x48] sm:$0xf]  ;;  %v4643_v56 = vld [vmem:[%s5174_s27 + $0x4c] sm:$0xf] }
  0x7b   : > { %v1173_v60 = vsel %vm5368_vm7, %v4486_v48, %v1172_v40  ;;  %v1179_v13 = vrot.slane %v5043_v5, 5  ;;  %v1920_v15 = vshrl.u32 %v4639_v3, 16  ;;  %v1923_v16 = vshll.u32 %v4639_v3, 16  ;;  %v4986_v3 = vld [vmem:[%s5174_s27 + $0x3c] sm:$0xff] }
  0x7c   : > { %v2242_v63 = vpack.c.b16 %v2213_v53, %v2212_v50  ;;  %v1912_v1 = vor.u32 %v1911_v58, %v1907_v57  ;;  %v1268_v10 = vunpack.c.l.b16 %v1173_v60  ;;  %v1903_v7 = vrot.slane %v1902_v0, 4 }
  0x7d   : > { %v1917_v11 = vrot.slane %v1915_v52, 5  ;;  %v1929_v17 = vshll.u32 %v4640_v6, 16  ;;  %v1933_v18 = vshrl.u32 %v4640_v6, 16  ;;  %v4487_v23 = vrot.slane %v1102_v14, 9 }
  0x7e   : > { %4500 = vmatmul.msk.bf16.gmra.mxu2 %vm736_vm3, %v1295_v61  ;;  %v1176_v61 = vsel %vm5368_vm7, %v1174_v49, %v1175_v46  ;;  %v1908_v20 = vsel %vm5193_vm4, %v1903_v7, %v1907_v57  ;;  %v1181_v24 = vrot.slane %v1179_v13, 4  ;;  %v1922_v26 = vrot.slane %v1920_v15, 4 }
  0x7f   : > { %v1269_v2 = vunpack.c.l.b16 %v1176_v61  ;;  %v1925_v29 = vrot.slane %v1923_v16, 5  ;;  %v1931_v30 = vrot.slane %v1929_v17, 5  ;;  %v1935_v31 = vrot.slane %v1933_v18, 4  ;;  %v4644_v16 = vld [vmem:[%s5174_s27 + $0x50] sm:$0x1] }
  0x80   : > { %v1180_v40 = vsel %vm5368_vm7, %v4487_v23, %v1179_v13  ;;  %v1939_v4 = vshll.u32 %v4641_v39, 16  ;;  %v1186_v61 = vrot.slane %v5223_v28, 5  ;;  %v1944_v0 = vshrl.u32 %v4642_v54, 16 }
  0x81   : > { %v1297_v12 = vpack.c.b16 %v1269_v2, %v1268_v10  ;;  %v1926_v42 = vor.u32 %v1925_v29, %v1922_v26  ;;  %v1936_v43 = vor.u32 %v1935_v31, %v1931_v30  ;;  %v1270_v47 = vunpack.c.l.b16 %v1180_v40  ;;  %v4645_v40 = vld [vmem:[%s5174_s27 + $0x54] sm:$0xf] }
  0x82   : > { %v1941_v53 = vrot.slane %v1939_v4, 5  ;;  %v1953_v52 = vshll.u32 %v4643_v56, 16  ;;  %v1957_v10 = vshrl.u32 %v4643_v56, 16  ;;  %v1946_v5 = vrot.slane %v1944_v0, 4 }
  0x83   : > { %4612 = vmatmul.msk.bf16.gmra.mxu3 %vm736_vm3, %v4983_v9  ;;  %v1913_v9 = vrot.slane %v1912_v1, 4  ;;  %v1927_v46 = vrot.slane %v1926_v42, 4  ;;  %v1937_v50 = vrot.slane %v1936_v43, 4  ;;  %v1947_v1 = vshll.u32 %v4642_v54, 16 }
  0x84   : > { %v1955_v14 = vrot.slane %v1953_v52, 5  ;;  %v1959_v15 = vrot.slane %v1957_v10, 4  ;;  %v1193_v42 = vrot.slane %v5268_v55, 5  ;;  %v1196_v55 = vrot.slane %v5272_v62, 5  ;;  %v4647_v10 = vld [vmem:[%s5174_s27 + $0x5c] sm:$0x1] }
  0x85   : > { %v1932_v59 = vsel %vm5193_vm4, %v1927_v46, %v1931_v30  ;;  %v1942_v60 = vsel %vm5193_vm4, %v1937_v50, %v1941_v53  ;;  %v1949_v13 = vrot.slane %v1947_v1, 5  ;;  %v4987_v53 = vld [vmem:[%s5174_s27 + $0x48] sm:$0xff] }
  0x86   : > { %v2216_v2 = vunpack.c.l.b16 %v1932_v59  ;;  %v2217_v6 = vunpack.c.l.b16 %v1942_v60  ;;  %v1960_v23 = vor.u32 %v1959_v15, %v1955_v14  ;;  %v1195_v56 = vrot.slane %v1193_v42, 4  ;;  %v4648_v15 = vld [vmem:[%s5174_s27 + $0x60] sm:$0xf] }
  0x87   : > { %4676 = vmatmul.msk.bf16.gmra.mxu0 %vm736_vm3, %v2241_v21  ;;  %v1918_v21 = vsel %vm5193_vm4, %v1913_v9, %v1917_v11  ;;  %v1188_v9 = vrot.slane %v1186_v61, 4  ;;  %v1189_v11 = vrot.slane %v5227_v32, 5 }
  0x88   : > { %v2215_v34 = vunpack.c.l.b16 %v1918_v21  ;;  %v1950_v21 = vor.u32 %v1949_v13, %v1946_v5  ;;  %v1961_v30 = vrot.slane %v1960_v23, 4  ;;  %v1197_v62 = vsel %vm5368_vm7, %v1195_v56, %v1196_v55  ;;  %v4650_v56 = vld [vmem:[%s5174_s27 + $0x68] sm:$0x1] }
  0x89   : > { %4469 = vmatmul.msk.bf16.gmra.mxu1 %vm736_vm3, %v4968_v25  ;;  %v1182_v25 = vrot.slane %v5044_v8, 5  ;;  %v1190_v18 = vsel %vm5368_vm7, %v1188_v9, %v1189_v11  ;;  %v4971_v8 = vld [vmem:[%s5174_s27 + $0x3c] sm:$0xff]  ;;  %v1987_v5 = vshll.u32 %v4647_v10, 16  ;;  %v4973_v10 = vld [vmem:[%s5174_s27 + $0x54] sm:$0xff] }
  0x8a   : > { %v1273_v26 = vunpack.c.l.b16 %v1190_v18  ;;  %v1951_v29 = vrot.slane %v1950_v21, 4 }
  0x8b   : > { %v1183_v41 = vsel %vm5368_vm7, %v1181_v24, %v1182_v25  ;;  %v1963_v24 = vshll.u32 %v4644_v16, 16  ;;  %v4649_v16 = vld [vmem:[%s5174_s27 + $0x64] sm:$0xf]  ;;  %v1989_v23 = vrot.slane %v1987_v5, 5 }
  0x8c   : > { %v1956_v43 = vsel %vm5193_vm4, %v1951_v29, %v1955_v14  ;;  %v1275_v14 = vunpack.c.l.b16 %v1197_v62  ;;  %v1200_v29 = vrot.slane %v5312_v27, 5 }
  0x8d   : > { %v1965_v31 = vrot.slane %v1963_v24, 5 }
  0x8e   : > { %4501 = vmatmul.msk.bf16.gmra.mxu2 %vm736_vm3, %v1296_v33  ;;  %v2214_v33 = vunpack.c.l.b16 %v1908_v20  ;;  %v2244_v20 = vpack.c.b16 %v2217_v6, %v2216_v2 }
  0x8f   : > { %v1966_v4 = vsel %vm5193_vm4, %v1961_v30, %v1965_v31  ;;  %v2005_v30 = vshrl.u32 %v4649_v16, 16 }
  0x90   : > { %v2243_v44 = vpack.c.b16 %v2215_v34, %v2214_v33  ;;  %v2219_v59 = vunpack.c.l.b16 %v1966_v4 }
  0x93   : > { %4613 = vmatmul.msk.bf16.gmra.mxu3 %vm736_vm3, %v4984_v36  ;;  %v1271_v36 = vunpack.c.l.b16 %v1183_v41  ;;  %v4646_v41 = vld [vmem:[%s5174_s27 + $0x58] sm:$0xf] }
  0x94   : > { %v1981_v46 = vshrl.u32 %v4646_v41, 16 }
  0x95   : > { %v1298_v58 = vpack.c.b16 %v1271_v36, %v1270_v47  ;;  %v1971_v47 = vshll.u32 %v4645_v40, 16  ;;  %v1977_v36 = vshll.u32 %v4646_v41, 16 }
  0x96   : > { %v1983_v1 = vrot.slane %v1981_v46, 4  ;;  %v2007_v46 = vrot.slane %v2005_v30, 4 }
  0x97   : > { %4677 = vmatmul.msk.bf16.gmra.mxu0 %vm736_vm3, %v2242_v63  ;;  %v1979_v0 = vrot.slane %v1977_v36, 5  ;;  %v1203_v36 = vrot.slane %v5319_v37, 5 }
  0x99   : > { %4470 = vmatmul.msk.bf16.gmra.mxu1 %vm736_vm3, %v4969_v51  ;;  %v1103_v51 = vld [vmem:[%s5174_s27 + $0x3c] sm:$0xe]  ;;  %v1984_v11 = vor.u32 %v1983_v1, %v1979_v0 }
  0x9a   : > { %v4488_v7 = vrot.slane %v1103_v51, 9  ;;  %v1973_v51 = vrot.slane %v1971_v47, 5  ;;  %v1202_v47 = vrot.slane %v1200_v29, 4 }
  0x9b   : > { %v1985_v21 = vrot.slane %v1984_v11, 4 }
  0x9c   : > { %v1187_v17 = vsel %vm5368_vm7, %v4488_v7, %v1186_v61  ;;  %v4972_v7 = vld [vmem:[%s5174_s27 + $0x48] sm:$0xff] }
  0x9d   : > { %v1990_v41 = vsel %vm5193_vm4, %v1985_v21, %v1989_v23  ;;  %v5045_v23 = vld [vmem:[%s5174_s27 + $0x64] sm:$0xf] }
  0x9e   : > { %v5463_v19 = vpop.f32.mrf.mxu1  ;;  %4502 = vmatmul.msk.bf16.gmra.mxu2 %vm736_vm3, %v1297_v12 }
  0xa3   : > { %4614 = vmatmul.msk.bf16.gmra.mxu3 %vm736_vm3, %v4985_v35  ;;  %v1272_v35 = vunpack.c.l.b16 %v1187_v17 }
  0xa5   : > { %v1299_v34 = vpack.c.b16 %v1273_v26, %v1272_v35  ;;  %v1995_v35 = vshll.u32 %v4648_v15, 16  ;;  %v2001_v26 = vshll.u32 %v4649_v16, 16 }
  0xa6   : > { %v5481_v49 = vpop.f32.mrf.mxu1 }
  0xa7   : > { %v5479_v48 = vpop.f32.mrf.mxu2  ;;  %4678 = vmatmul.msk.bf16.gmra.mxu0 %vm736_vm3, %v2243_v44  ;;  %v1104_v44 = vld [vmem:[%s5174_s27 + $0x48] sm:$0xe]  ;;  %v1997_v4 = vrot.slane %v1995_v35, 5  ;;  %v1106_v35 = vld [vmem:[%s5174_s27 + $0x60] sm:$0xe] }
  0xa8   : > { %v4489_v54 = vrot.slane %v1104_v44, 9  ;;  %v2003_v44 = vrot.slane %v2001_v26, 5 }
  0xa9   : > { %4471 = vmatmul.msk.bf16.gmra.mxu1 %vm736_vm3, %v4970_v45  ;;  %v1968_v45 = vshrl.u32 %v4645_v40, 16 }
  0xaa   : > { %v1194_v2 = vsel %vm5368_vm7, %v4489_v54, %v1193_v42  ;;  %v2221_v54 = vunpack.c.l.b16 %v1990_v41  ;;  %v2008_v37 = vor.u32 %v2007_v46, %v2003_v44 }
  0xab   : > { %v5487_v57 = vpop.f32.mrf.mxu0  ;;  %v5494_v63 = vpop.f32.mrf.mxu3  ;;  %v1970_v61 = vrot.slane %v1968_v45, 4  ;;  %v1274_v13 = vunpack.c.l.b16 %v1194_v2  ;;  %v4988_v45 = vld [vmem:[%s5174_s27 + $0x54] sm:$0xff] }
  0xac   : > { %v2009_v11 = vrot.slane %v2008_v37, 4 }
  0xad   : > { %v1974_v9 = vor.u32 %v1973_v51, %v1970_v61  ;;  %v1300_v24 = vpack.c.b16 %v1275_v14, %v1274_v13  ;;  %v1204_v51 = vsel %vm5368_vm7, %v1202_v47, %v1203_v36  ;;  %v4651_v13 = vld [vmem:[%s5174_s27 + $0x6c] sm:$0xf]  ;;  %v4652_v14 = vld [vmem:[%s5174_s27 + $0x70] sm:$0xf] }
  0xae   : > { %4503 = vmatmul.msk.bf16.gmra.mxu2 %vm736_vm3, %v1298_v58  ;;  %v2218_v58 = vunpack.c.l.b16 %v1956_v43  ;;  %v2016_v26 = vshrl.u32 %v4651_v13, 16  ;;  %v2025_v30 = vshll.u32 %v4652_v14, 16 }
  0xaf   : > { %v5500_v12 = vpop.f32.mrf.mxu2 }
  0xb0   : > { %v5502_v28 = vpop.f32.mrf.mxu1  ;;  %v2018_v36 = vrot.slane %v2016_v26, 4  ;;  %v4655_v26 = vld [vmem:[%s5174_s27 + $0x7c] sm:$0xf] }
  0xb3   : > { %4615 = vmatmul.msk.bf16.gmra.mxu3 %vm736_vm3, %v4986_v3  ;;  %v5510_v32 = vpop.f32.mrf.mxu0  ;;  %v5513_v25 = vpop.f32.mrf.mxu3  ;;  %v2245_v3 = vpack.c.b16 %v2219_v59, %v2218_v58 }
  0xb7   : > { %4679 = vmatmul.msk.bf16.gmra.mxu0 %vm736_vm3, %v2244_v20  ;;  %v1975_v20 = vrot.slane %v1974_v9, 4 }
  0xb8   : > { %v5516_v33 = vpop.f32.mrf.mxu1 }
  0xb9   : > { %4472 = vmatmul.msk.bf16.gmra.mxu1 %vm736_vm3, %v4971_v8  ;;  %v1992_v8 = vshrl.u32 %v4648_v15, 16  ;;  %v1980_v40 = vsel %vm5193_vm4, %v1975_v20, %v1979_v0  ;;  %v2011_v0 = vshll.u32 %v4650_v56, 16 }
  0xbb   : > { %v5519_v39 = vpop.f32.mrf.mxu2  ;;  %v1994_v43 = vrot.slane %v1992_v8, 4  ;;  %v2013_v5 = vrot.slane %v2011_v0, 5 }
  0xbd   : > { %v1998_v59 = vor.u32 %v1997_v4, %v1994_v43  ;;  %v2014_v21 = vsel %vm5193_vm4, %v2009_v11, %v2013_v5  ;;  %v4989_v4 = vld [vmem:[%s5174_s27 + $0x60] sm:$0xff] }
  0xbe   : > { %v5529_v50 = vpop.f32.mrf.mxu0  ;;  %4504 = vmatmul.msk.bf16.gmra.mxu2 %vm736_vm3, %v1299_v34  ;;  %v1105_v34 = vld [vmem:[%s5174_s27 + $0x54] sm:$0xe] }
  0xbf   : > { %v4490_v27 = vrot.slane %v1105_v34, 9  ;;  %v1999_v9 = vrot.slane %v1998_v59, 4  ;;  %v2029_v34 = vshrl.u32 %v4652_v14, 16  ;;  %v4653_v59 = vld [vmem:[%s5174_s27 + $0x74] sm:$0x1] }
  0xc0   : > { %v5534_v60 = vpop.f32.mrf.mxu3 }
  0xc1   : > { %v1201_v61 = vsel %vm5368_vm7, %v4490_v27, %v1200_v29  ;;  %v2004_v20 = vsel %vm5193_vm4, %v1999_v9, %v2003_v44  ;;  %v2019_v29 = vshll.u32 %v4651_v13, 16  ;;  %v4491_v27 = vrot.slane %v1106_v35, 9  ;;  %v4654_v35 = vld [vmem:[%s5174_s27 + $0x78] sm:$0xf] }
  0xc2   : > { %v5536_v52 = vpop.f32.mrf.mxu1  ;;  %v1276_v62 = vunpack.c.l.b16 %v1201_v61  ;;  %v2222_v44 = vunpack.c.l.b16 %v2004_v20 }
  0xc3   : > { %4616 = vmatmul.msk.bf16.gmra.mxu3 %vm736_vm3, %v4987_v53  ;;  %v5544_v6 = vpop.f32.mrf.mxu2  ;;  %v2220_v53 = vunpack.c.l.b16 %v1980_v40  ;;  %v5046_v40 = vld [vmem:[%s5174_s27 + $0x68] sm:$0x1]  ;;  %v2021_v46 = vrot.slane %v2019_v29, 5  ;;  %v5047_v29 = vld [vmem:[%s5174_s27 + $0x70] sm:$0xf] }
  0xc4   : > { %v1210_v41 = vrot.slane %v5046_v40, 5  ;;  %v1107_v40 = vld [vmem:[%s5174_s27 + $0x6c] sm:$0xe] }
  0xc5   : > { %v2246_v1 = vpack.c.b16 %v2221_v54, %v2220_v53  ;;  %v2027_v53 = vrot.slane %v2025_v30, 5  ;;  %v2031_v54 = vrot.slane %v2029_v34, 4  ;;  %v2022_v0 = vor.u32 %v2021_v46, %v2018_v36  ;;  %v5048_v46 = vld [vmem:[%s5174_s27 + $0x74] sm:$0x1] }
  0xc6   : > { %v5550_v17 = vpop.f32.mrf.mxu0  ;;  %v1214_v30 = vrot.slane %v5047_v29, 5 }
  0xc7   : > { %4680 = vmatmul.msk.bf16.gmra.mxu0 %vm736_vm3, %v2245_v3  ;;  %v1277_v3 = vunpack.c.l.b16 %v1204_v51 }
  0xc8   : > { %v5552_v18 = vpop.f32.mrf.mxu3 }
  0xc9   : > { %4473 = vmatmul.msk.bf16.gmra.mxu1 %vm736_vm3, %v4972_v7  ;;  %v1301_v15 = vpack.c.b16 %v1277_v3, %v1276_v62  ;;  %v4974_v3 = vld [vmem:[%s5174_s27 + $0x60] sm:$0xff] }
  0xca   : > { %v5556_v31 = vpop.f32.mrf.mxu1 }
  0xce   : > { %4505 = vmatmul.msk.bf16.gmra.mxu2 %vm736_vm3, %v1300_v24  ;;  %v5564_v42 = vpop.f32.mrf.mxu2  ;;  %v1207_v24 = vrot.slane %v5045_v23, 5 }
  0xd0   : > { %v1209_v47 = vrot.slane %v1207_v24, 4  ;;  %v1208_v61 = vsel %vm5368_vm7, %v4491_v27, %v1207_v24  ;;  %v2053_v27 = vshrl.u32 %v4655_v26, 16 }
  0xd1   : > { %v5569_v55 = vpop.f32.mrf.mxu0  ;;  %v1278_v5 = vunpack.c.l.b16 %v1208_v61  ;;  %v4492_v61 = vrot.slane %v1107_v40, 9 }
  0xd2   : > { %v5571_v58 = vpop.f32.mrf.mxu3  ;;  %v1211_v51 = vsel %vm5368_vm7, %v1209_v47, %v1210_v41 }
  0xd3   : > { %4617 = vmatmul.msk.bf16.gmra.mxu3 %vm736_vm3, %v4988_v45  ;;  %v2223_v45 = vunpack.c.l.b16 %v2014_v21  ;;  %v1279_v13 = vunpack.c.l.b16 %v1211_v51  ;;  %v1216_v51 = vrot.slane %v1214_v30, 4 }
  0xd5   : > { %v2247_v37 = vpack.c.b16 %v2223_v45, %v2222_v44  ;;  %v1302_v24 = vpack.c.b16 %v1279_v13, %v1278_v5  ;;  %v2043_v44 = vshll.u32 %v4654_v35, 16  ;;  %v2049_v45 = vshll.u32 %v4655_v26, 16 }
  0xd6   : > { %v5579_v2 = vpop.f32.mrf.mxu1  ;;  %v5581_v7 = vpop.f32.mrf.mxu2  ;;  %v2055_v5 = vrot.slane %v2053_v27, 4 }
  0xd7   : > { %4681 = vmatmul.msk.bf16.gmra.mxu0 %vm736_vm3, %v2246_v1  ;;  %v2032_v1 = vor.u32 %v2031_v54, %v2027_v53  ;;  %v1217_v54 = vrot.slane %v5048_v46, 5 }
  0xd9   : > { %4474 = vmatmul.msk.bf16.gmra.mxu1 %vm736_vm3, %v4973_v10  ;;  %v5587_v16 = vpop.f32.mrf.mxu0  ;;  %v2035_v10 = vshll.u32 %v4653_v59, 16  ;;  %v2033_v20 = vrot.slane %v2032_v1, 4  ;;  %v4990_v59 = vld [vmem:[%s5174_s27 + $0x6c] sm:$0xff] }
  0xda   : > { %v5594_v8 = vpop.f32.mrf.mxu3 }
  0xdb   : > { %v2037_v21 = vrot.slane %v2035_v10, 5 }
  0xde   : > { %4506 = vmatmul.msk.bf16.gmra.mxu2 %vm736_vm3, %v1301_v15  ;;  %v5599_v43 = vpop.f32.mrf.mxu1  ;;  %v2023_v15 = vrot.slane %v2022_v0, 4 }
  0xe0   : > { %v2028_v34 = vsel %vm5193_vm4, %v2023_v15, %v2027_v53  ;;  %v4656_v15 = vld [vmem:[%s5174_s27 + $0x80] sm:$0x1] }
  0xe1   : > { %v5602_v56 = vpop.f32.mrf.mxu2 }
  0xe3   : > { %4618 = vmatmul.msk.bf16.gmra.mxu3 %vm736_vm3, %v4989_v4  ;;  %v2040_v4 = vshrl.u32 %v4654_v35, 16  ;;  %v4975_v35 = vld [vmem:[%s5174_s27 + $0x6c] sm:$0xff] }
  0xe4   : > { %v5610_v62 = vpop.f32.mrf.mxu0 }
  0xe5   : > { %v2042_v10 = vrot.slane %v2040_v4, 4 }
  0xe6   : > { %v5613_v9 = vpop.f32.mrf.mxu3  ;;  %v1018_v11 = vpop.f32.mrf.mxu1 }
  0xe7   : > { %v1019_v14 = vadd.f32 %v1018_v11, %v5487_v57  ;;  %4682 = vmatmul.msk.bf16.gmra.mxu0 %vm736_vm3, %v2247_v37  ;;  %v2038_v57 = vsel %vm5193_vm4, %v2033_v20, %v2037_v21  ;;  %v2224_v37 = vunpack.c.l.b16 %v2028_v34  ;;  %v2051_v11 = vrot.slane %v2049_v45, 5 }
  0xe8   : > { %v2225_v0 = vunpack.c.l.b16 %v2038_v57  ;;  %v1215_v20 = vsel %vm5368_vm7, %v4492_v61, %v1214_v30  ;;  %v2059_v34 = vshll.u32 %v4656_v15, 16 }
  0xe9   : > { %v5617_v23 = vpop.f32.mrf.mxu2  ;;  %4475 = vmatmul.msk.bf16.gmra.mxu1 %vm736_vm3, %v4974_v3  ;;  %v2045_v3 = vrot.slane %v2043_v44, 5  ;;  %v2056_v29 = vor.u32 %v2055_v5, %v2051_v11 }
  0xea   : > { %v2248_v21 = vpack.c.b16 %v2225_v0, %v2224_v37  ;;  %v2061_v46 = vrot.slane %v2059_v34, 5  ;;  %v4658_v37 = vld [vmem:[%s5174_s27 + $0x88] sm:$0xf]  ;;  %v5049_v0 = vld [vmem:[%s5174_s27 + $0x7c] sm:$0xf] }
  0xeb   : > { %v2046_v26 = vor.u32 %v2045_v3, %v2042_v10  ;;  %v1108_v10 = vld [vmem:[%s5174_s27 + $0x78] sm:$0xe] }
  0xec   : > { %v5628_v41 = vpop.f32.mrf.mxu0 }
  0xed   : > { %v2047_v27 = vrot.slane %v2046_v26, 4 }
  0xee   : > { %v5630_v47 = vpop.f32.mrf.mxu3  ;;  %4507 = vmatmul.msk.bf16.gmra.mxu2 %vm736_vm3, %v1302_v24  ;;  %v1020_v36 = vpop.f32.mrf.mxu1 }
  0xef   : > { %v1021_v53 = vadd.f32 %v1020_v36, %v5510_v32  ;;  %v1218_v32 = vsel %vm5368_vm7, %v1216_v51, %v1217_v54  ;;  %v2057_v36 = vrot.slane %v2056_v29, 4  ;;  %v4657_v54 = vld [vmem:[%s5174_s27 + $0x84] sm:$0xf]  ;;  %v4991_v29 = vld [vmem:[%s5174_s27 + $0x78] sm:$0xff] }
  0xf0   : > { %v1281_v4 = vunpack.c.l.b16 %v1218_v32  ;;  %v2067_v3 = vshll.u32 %v4657_v54, 16  ;;  %v2077_v32 = vshrl.u32 %v4658_v37, 16 }
  0xf1   : > { %v1370_v1 = vpop.f32.mrf.mxu2  ;;  %v2062_v15 = vsel %vm5193_vm4, %v2057_v36, %v2061_v46 }
  0xf2   : > { %v1450_v13 = vadd.f32 %v1370_v1, %v1019_v14  ;;  %v1280_v14 = vunpack.c.l.b16 %v1215_v20  ;;  %v1221_v1 = vrot.slane %v5049_v0, 5  ;;  %v2073_v20 = vshll.u32 %v4658_v37, 16 }
  0xf3   : > { %4619 = vmatmul.msk.bf16.gmra.mxu3 %vm736_vm3, %v4990_v59  ;;  %v2079_v36 = vrot.slane %v2077_v32, 4 }
  0xf4   : > { %v2316_v24 = vpop.f32.mrf.mxu0  ;;  %v1303_v51 = vpack.c.b16 %v1281_v4, %v1280_v14 }
  0xf6   : > { %v1663_v57 = vpop.f32.mrf.mxu3  ;;  %v1023_v40 = vpop.f32.mrf.mxu1 }
  0xf7   : > { %v1743_v44 = vadd.f32 %v1663_v57, %v1450_v13  ;;  %v1024_v30 = vadd.f32 %v1023_v40, %v5529_v50  ;;  %4683 = vmatmul.msk.bf16.gmra.mxu0 %vm736_vm3, %v2248_v21  ;;  %v2064_v50 = vshrl.u32 %v4657_v54, 16  ;;  %v2052_v13 = vsel %vm5193_vm4, %v2047_v27, %v2051_v11  ;;  %v5050_v21 = vld [vmem:[%s5174_s27 + $0x80] sm:$0x1] }
  0xf8   : > { %v4493_v57 = vrot.slane %v1108_v10, 9  ;;  %v1223_v40 = vrot.slane %v1221_v1, 4  ;;  %v2226_v14 = vunpack.c.l.b16 %v2052_v13  ;;  %v2227_v11 = vunpack.c.l.b16 %v2062_v15 }
  0xf9   : > { %v1372_v45 = vpop.f32.mrf.mxu2  ;;  %4476 = vmatmul.msk.bf16.gmra.mxu1 %vm736_vm3, %v4975_v35  ;;  %v5647_v59 = vadd.f32 %v2316_v24, %v1743_v44  ;;  %v1224_v24 = vrot.slane %v5050_v21, 5  ;;  %v2066_v4 = vrot.slane %v2064_v50, 4  ;;  %v2069_v44 = vrot.slane %v2067_v3, 5  ;;  %v4976_v50 = vld [vmem:[%s5174_s27 + $0x78] sm:$0xff] }
  0xfa   : > { %v1451_v61 = vadd.f32 %v1372_v45, %v1021_v53  ;;  %v2075_v27 = vrot.slane %v2073_v20, 5  ;;  %v2249_v37 = vpack.c.b16 %v2227_v11, %v2226_v14  ;;  %v4661_v14 = vld [vmem:[%s5174_s27 + $0x94] sm:$0xf]  ;;  %v5051_v11 = vld [vmem:[%s5174_s27 + $0x88] sm:$0xf] }
  0xfb   : > { %v2070_v0 = vor.u32 %v2069_v44, %v2066_v4  ;;  %v1228_v4 = vrot.slane %v5051_v11, 5  ;;  %v1109_v44 = vld [vmem:[%s5174_s27 + $0x84] sm:$0xe] }
  0xfc   : > { %v2318_v5 = vpop.f32.mrf.mxu0  ;;  %v2080_v3 = vor.u32 %v2079_v36, %v2075_v27 }
  0xfd   : > { %v2071_v21 = vrot.slane %v2070_v0, 4 }
  0xfe   : > { %v1665_v53 = vpop.f32.mrf.mxu3  ;;  %4508 = vmatmul.msk.bf16.gmra.mxu2 %vm736_vm3, %v1303_v51  ;;  %v1025_v35 = vpop.f32.mrf.mxu1  ;;  %v4659_v51 = vld [vmem:[%s5174_s27 + $0x8c] sm:$0x1] }
  0xff   : > { %v1744_v26 = vadd.f32 %v1665_v53, %v1451_v61  ;;  %v1026_v34 = vadd.f32 %v1025_v35, %v5550_v17  ;;  %v1222_v61 = vsel %vm5368_vm7, %v4493_v57, %v1221_v1  ;;  %v1225_v17 = vsel %vm5368_vm7, %v1223_v40, %v1224_v24 }
 0x100   : > { %v2083_v13 = vshll.u32 %v4659_v51, 16  ;;  %v1283_v20 = vunpack.c.l.b16 %v1225_v17  ;;  %v2081_v53 = vrot.slane %v2080_v3, 4  ;;  %v2101_v17 = vshrl.u32 %v4661_v14, 16  ;;  %v4992_v3 = vld [vmem:[%s5174_s27 + $0x84] sm:$0xff] }
 0x101   : > { %v1375_v45 = vpop.f32.mrf.mxu2  ;;  %v5660_v46 = vadd.f32 %v2318_v5, %v1744_v26  ;;  %v4660_v26 = vld [vmem:[%s5174_s27 + $0x90] sm:$0xf] }
 0x102   : > { %v1452_v54 = vadd.f32 %v1375_v45, %v1024_v30  ;;  %v1282_v30 = vunpack.c.l.b16 %v1222_v61  ;;  %v2085_v35 = vrot.slane %v2083_v13, 5  ;;  %v2088_v45 = vshrl.u32 %v4660_v26, 16 }
 0x103   : > { %4620 = vmatmul.msk.bf16.gmra.mxu3 %vm736_vm3, %v4991_v29  ;;  %v2091_v51 = vshll.u32 %v4660_v26, 16  ;;  %v2097_v61 = vshll.u32 %v4661_v14, 16  ;;  %v4494_v13 = vrot.slane %v1109_v44, 9 }
 0x104   : > { %v2321_v10 = vpop.f32.mrf.mxu0  ;;  %v1304_v40 = vpack.c.b16 %v1283_v20, %v1282_v30  ;;  %v2090_v20 = vrot.slane %v2088_v45, 4 }
 0x106   : > { %v1668_v15 = vpop.f32.mrf.mxu3  ;;  %v1028_v5 = vpop.f32.mrf.mxu1 }
 0x107   : > { %v1745_v32 = vadd.f32 %v1668_v15, %v1452_v54  ;;  %v1029_v1 = vadd.f32 %v1028_v5, %v5569_v55  ;;  %4684 = vmatmul.msk.bf16.gmra.mxu0 %vm736_vm3, %v2249_v37  ;;  %v2076_v55 = vsel %vm5193_vm4, %v2071_v21, %v2075_v27  ;;  %v2086_v54 = vsel %vm5193_vm4, %v2081_v53, %v2085_v35  ;;  %v5052_v37 = vld [vmem:[%s5174_s27 + $0x8c] sm:$0x1] }
 0x108   : > { %v1231_v0 = vrot.slane %v5052_v37, 5  ;;  %v1230_v15 = vrot.slane %v1228_v4, 4  ;;  %v2228_v5 = vunpack.c.l.b16 %v2076_v55  ;;  %v2229_v30 = vunpack.c.l.b16 %v2086_v54  ;;  %v4977_v55 = vld [vmem:[%s5174_s27 + $0x84] sm:$0xff] }
 0x109   : > { %v1377_v24 = vpop.f32.mrf.mxu2  ;;  %4477 = vmatmul.msk.bf16.gmra.mxu1 %vm736_vm3, %v4976_v50  ;;  %v5673_v29 = vadd.f32 %v2321_v10, %v1745_v32  ;;  %v2093_v21 = vrot.slane %v2091_v51, 5  ;;  %v2103_v53 = vrot.slane %v2101_v17, 4 }
 0x10a   : > { %v1453_v57 = vadd.f32 %v1377_v24, %v1026_v34  ;;  %v2099_v24 = vrot.slane %v2097_v61, 5  ;;  %v2250_v14 = vpack.c.b16 %v2229_v30, %v2228_v5  ;;  %v4664_v5 = vld [vmem:[%s5174_s27 + $0xa0] sm:$0xf]  ;;  %v5053_v30 = vld [vmem:[%s5174_s27 + $0x94] sm:$0xf] }
 0x10b   : > { %v2094_v44 = vor.u32 %v2093_v21, %v2090_v20  ;;  %v1235_v20 = vrot.slane %v5053_v30, 5 }
 0x10c   : > { %v2323_v36 = vpop.f32.mrf.mxu0  ;;  %v2104_v45 = vor.u32 %v2103_v53, %v2099_v24 }
 0x10e   : > { %v1670_v34 = vpop.f32.mrf.mxu3  ;;  %4509 = vmatmul.msk.bf16.gmra.mxu2 %vm736_vm3, %v1304_v40  ;;  %v1030_v10 = vpop.f32.mrf.mxu1  ;;  %v4662_v40 = vld [vmem:[%s5174_s27 + $0x98] sm:$0x1] }
 0x10f   : > { %v1746_v50 = vadd.f32 %v1670_v34, %v1453_v57  ;;  %v1031_v27 = vadd.f32 %v1030_v10, %v5587_v16  ;;  %v1229_v57 = vsel %vm5368_vm7, %v4494_v13, %v1228_v4  ;;  %v1232_v16 = vsel %vm5368_vm7, %v1230_v15, %v1231_v0 }
 0x110   : > { %v2107_v54 = vshll.u32 %v4662_v40, 16  ;;  %v1285_v61 = vunpack.c.l.b16 %v1232_v16  ;;  %v2095_v0 = vrot.slane %v2094_v44, 4  ;;  %v2105_v34 = vrot.slane %v2104_v45, 4  ;;  %v4993_v45 = vld [vmem:[%s5174_s27 + $0x90] sm:$0xff] }
 0x111   : > { %v1380_v32 = vpop.f32.mrf.mxu2  ;;  %v5686_v35 = vadd.f32 %v2323_v36, %v1746_v50  ;;  %v4663_v50 = vld [vmem:[%s5174_s27 + $0x9c] sm:$0xf]  ;;  %v2125_v16 = vshrl.u32 %v4664_v5, 16 }
 0x112   : > { %v1454_v26 = vadd.f32 %v1380_v32, %v1029_v1  ;;  %v1284_v1 = vunpack.c.l.b16 %v1229_v57  ;;  %v2109_v10 = vrot.slane %v2107_v54, 5  ;;  %v1110_v32 = vld [vmem:[%s5174_s27 + $0x90] sm:$0xe]  ;;  %v2115_v21 = vshll.u32 %v4663_v50, 16 }
 0x113   : > { %4621 = vmatmul.msk.bf16.gmra.mxu3 %vm736_vm3, %v4992_v3  ;;  %v2121_v57 = vshll.u32 %v4664_v5, 16 }
 0x114   : > { %v2326_v11 = vpop.f32.mrf.mxu0  ;;  %v1305_v15 = vpack.c.b16 %v1285_v61, %v1284_v1  ;;  %v2110_v40 = vsel %vm5193_vm4, %v2105_v34, %v2109_v10  ;;  %v2127_v34 = vrot.slane %v2125_v16, 4 }
 0x116   : > { %v1673_v51 = vpop.f32.mrf.mxu3  ;;  %v1033_v36 = vpop.f32.mrf.mxu1 }
 0x117   : > { %v1747_v17 = vadd.f32 %v1673_v51, %v1454_v26  ;;  %v1034_v4 = vadd.f32 %v1033_v36, %v5610_v62  ;;  %4685 = vmatmul.msk.bf16.gmra.mxu0 %vm736_vm3, %v2250_v14  ;;  %v2112_v62 = vshrl.u32 %v4663_v50, 16  ;;  %v2100_v26 = vsel %vm5193_vm4, %v2095_v0, %v2099_v24  ;;  %v5054_v14 = vld [vmem:[%s5174_s27 + $0x98] sm:$0x1] }
 0x118   : > { %v4495_v51 = vrot.slane %v1110_v32, 9  ;;  %v1237_v36 = vrot.slane %v1235_v20, 4  ;;  %v2230_v1 = vunpack.c.l.b16 %v2100_v26  ;;  %v2231_v24 = vunpack.c.l.b16 %v2110_v40 }
 0x119   : > { %v1382_v37 = vpop.f32.mrf.mxu2  ;;  %4478 = vmatmul.msk.bf16.gmra.mxu1 %vm736_vm3, %v4977_v55  ;;  %v5699_v3 = vadd.f32 %v2326_v11, %v1747_v17  ;;  %v1238_v11 = vrot.slane %v5054_v14, 5  ;;  %v2114_v61 = vrot.slane %v2112_v62, 4  ;;  %v2117_v17 = vrot.slane %v2115_v21, 5  ;;  %v4978_v62 = vld [vmem:[%s5174_s27 + $0x90] sm:$0xff] }
 0x11a   : > { %v1455_v13 = vadd.f32 %v1382_v37, %v1031_v27  ;;  %v2123_v0 = vrot.slane %v2121_v57, 5  ;;  %v2251_v5 = vpack.c.b16 %v2231_v24, %v2230_v1  ;;  %v4667_v24 = vld [vmem:[%s5174_s27 + $0xac] sm:$0xf] }
 0x11b   : > { %v2118_v30 = vor.u32 %v2117_v17, %v2114_v61  ;;  %v1111_v61 = vld [vmem:[%s5174_s27 + $0x9c] sm:$0xe] }
 0x11c   : > { %v2328_v53 = vpop.f32.mrf.mxu0  ;;  %v2128_v21 = vor.u32 %v2127_v34, %v2123_v0 }
 0x11e   : > { %v1675_v27 = vpop.f32.mrf.mxu3  ;;  %4510 = vmatmul.msk.bf16.gmra.mxu2 %vm736_vm3, %v1305_v15  ;;  %v1035_v55 = vpop.f32.mrf.mxu1  ;;  %v4665_v15 = vld [vmem:[%s5174_s27 + $0xa4] sm:$0x1] }
 0x11f   : > { %v1748_v44 = vadd.f32 %v1675_v27, %v1455_v13  ;;  %v1036_v54 = vadd.f32 %v1035_v55, %v5628_v41  ;;  %v1236_v13 = vsel %vm5368_vm7, %v4495_v51, %v1235_v20  ;;  %v1239_v41 = vsel %vm5368_vm7, %v1237_v36, %v1238_v11  ;;  %v4666_v55 = vld [vmem:[%s5174_s27 + $0xa8] sm:$0xf]  ;;  %v5055_v36 = vld [vmem:[%s5174_s27 + $0xa0] sm:$0xf] }
 0x120   : > { %v2131_v26 = vshll.u32 %v4665_v15, 16  ;;  %v1287_v57 = vunpack.c.l.b16 %v1239_v41  ;;  %v2119_v20 = vrot.slane %v2118_v30, 4  ;;  %v2129_v11 = vrot.slane %v2128_v21, 4 }
 0x121   : > { %v1385_v37 = vpop.f32.mrf.mxu2  ;;  %v5712_v10 = vadd.f32 %v2328_v53, %v1748_v44  ;;  %v1242_v1 = vrot.slane %v5055_v36, 5  ;;  %v2139_v34 = vshll.u32 %v4666_v55, 16  ;;  %v2149_v41 = vshrl.u32 %v4667_v24, 16 }
 0x122   : > { %v1456_v50 = vadd.f32 %v1385_v37, %v1034_v4  ;;  %v1286_v4 = vunpack.c.l.b16 %v1236_v13  ;;  %v2133_v27 = vrot.slane %v2131_v26, 5  ;;  %v2124_v17 = vsel %vm5193_vm4, %v2119_v20, %v2123_v0 }
 0x123   : > { %4622 = vmatmul.msk.bf16.gmra.mxu3 %vm736_vm3, %v4993_v45  ;;  %v2136_v37 = vshrl.u32 %v4666_v55, 16  ;;  %v2145_v13 = vshll.u32 %v4667_v24, 16  ;;  %v1244_v21 = vrot.slane %v1242_v1, 4  ;;  %v2232_v0 = vunpack.c.l.b16 %v2124_v17  ;;  %v4668_v24 = vld [vmem:[%s5174_s27 + $0xb0] sm:$0x1]  ;;  %v4979_v17 = vld [vmem:[%s5174_s27 + $0x9c] sm:$0xff] }
 0x124   : > { %v2331_v32 = vpop.f32.mrf.mxu0  ;;  %v1306_v51 = vpack.c.b16 %v1287_v57, %v1286_v4  ;;  %v2134_v15 = vsel %vm5193_vm4, %v2129_v11, %v2133_v27  ;;  %v2141_v20 = vrot.slane %v2139_v34, 5  ;;  %v2151_v27 = vrot.slane %v2149_v41, 4 }
 0x125   : > { %v2233_v57 = vunpack.c.l.b16 %v2134_v15  ;;  %v2147_v11 = vrot.slane %v2145_v13, 5  ;;  %v2155_v15 = vshll.u32 %v4668_v24, 16 }
 0x126   : > { %v1678_v53 = vpop.f32.mrf.mxu3  ;;  %v1038_v40 = vpop.f32.mrf.mxu1 }
 0x127   : > { %v1749_v16 = vadd.f32 %v1678_v53, %v1456_v50  ;;  %4686 = vmatmul.msk.bf16.gmra.mxu0 %vm736_vm3, %v2251_v5  ;;  %v5056_v5 = vld [vmem:[%s5174_s27 + $0xa4] sm:$0x1]  ;;  %v4994_v53 = vld [vmem:[%s5174_s27 + $0x9c] sm:$0xff]  ;;  %v1039_v4 = vadd.f32 %v1038_v40, %v5463_v19  ;;  %v2252_v19 = vpack.c.b16 %v2233_v57, %v2232_v0  ;;  %v2157_v0 = vrot.slane %v2155_v15, 5 }
 0x128   : > { %v1245_v30 = vrot.slane %v5056_v5, 5 }
 0x129   : > { %v1387_v14 = vpop.f32.mrf.mxu2  ;;  %4479 = vmatmul.msk.bf16.gmra.mxu1 %vm736_vm3, %v4978_v62  ;;  %v5724_v44 = vadd.f32 %v2331_v32, %v1749_v16  ;;  %v4496_v62 = vrot.slane %v1111_v61, 9  ;;  %v2138_v16 = vrot.slane %v2136_v37, 4 }
 0x12a   : > { %v1457_v45 = vadd.f32 %v1387_v14, %v1036_v54 }
 0x12b   : > { %v2142_v40 = vor.u32 %v2141_v20, %v2138_v16 }
 0x12c   : > { %v2333_v50 = vpop.f32.mrf.mxu0 }
 0x12e   : > { %v1680_v54 = vpop.f32.mrf.mxu3  ;;  %4511 = vmatmul.msk.bf16.gmra.mxu2 %vm736_vm3, %v1306_v51  ;;  %v1040_v32 = vpop.f32.mrf.mxu1  ;;  %v1243_v51 = vsel %vm5368_vm7, %v4496_v62, %v1242_v1  ;;  %v4669_v1 = vld [vmem:[%s5174_s27 + $0xb4] sm:$0xf]  ;;  %v2143_v62 = vrot.slane %v2142_v40, 4 }
 0x12f   : > { %v1750_v26 = vadd.f32 %v1680_v54, %v1457_v45  ;;  %v1246_v45 = vsel %vm5368_vm7, %v1244_v21, %v1245_v30  ;;  %v1288_v37 = vunpack.c.l.b16 %v1243_v51  ;;  %v4670_v54 = vld [vmem:[%s5174_s27 + $0xb8] sm:$0xf]  ;;  %v1041_v30 = vadd.f32 %v1040_v32, %v5481_v49 }
 0x130   : > { %v1289_v34 = vunpack.c.l.b16 %v1246_v45  ;;  %v2160_v16 = vshrl.u32 %v4669_v1, 16  ;;  %v2163_v20 = vshll.u32 %v4669_v1, 16  ;;  %v2173_v51 = vshrl.u32 %v4670_v54, 16  ;;  %v1112_v45 = vld [vmem:[%s5174_s27 + $0xa8] sm:$0xe] }
 0x131   : > { %v1390_v14 = vpop.f32.mrf.mxu2  ;;  %v5737_v55 = vadd.f32 %v2333_v50, %v1750_v26  ;;  %v2152_v50 = vor.u32 %v2151_v27, %v2147_v11  ;;  %v5057_v27 = vld [vmem:[%s5174_s27 + $0xac] sm:$0xf]  ;;  %v2148_v32 = vsel %vm5193_vm4, %v2143_v62, %v2147_v11 }
 0x132   : > { %v1458_v36 = vadd.f32 %v1390_v14, %v1039_v4  ;;  %v1307_v26 = vpack.c.b16 %v1289_v34, %v1288_v37  ;;  %v2169_v14 = vshll.u32 %v4670_v54, 16  ;;  %v2162_v37 = vrot.slane %v2160_v16, 4 }
 0x133   : > { %4623 = vmatmul.msk.bf16.gmra.mxu3 %vm736_vm3, %v4994_v53  ;;  %v2153_v53 = vrot.slane %v2152_v50, 4  ;;  %v2165_v34 = vrot.slane %v2163_v20, 5  ;;  %v2175_v54 = vrot.slane %v2173_v51, 4  ;;  %v4980_v51 = vld [vmem:[%s5174_s27 + $0xa8] sm:$0xff] }
 0x134   : > { %v2336_v61 = vpop.f32.mrf.mxu0  ;;  %v2171_v50 = vrot.slane %v2169_v14, 5 }
 0x135   : > { %v2158_v24 = vsel %vm5193_vm4, %v2153_v53, %v2157_v0 }
 0x136   : > { %v1683_v13 = vpop.f32.mrf.mxu3  ;;  %v1043_v41 = vpop.f32.mrf.mxu1  ;;  %v2235_v62 = vunpack.c.l.b16 %v2158_v24  ;;  %v2176_v20 = vor.u32 %v2175_v54, %v2171_v50 }
 0x137   : > { %v1751_v5 = vadd.f32 %v1683_v13, %v1458_v36  ;;  %4687 = vmatmul.msk.bf16.gmra.mxu0 %vm736_vm3, %v2252_v19  ;;  %v1249_v36 = vrot.slane %v5057_v27, 5  ;;  %v5058_v19 = vld [vmem:[%s5174_s27 + $0xb0] sm:$0x1]  ;;  %v4995_v13 = vld [vmem:[%s5174_s27 + $0xa8] sm:$0xff]  ;;  %v1044_v11 = vadd.f32 %v1043_v41, %v5502_v28 }
 0x138   : > { %v1252_v40 = vrot.slane %v5058_v19, 5 }
 0x139   : > { %v1392_v21 = vpop.f32.mrf.mxu2  ;;  %4480 = vmatmul.msk.bf16.gmra.mxu1 %vm736_vm3, %v4979_v17  ;;  %v5751_v4 = vadd.f32 %v2336_v61, %v1751_v5  ;;  %v4497_v5 = vrot.slane %v1112_v45, 9  ;;  %v1251_v1 = vrot.slane %v1249_v36, 4 }
 0x13a   : > { %v1459_v57 = vadd.f32 %v1392_v21, %v1041_v30  ;;  %v2234_v30 = vunpack.c.l.b16 %v2148_v32  ;;  %v4671_v21 = vld [vmem:[%s5174_s27 + $0xbc] sm:$0x1] }
 0x13b   : > { %v1253_v16 = vsel %vm5368_vm7, %v1251_v1, %v1252_v40  ;;  %v2179_v28 = vshll.u32 %v4671_v21, 16  ;;  %v4673_v1 = vld [vmem:[%s5174_s27 + $0xc4] sm:$0xf] }
 0x13c   : > { %v2338_v49 = vpop.f32.mrf.mxu0  ;;  %v2253_v41 = vpack.c.b16 %v2235_v62, %v2234_v30  ;;  %v1291_v24 = vunpack.c.l.b16 %v1253_v16  ;;  %v1113_v30 = vld [vmem:[%s5174_s27 + $0xb4] sm:$0xe]  ;;  %v5060_v62 = vld [vmem:[%s5174_s27 + $0xb8] sm:$0xf]  ;;  %v2197_v16 = vshrl.u32 %v4673_v1, 16 }
 0x13d   : > { %v1256_v21 = vrot.slane %v5060_v62, 5 }
 0x13e   : > { %v1685_v61 = vpop.f32.mrf.mxu3  ;;  %4512 = vmatmul.msk.bf16.gmra.mxu2 %vm736_vm3, %v1307_v26  ;;  %v1045_v17 = vpop.f32.mrf.mxu1  ;;  %v2166_v26 = vor.u32 %v2165_v34, %v2162_v37  ;;  %v2181_v37 = vrot.slane %v2179_v28, 5  ;;  %v4672_v34 = vld [vmem:[%s5174_s27 + $0xc0] sm:$0xf]  ;;  %v5061_v28 = vld [vmem:[%s5174_s27 + $0x14] sm:$0x1] }
 0x13f   : > { %v1752_v15 = vadd.f32 %v1685_v61, %v1459_v57  ;;  %v1250_v57 = vsel %vm5368_vm7, %v4497_v5, %v1249_v36  ;;  %v2177_v36 = vrot.slane %v2176_v20, 4  ;;  %v1046_v40 = vadd.f32 %v1045_v17, %v5516_v33 }
 0x140   : > { %v1290_v32 = vunpack.c.l.b16 %v1250_v57  ;;  %v2167_v61 = vrot.slane %v2166_v26, 4  ;;  %v2184_v17 = vshrl.u32 %v4672_v34, 16  ;;  %v2187_v26 = vshll.u32 %v4672_v34, 16  ;;  %v4996_v34 = vld [vmem:[%s5174_s27 + $0xb4] sm:$0xff] }
 0x141   : > { %v1395_v53 = vpop.f32.mrf.mxu2  ;;  %v5764_v0 = vadd.f32 %v2338_v49, %v1752_v15  ;;  %v5059_v15 = vld [vmem:[%s5174_s27 + $0x10] sm:$0xf]  ;;  %v2182_v33 = vsel %vm5193_vm4, %v2177_v36, %v2181_v37  ;;  %v2193_v57 = vshll.u32 %v4673_v1, 16  ;;  %v1258_v36 = vrot.slane %v1256_v21, 4  ;;  %v4691_v37 = vld [vmem:[%s5174_s27 + $0xc] sm:$0xe] }
 0x142   : > { %v1460_v27 = vadd.f32 %v1395_v53, %v1044_v11  ;;  %v1308_v11 = vpack.c.b16 %v1291_v24, %v1290_v32  ;;  %v5062_v32 = vld [vmem:[%s5174_s27 + $0xbc] sm:$0x1]  ;;  %v4707_v1 = vrot.slane %v4691_v37, 9 }
 0x143   : > { %4624 = vmatmul.msk.bf16.gmra.mxu3 %vm736_vm3, %v4995_v13  ;;  %v2494_v13 = vrot.slane %v5059_v15, 5  ;;  %v2186_v15 = vrot.slane %v2184_v17, 4 }
 0x144   : > { %v2341_v14 = vpop.f32.mrf.mxu0 }
 0x145   : > { %v2496_v20 = vrot.slane %v2494_v13, 4 }
 0x146   : > { %v1688_v45 = vpop.f32.mrf.mxu3  ;;  %v1048_v49 = vpop.f32.mrf.mxu1 }
 0x147   : > { %v1753_v19 = vadd.f32 %v1688_v45, %v1460_v27  ;;  %4688 = vmatmul.msk.bf16.gmra.mxu0 %vm736_vm3, %v2253_v41  ;;  %v2172_v27 = vsel %vm5193_vm4, %v2167_v61, %v2171_v50  ;;  %v2497_v41 = vrot.slane %v5061_v28, 5  ;;  %v4498_v45 = vrot.slane %v1113_v30, 9 }
 0x148   : > { %v2236_v50 = vunpack.c.l.b16 %v2172_v27  ;;  %v1049_v62 = vadd.f32 %v1048_v49, %v5536_v52  ;;  %v2195_v30 = vrot.slane %v2193_v57, 5  ;;  %v2199_v28 = vrot.slane %v2197_v16, 4  ;;  %v4674_v27 = vld [vmem:[%s5174_s27 + $0xc8] sm:$0x1]  ;;  %v4851_v57 = vld [vmem:[%s5174_s27 + $0x18] sm:$0xf] }
 0x149   : > { %v1397_v5 = vpop.f32.mrf.mxu2  ;;  %4481 = vmatmul.msk.bf16.gmra.mxu1 %vm736_vm3, %v4980_v51  ;;  %v5780_v53 = vadd.f32 %v2341_v14, %v1753_v19  ;;  %v1259_v14 = vrot.slane %v5062_v32, 5  ;;  %v2237_v19 = vunpack.c.l.b16 %v2182_v33  ;;  %v2495_v33 = vsel %vm5368_vm7, %v4707_v1, %v2494_v13 }
 0x14a   : > { %v1461_v54 = vadd.f32 %v1397_v5, %v1046_v40  ;;  %v2189_v5 = vrot.slane %v2187_v26, 5  ;;  %v2605_v52 = vunpack.c.l.b16 %v2495_v33  ;;  %v2203_v37 = vshll.u32 %v4674_v27, 16 }
 0x14b   : > { %v1260_v26 = vsel %vm5368_vm7, %v1258_v36, %v1259_v14  ;;  %v2254_v16 = vpack.c.b16 %v2237_v19, %v2236_v50  ;;  %v3167_v14 = vshrl.u32 %v4851_v57, 16  ;;  %v3170_v36 = vshll.u32 %v4851_v57, 16 }
 0x14c   : > { %v2343_v51 = vpop.f32.mrf.mxu0 }
 0x14d   : > { %v3169_v27 = vrot.slane %v3167_v14, 4 }
 0x14e   : > { %v1690_v24 = vpop.f32.mrf.mxu3  ;;  %4513 = vmatmul.msk.bf16.gmra.mxu2 %vm736_vm3, %v1308_v11  ;;  %v1050_v61 = vpop.f32.mrf.mxu1  ;;  %v1257_v11 = vsel %vm5368_vm7, %v4498_v45, %v1256_v21  ;;  %v5804_v21 = vld [vmem:[%s5174_s27 + $0x1c] sm:$0xf]  ;;  %v2200_v45 = vor.u32 %v2199_v28, %v2195_v30 }
 0x14f   : > { %v1754_v40 = vadd.f32 %v1690_v24, %v1461_v54  ;;  %v2498_v54 = vsel %vm5368_vm7, %v2496_v20, %v2497_v41  ;;  %v2190_v24 = vor.u32 %v2189_v5, %v2186_v15  ;;  %v4981_v41 = vld [vmem:[%s5174_s27 + $0xb4] sm:$0xff]  ;;  %v3180_v50 = vshrl.u32 %v5804_v21, 16 }
 0x150   : > { %v2606_v49 = vunpack.c.l.b16 %v2498_v54  ;;  %v1051_v15 = vadd.f32 %v1050_v61, %v5556_v31 }
 0x151   : > { %v1400_v32 = vpop.f32.mrf.mxu2  ;;  %v5808_v1 = vadd.f32 %v2343_v51, %v1754_v40  ;;  %v2191_v51 = vrot.slane %v2190_v24, 4  ;;  %v2201_v40 = vrot.slane %v2200_v45, 4  ;;  %v3182_v57 = vrot.slane %v3180_v50, 4 }
 0x152   : > { %v1462_v17 = vadd.f32 %v1400_v32, %v1049_v62  ;;  %v5806_v13 = vpack.c.b16 %v2606_v49, %v2605_v52  ;;  %v1292_v62 = vunpack.c.l.b16 %v1257_v11  ;;  %v1293_v32 = vunpack.c.l.b16 %v1260_v26 }
 0x153   : > { %4625 = vmatmul.msk.bf16.gmra.mxu3 %vm736_vm3, %v4996_v34  ;;  %6563 = vst [vmem:[#allocation2_spill] sm:$0xff] %v5808_v1  ;;  %v3176_v34 = vshll.u32 %v5804_v21, 16  ;;  %v2205_v11 = vrot.slane %v2203_v37, 5  ;;  %v3172_v26 = vrot.slane %v3170_v36, 5  ;;  %v2196_v31 = vsel %vm5193_vm4, %v2191_v51, %v2195_v30  ;;  %v4915_v51 = vld [vmem:[%s5174_s27 + $0x18] sm:$0xe] }
 0x154   : > { %v2346_v20 = vpop.f32.mrf.mxu0  ;;  %v1309_v28 = vpack.c.b16 %v1293_v32, %v1292_v62  ;;  %v4997_v32 = vld [vmem:[%s5174_s27 + $0xc0] sm:$0xff]  ;;  %v2238_v30 = vunpack.c.l.b16 %v2196_v31 }
 0x155   : > { %v3178_v49 = vrot.slane %v3176_v34, 5  ;;  %v2206_v61 = vsel %vm5193_vm4, %v2201_v40, %v2205_v11  ;;  %v3173_v37 = vor.u32 %v3172_v26, %v3169_v27  ;;  %v4854_v40 = vld [vmem:[%s5174_s27 + $0x24] sm:$0xf]  ;;  %v5834_v11 = vld [vmem:[%s5174_s27 + $0x28] sm:$0xf] }
 0x156   : > { %v1693_v33 = vpop.f32.mrf.mxu3  ;;  %v1053_v54 = vpop.f32.mrf.mxu1  ;;  %v2239_v36 = vunpack.c.l.b16 %v2206_v61 }
 0x157   : > { %v1755_v19 = vadd.f32 %v1693_v33, %v1462_v17  ;;  %4689 = vmatmul.msk.bf16.gmra.mxu0 %vm736_vm3, %v2254_v16  ;;  %v5819_v17 = vld [vmem:[%s5174_s27 + $0x20] sm:$0x1]  ;;  %v1054_v14 = vadd.f32 %v1053_v54, %v5579_v2  ;;  %v3174_v50 = vrot.slane %v3173_v37, 4  ;;  %v5063_v54 = vld [vmem:[%s5174_s27 + $0x1c] sm:$0xf] }
 0x158   : > { %v2501_v26 = vrot.slane %v5063_v54, 5  ;;  %v4692_v37 = vld [vmem:[%s5174_s27 + $0x18] sm:$0xe] }
 0x159   : > { %v1402_v5 = vpop.f32.mrf.mxu2  ;;  %4482 = vmatmul.msk.bf16.gmra.mxu1 %vm736_vm3, %v4981_v41  ;;  %v5816_v1 = vadd.f32 %v2346_v20, %v1755_v19  ;;  %v3183_v41 = vor.u32 %v3182_v57, %v3178_v49  ;;  %v3186_v20 = vshll.u32 %v5819_v17, 16  ;;  %v3179_v31 = vsel %vm5193_vm4, %v3174_v50, %v3178_v49 }
 0x15a   : > { %v1463_v52 = vadd.f32 %v1402_v5, %v1051_v15  ;;  %v2255_v5 = vpack.c.b16 %v2239_v36, %v2238_v30  ;;  %v3844_v49 = vrot.slane %v5819_v17, 5  ;;  %v5064_v30 = vld [vmem:[%s5174_s27 + $0x20] sm:$0x1]  ;;  %v4708_v50 = vrot.slane %v4692_v37, 9 }
 0x15b   : > { %v3184_v19 = vrot.slane %v3183_v41, 4  ;;  %v3188_v15 = vrot.slane %v3186_v20, 5  ;;  %v3191_v41 = vshrl.u32 %v4854_v40, 16  ;;  %v3194_v20 = vshll.u32 %v4854_v40, 16 }
 0x15c   : > { %v2348_v16 = vpop.f32.mrf.mxu0  ;;  %v2504_v36 = vrot.slane %v5064_v30, 5  ;;  %v2502_v37 = vsel %vm5368_vm7, %v4708_v50, %v2501_v26  ;;  %v4857_v50 = vld [vmem:[%s5174_s27 + $0x30] sm:$0xf] }
 0x15d   : > { %v3189_v61 = vsel %vm5193_vm4, %v3184_v19, %v3188_v15  ;;  %v2503_v19 = vrot.slane %v2501_v26, 4  ;;  %v3196_v17 = vrot.slane %v3194_v20, 5 }
 0x15e   : > { %v1695_v24 = vpop.f32.mrf.mxu3  ;;  %4514 = vmatmul.msk.bf16.gmra.mxu2 %vm736_vm3, %v1309_v28  ;;  %v1055_v45 = vpop.f32.mrf.mxu1  ;;  %v3841_v28 = vrot.slane %v5804_v21, 5  ;;  %v3552_v40 = vunpack.c.l.b16 %v3189_v61 }
 0x15f   : > { %v1756_v62 = vadd.f32 %v1695_v24, %v1463_v52  ;;  %v4931_v24 = vrot.slane %v4915_v51, 9  ;;  %v4998_v51 = vld [vmem:[%s5174_s27 + $0x18] sm:$0xff]  ;;  %v2505_v61 = vsel %vm5368_vm7, %v2503_v19, %v2504_v36  ;;  %v5874_v19 = vld [vmem:[%s5174_s27 + $0x34] sm:$0xf] }
 0x161   : > { %v1405_v33 = vpop.f32.mrf.mxu2  ;;  %v5836_v27 = vadd.f32 %v2348_v16, %v1756_v62  ;;  %v3200_v16 = vshll.u32 %v5834_v11, 16  ;;  %v3204_v62 = vshrl.u32 %v5834_v11, 16 }
 0x162   : > { %v1464_v34 = vadd.f32 %v1405_v33, %v1054_v14  ;;  %v3843_v14 = vrot.slane %v3841_v28, 4 }
 0x163   : > { %4626 = vmatmul.msk.bf16.gmra.mxu3 %vm736_vm3, %v4997_v32  ;;  %v1056_v32 = vadd.f32 %v1055_v45, %v5599_v43  ;;  %v3193_v45 = vrot.slane %v3191_v41, 4  ;;  %v5857_v54 = vrot.slane %v3200_v16, 5 }
 0x164   : > { %v2351_v2 = vpop.f32.mrf.mxu0 }
 0x165   : > { %v3197_v16 = vor.u32 %v3196_v17, %v3193_v45  ;;  %v4916_v45 = vld [vmem:[%s5174_s27 + $0x24] sm:$0xe] }
 0x166   : > { %v1698_v52 = vpop.f32.mrf.mxu3  ;;  %v1058_v57 = vpop.f32.mrf.mxu1 }
 0x167   : > { %v1757_v21 = vadd.f32 %v1698_v52, %v1464_v34  ;;  %4690 = vmatmul.msk.bf16.gmra.mxu0 %vm736_vm3, %v2255_v5  ;;  %v3551_v34 = vunpack.c.l.b16 %v3179_v31  ;;  %v3842_v5 = vsel %vm5368_vm7, %v4931_v24, %v3841_v28  ;;  %v3206_v52 = vrot.slane %v3204_v62, 4 }
 0x168   : > { %v3952_v24 = vunpack.c.l.b16 %v3842_v5  ;;  %v1059_v26 = vadd.f32 %v1058_v57, %v5479_v48  ;;  %v3848_v48 = vrot.slane %v5834_v11, 5 }
 0x169   : > { %v1407_v33 = vpop.f32.mrf.mxu2  ;;  %4723 = vmatmul.msk.bf16.vlgmr.msra.gmra.mxu1 %vm736_vm3, %v5806_v13  ;;  %v5855_v43 = vadd.f32 %v2351_v2, %v1757_v21  ;;  %v3845_v13 = vsel %vm5368_vm7, %v3843_v14, %v3844_v49  ;;  %v3583_v2 = vpack.c.b16 %v3552_v40, %v3551_v34  ;;  %v3207_v62 = vor.u32 %v3206_v52, %v5857_v54 }
 0x16a   : > { %v1465_v15 = vadd.f32 %v1407_v33, %v1056_v32  ;;  %v5866_v32 = vld [vmem:[%s5174_s27 + $0x2c] sm:$0x1]  ;;  %v3953_v20 = vunpack.c.l.b16 %v3845_v13  ;;  %v2607_v14 = vunpack.c.l.b16 %v2502_v37  ;;  %v2608_v49 = vunpack.c.l.b16 %v2505_v61 }
 0x16b   : > { %v3210_v30 = vshll.u32 %v5866_v32, 16  ;;  %v3215_v52 = vshrl.u32 %v4857_v50, 16  ;;  %v3218_v13 = vshll.u32 %v4857_v50, 16  ;;  %v3224_v37 = vshll.u32 %v5874_v19, 16 }
 0x16c   : > { %v2353_v31 = vpop.f32.mrf.mxu0  ;;  %v3984_v34 = vpack.c.b16 %v3953_v20, %v3952_v24  ;;  %v2638_v40 = vpack.c.b16 %v2608_v49, %v2607_v14  ;;  %v3228_v61 = vshrl.u32 %v5874_v19, 16  ;;  %v5065_v24 = vld [vmem:[%s5174_s27 + $0x28] sm:$0xf]  ;;  %v4932_v14 = vrot.slane %v4916_v45, 9 }
 0x16d   : > { %v3212_v5 = vrot.slane %v3210_v30, 5  ;;  %v2508_v20 = vrot.slane %v5065_v24, 5  ;;  %v3851_v11 = vrot.slane %v5866_v32, 5  ;;  %v3220_v45 = vrot.slane %v3218_v13, 5  ;;  %v4999_v24 = vld [vmem:[%s5174_s27 + $0x24] sm:$0xff] }
 0x16e   : > { %v1700_v28 = vpop.f32.mrf.mxu3  ;;  %4835 = vmatmul.msk.bf16.vlgmr.msra.gmra.mxu2 %vm736_vm3, %v4998_v51  ;;  %v1060_v41 = vpop.f32.mrf.mxu1  ;;  %v3208_v51 = vrot.slane %v3207_v62, 4  ;;  %v5895_v32 = vrot.slane %v3224_v37, 5 }
 0x16f   : > { %v1758_v21 = vadd.f32 %v1700_v28, %v1465_v15  ;;  %v3198_v15 = vrot.slane %v3197_v16, 4  ;;  %v5066_v16 = vld [vmem:[%s5174_s27 + $0x2c] sm:$0x1] }
 0x170   : > { %v2511_v62 = vrot.slane %v5066_v16, 5  ;;  %v3213_v30 = vsel %vm5193_vm4, %v3208_v51, %v3212_v5  ;;  %v3849_v5 = vsel %vm5368_vm7, %v4932_v14, %v3848_v48 }
 0x171   : > { %v1410_v36 = vpop.f32.mrf.mxu2  ;;  %v5879_v57 = vadd.f32 %v2353_v31, %v1758_v21  ;;  %v4693_v31 = vld [vmem:[%s5174_s27 + $0x24] sm:$0xe]  ;;  %v1061_v21 = vadd.f32 %v1060_v41, %v5500_v12  ;;  %v3203_v49 = vsel %vm5193_vm4, %v3198_v15, %v5857_v54  ;;  %v2510_v41 = vrot.slane %v2508_v20, 4 }
 0x172   : > { %v1466_v33 = vadd.f32 %v1410_v36, %v1059_v26  ;;  %v3850_v36 = vrot.slane %v3848_v48, 4  ;;  %v4709_v12 = vrot.slane %v4693_v31, 9  ;;  %v3553_v54 = vunpack.c.l.b16 %v3203_v49 }
 0x173   : > { %4899 = vmatmul.msk.bf16.vlgmr.msra.gmra.mxu3 %vm736_vm3, %v3583_v2  ;;  %6564 = vst [vmem:[#allocation3_spill] sm:$0xff] %v5879_v57  ;;  %v3554_v15 = vunpack.c.l.b16 %v3213_v30  ;;  %v5901_v57 = vld [vmem:[%s5174_s27 + $0x38] sm:$0x1] }
 0x174   : > { %v2356_v17 = vpop.f32.mrf.mxu0  ;;  %v3234_v48 = vshll.u32 %v5901_v57, 16 }
 0x175   : > { %v3584_v31 = vpack.c.b16 %v3554_v15, %v3553_v54  ;;  %v5067_v15 = vld [vmem:[%s5174_s27 + $0x34] sm:$0xf] }
 0x176   : > { %v1703_v28 = vpop.f32.mrf.mxu3  ;;  %v1063_v2 = vpop.f32.mrf.mxu1 }
 0x177   : > { %v1759_v26 = vadd.f32 %v1703_v28, %v1466_v33  ;;  %4947 = vmatmul.msk.bf16.vlgmr.msra.gmra.mxu0 %vm736_vm3, %v3984_v34  ;;  %v3217_v33 = vrot.slane %v3215_v52, 4  ;;  %v3230_v28 = vrot.slane %v3228_v61, 4  ;;  %v2512_v61 = vsel %vm5368_vm7, %v2510_v41, %v2511_v62  ;;  %v5920_v41 = vld [vmem:[%s5174_s27 + $0x40] sm:$0xf] }
 0x179   : > { %v1412_v50 = vpop.f32.mrf.mxu2  ;;  %4724 = vmatmul.msk.bf16.gmra.mxu1 %vm736_vm3, %v2638_v40  ;;  %v5898_v16 = vadd.f32 %v2356_v17, %v1759_v26  ;;  %v3852_v40 = vsel %vm5368_vm7, %v3850_v36, %v3851_v11  ;;  %v3221_v52 = vor.u32 %v3220_v45, %v3217_v33  ;;  %v2509_v17 = vsel %vm5368_vm7, %v4709_v12, %v2508_v20 }
 0x17a   : > { %v1467_v34 = vadd.f32 %v1412_v50, %v1061_v21  ;;  %v3231_v26 = vor.u32 %v3230_v28, %v5895_v32  ;;  %v1064_v11 = vadd.f32 %v1063_v2, %v5519_v39  ;;  %v3954_v21 = vunpack.c.l.b16 %v3849_v5  ;;  %v4917_v28 = vld [vmem:[%s5174_s27 + $0x30] sm:$0xe] }
 0x17b   : > { %v3955_v49 = vunpack.c.l.b16 %v3852_v40  ;;  %v2609_v36 = vunpack.c.l.b16 %v2509_v17  ;;  %v2610_v20 = vunpack.c.l.b16 %v2512_v61  ;;  %v3222_v33 = vrot.slane %v3221_v52, 4 }
 0x17c   : > { %v2358_v51 = vpop.f32.mrf.mxu0  ;;  %v3232_v62 = vrot.slane %v3231_v26, 4  ;;  %v3236_v45 = vrot.slane %v3234_v48, 5  ;;  %v3855_v12 = vrot.slane %v5874_v19, 5  ;;  %v2515_v5 = vrot.slane %v5067_v15, 5  ;;  %v4694_v19 = vld [vmem:[%s5174_s27 + $0x30] sm:$0xe] }
 0x17d   : > { %v2639_v54 = vpack.c.b16 %v2610_v20, %v2609_v36  ;;  %v4933_v61 = vrot.slane %v4917_v28, 9 }
 0x17e   : > { %v1705_v13 = vpop.f32.mrf.mxu3  ;;  %4836 = vmatmul.msk.bf16.gmra.mxu2 %vm736_vm3, %v4999_v24  ;;  %v1065_v37 = vpop.f32.mrf.mxu1  ;;  %v4860_v24 = vld [vmem:[%s5174_s27 + $0x3c] sm:$0xf]  ;;  %v3237_v17 = vsel %vm5193_vm4, %v3232_v62, %v3236_v45  ;;  %v5000_v45 = vld [vmem:[%s5174_s27 + $0x30] sm:$0xff] }
 0x17f   : > { %v1760_v14 = vadd.f32 %v1705_v13, %v1467_v34  ;;  %v3985_v34 = vpack.c.b16 %v3955_v49, %v3954_v21  ;;  %v3227_v13 = vsel %vm5193_vm4, %v3222_v33, %v5895_v32  ;;  %v3239_v26 = vshrl.u32 %v4860_v24, 16  ;;  %v5068_v49 = vld [vmem:[%s5174_s27 + $0x38] sm:$0x1] }
 0x180   : > { %v3857_v21 = vrot.slane %v3855_v12, 4  ;;  %v3858_v32 = vrot.slane %v5901_v57, 5  ;;  %v3555_v20 = vunpack.c.l.b16 %v3227_v13  ;;  %v2517_v33 = vrot.slane %v2515_v5, 4 }
 0x181   : > { %v1415_v30 = vpop.f32.mrf.mxu2  ;;  %v5922_v39 = vadd.f32 %v2358_v51, %v1760_v14  ;;  %v3242_v51 = vshll.u32 %v4860_v24, 16  ;;  %v3248_v14 = vshll.u32 %v5920_v41, 16  ;;  %v3556_v28 = vunpack.c.l.b16 %v3237_v17 }
 0x182   : > { %v1468_v50 = vadd.f32 %v1415_v30, %v1064_v11  ;;  %v1066_v11 = vadd.f32 %v1065_v37, %v5544_v6  ;;  %v2518_v30 = vrot.slane %v5068_v49, 5  ;;  %v3856_v24 = vsel %vm5368_vm7, %v4933_v61, %v3855_v12 }
 0x183   : > { %4900 = vmatmul.msk.bf16.gmra.mxu3 %vm736_vm3, %v3584_v31  ;;  %v3252_v31 = vshrl.u32 %v5920_v41, 16  ;;  %v3241_v6 = vrot.slane %v3239_v26, 4  ;;  %v3244_v37 = vrot.slane %v3242_v51, 5  ;;  %v5943_v57 = vrot.slane %v3248_v14, 5 }
 0x184   : > { %v2361_v2 = vpop.f32.mrf.mxu0  ;;  %v2519_v17 = vsel %vm5368_vm7, %v2517_v33, %v2518_v30  ;;  %v3956_v61 = vunpack.c.l.b16 %v3856_v24  ;;  %v4918_v24 = vld [vmem:[%s5174_s27 + $0x3c] sm:$0xe] }
 0x185   : > { %v3254_v15 = vrot.slane %v3252_v31, 4  ;;  %v3245_v14 = vor.u32 %v3244_v37, %v3241_v6 }
 0x186   : > { %v1708_v40 = vpop.f32.mrf.mxu3  ;;  %v1068_v52 = vpop.f32.mrf.mxu1 }
 0x187   : > { %v1761_v48 = vadd.f32 %v1708_v40, %v1468_v50  ;;  %4948 = vmatmul.msk.bf16.gmra.mxu0 %vm736_vm3, %v3985_v34  ;;  %v4710_v50 = vrot.slane %v4694_v19, 9  ;;  %v5952_v19 = vld [vmem:[%s5174_s27 + $0x44] sm:$0x1]  ;;  %v3255_v31 = vor.u32 %v3254_v15, %v5943_v57  ;;  %v3246_v33 = vrot.slane %v3245_v14, 4 }
 0x189   : > { %v1417_v36 = vpop.f32.mrf.mxu2  ;;  %4725 = vmatmul.msk.bf16.gmra.mxu1 %vm736_vm3, %v2639_v54  ;;  %v5941_v34 = vadd.f32 %v2361_v2, %v1761_v48  ;;  %v3859_v54 = vsel %vm5368_vm7, %v3857_v21, %v3858_v32  ;;  %v2516_v13 = vsel %vm5368_vm7, %v4710_v50, %v2515_v5  ;;  %v3585_v2 = vpack.c.b16 %v3556_v28, %v3555_v20  ;;  %v5960_v50 = vld [vmem:[%s5174_s27 + $0x4c] sm:$0xf] }
 0x18a   : > { %v1469_v62 = vadd.f32 %v1417_v36, %v1066_v11  ;;  %v3957_v51 = vunpack.c.l.b16 %v3859_v54  ;;  %v1069_v5 = vadd.f32 %v1068_v52, %v5564_v42  ;;  %v2611_v11 = vunpack.c.l.b16 %v2516_v13  ;;  %v4863_v36 = vld [vmem:[%s5174_s27 + $0x48] sm:$0xf] }
 0x18b   : > { %v2612_v21 = vunpack.c.l.b16 %v2519_v17  ;;  %v3258_v32 = vshll.u32 %v5952_v19, 16  ;;  %v3862_v42 = vrot.slane %v5920_v41, 5  ;;  %v3263_v37 = vshrl.u32 %v4863_v36, 16 }
 0x18c   : > { %v2363_v40 = vpop.f32.mrf.mxu0  ;;  %v3986_v20 = vpack.c.b16 %v3957_v51, %v3956_v61  ;;  %v3266_v15 = vshll.u32 %v4863_v36, 16  ;;  %v3272_v54 = vshll.u32 %v5960_v50, 16  ;;  %v3276_v13 = vshrl.u32 %v5960_v50, 16  ;;  %v5070_v51 = vld [vmem:[%s5174_s27 + $0x44] sm:$0x1] }
 0x18d   : > { %v3260_v28 = vrot.slane %v3258_v32, 5  ;;  %v2525_v14 = vrot.slane %v5070_v51, 5  ;;  %v3865_v41 = vrot.slane %v5952_v19, 5  ;;  %v3864_v32 = vrot.slane %v3862_v42, 4  ;;  %v5987_v51 = vld [vmem:[%s5174_s27 + $0x50] sm:$0x1] }
 0x18e   : > { %v1710_v12 = vpop.f32.mrf.mxu3  ;;  %4837 = vmatmul.msk.bf16.gmra.mxu2 %vm736_vm3, %v5000_v45  ;;  %v1070_v26 = vpop.f32.mrf.mxu1  ;;  %v2640_v45 = vpack.c.b16 %v2612_v21, %v2611_v11  ;;  %v3251_v11 = vsel %vm5193_vm4, %v3246_v33, %v5943_v57  ;;  %v3268_v36 = vrot.slane %v3266_v15, 5  ;;  %v5981_v19 = vrot.slane %v3272_v54, 5 }
 0x18f   : > { %v1762_v48 = vadd.f32 %v1710_v12, %v1469_v62  ;;  %v3256_v62 = vrot.slane %v3255_v31, 4  ;;  %v3557_v57 = vunpack.c.l.b16 %v3251_v11 }
 0x191   : > { %v1420_v49 = vpop.f32.mrf.mxu2  ;;  %v5965_v52 = vadd.f32 %v2363_v40, %v1762_v48  ;;  %v4695_v40 = vld [vmem:[%s5174_s27 + $0x3c] sm:$0xe]  ;;  %v1071_v48 = vadd.f32 %v1070_v26, %v5581_v7  ;;  %v3261_v21 = vsel %vm5193_vm4, %v3256_v62, %v3260_v28 }
 0x192   : > { %v1470_v30 = vadd.f32 %v1420_v49, %v1069_v5  ;;  %v4934_v5 = vrot.slane %v4918_v24, 9  ;;  %v3278_v24 = vrot.slane %v3276_v13, 4  ;;  %v4711_v7 = vrot.slane %v4695_v40, 9 }
 0x193   : > { %4901 = vmatmul.msk.bf16.gmra.mxu3 %vm736_vm3, %v3585_v2  ;;  %v5069_v2 = vld [vmem:[%s5174_s27 + $0x40] sm:$0xf]  ;;  %v3558_v33 = vunpack.c.l.b16 %v3261_v21 }
 0x194   : > { %v2366_v6 = vpop.f32.mrf.mxu0  ;;  %v2522_v61 = vrot.slane %v5069_v2, 5  ;;  %v3863_v28 = vsel %vm5368_vm7, %v4934_v5, %v3862_v42  ;;  %v3282_v42 = vshll.u32 %v5987_v51, 16 }
 0x195   : > { %v3586_v40 = vpack.c.b16 %v3558_v33, %v3557_v57  ;;  %v5071_v33 = vld [vmem:[%s5174_s27 + $0x4c] sm:$0xf] }
 0x196   : > { %v1713_v17 = vpop.f32.mrf.mxu3  ;;  %v1073_v12 = vpop.f32.mrf.mxu1  ;;  %v2524_v26 = vrot.slane %v2522_v61, 4 }
 0x197   : > { %v1763_v31 = vadd.f32 %v1713_v17, %v1470_v30  ;;  %4949 = vmatmul.msk.bf16.gmra.mxu0 %vm736_vm3, %v3986_v20  ;;  %v3265_v30 = vrot.slane %v3263_v37, 4  ;;  %v5001_v17 = vld [vmem:[%s5174_s27 + $0x3c] sm:$0xff] }
 0x198   : > { %v2526_v13 = vsel %vm5368_vm7, %v2524_v26, %v2525_v14  ;;  %v6006_v26 = vld [vmem:[%s5174_s27 + $0x58] sm:$0xf] }
 0x199   : > { %v1422_v49 = vpop.f32.mrf.mxu2  ;;  %4726 = vmatmul.msk.bf16.gmra.mxu1 %vm736_vm3, %v2640_v45  ;;  %v5984_v2 = vadd.f32 %v2366_v6, %v1763_v31  ;;  %v3866_v45 = vsel %vm5368_vm7, %v3864_v32, %v3865_v41  ;;  %v3269_v37 = vor.u32 %v3268_v36, %v3265_v30  ;;  %v2523_v6 = vsel %vm5368_vm7, %v4711_v7, %v2522_v61 }
 0x19a   : > { %v1471_v20 = vadd.f32 %v1422_v49, %v1071_v48  ;;  %v3279_v31 = vor.u32 %v3278_v24, %v5981_v19  ;;  %v1074_v41 = vadd.f32 %v1073_v12, %v5602_v56  ;;  %v3958_v48 = vunpack.c.l.b16 %v3863_v28  ;;  %v4919_v24 = vld [vmem:[%s5174_s27 + $0x48] sm:$0xe] }
 0x19b   : > { %v3959_v11 = vunpack.c.l.b16 %v3866_v45  ;;  %v2613_v32 = vunpack.c.l.b16 %v2523_v6  ;;  %v2614_v61 = vunpack.c.l.b16 %v2526_v13  ;;  %v3270_v30 = vrot.slane %v3269_v37, 4 }
 0x19c   : > { %v2368_v62 = vpop.f32.mrf.mxu0  ;;  %v3280_v14 = vrot.slane %v3279_v31, 4  ;;  %v3284_v36 = vrot.slane %v3282_v42, 5  ;;  %v3869_v7 = vrot.slane %v5960_v50, 5  ;;  %v2529_v28 = vrot.slane %v5071_v33, 5  ;;  %v4696_v50 = vld [vmem:[%s5174_s27 + $0x48] sm:$0xe] }
 0x19d   : > { %v2641_v57 = vpack.c.b16 %v2614_v61, %v2613_v32  ;;  %v4935_v13 = vrot.slane %v4919_v24, 9 }
 0x19e   : > { %v1715_v15 = vpop.f32.mrf.mxu3  ;;  %4838 = vmatmul.msk.bf16.gmra.mxu2 %vm736_vm3, %v5001_v17  ;;  %v1075_v54 = vpop.f32.mrf.mxu1  ;;  %v4866_v17 = vld [vmem:[%s5174_s27 + $0x54] sm:$0xf]  ;;  %v3285_v6 = vsel %vm5193_vm4, %v3280_v14, %v3284_v36  ;;  %v5002_v36 = vld [vmem:[%s5174_s27 + $0x48] sm:$0xff] }
 0x19f   : > { %v1764_v5 = vadd.f32 %v1715_v15, %v1471_v20  ;;  %v3987_v20 = vpack.c.b16 %v3959_v11, %v3958_v48  ;;  %v3275_v15 = vsel %vm5193_vm4, %v3270_v30, %v5981_v19  ;;  %v3287_v31 = vshrl.u32 %v4866_v17, 16  ;;  %v5072_v11 = vld [vmem:[%s5174_s27 + $0x50] sm:$0x1] }
 0x1a0   : > { %v3871_v48 = vrot.slane %v3869_v7, 4  ;;  %v3872_v19 = vrot.slane %v5987_v51, 5  ;;  %v3559_v61 = vunpack.c.l.b16 %v3275_v15  ;;  %v2531_v30 = vrot.slane %v2529_v28, 4 }
 0x1a1   : > { %v1425_v21 = vpop.f32.mrf.mxu2  ;;  %v6008_v56 = vadd.f32 %v2368_v62, %v1764_v5  ;;  %v3290_v62 = vshll.u32 %v4866_v17, 16  ;;  %v3296_v5 = vshll.u32 %v6006_v26, 16  ;;  %v3560_v24 = vunpack.c.l.b16 %v3285_v6 }
 0x1a2   : > { %v1472_v49 = vadd.f32 %v1425_v21, %v1074_v41  ;;  %v1076_v41 = vadd.f32 %v1075_v54, %v5617_v23  ;;  %v2532_v21 = vrot.slane %v5072_v11, 5  ;;  %v3870_v17 = vsel %vm5368_vm7, %v4935_v13, %v3869_v7 }
 0x1a3   : > { %4902 = vmatmul.msk.bf16.gmra.mxu3 %vm736_vm3, %v3586_v40  ;;  %v3300_v40 = vshrl.u32 %v6006_v26, 16  ;;  %v3289_v23 = vrot.slane %v3287_v31, 4  ;;  %v3292_v54 = vrot.slane %v3290_v62, 5  ;;  %v6029_v51 = vrot.slane %v3296_v5, 5 }
 0x1a4   : > { %v2371_v12 = vpop.f32.mrf.mxu0  ;;  %v2533_v6 = vsel %vm5368_vm7, %v2531_v30, %v2532_v21  ;;  %v3960_v13 = vunpack.c.l.b16 %v3870_v17  ;;  %v4920_v17 = vld [vmem:[%s5174_s27 + $0x54] sm:$0xe] }
 0x1a5   : > { %v3302_v33 = vrot.slane %v3300_v40, 4  ;;  %v3293_v5 = vor.u32 %v3292_v54, %v3289_v23 }
 0x1a6   : > { %v1718_v45 = vpop.f32.mrf.mxu3  ;;  %v1078_v37 = vpop.f32.mrf.mxu1 }
 0x1a7   : > { %v1765_v42 = vadd.f32 %v1718_v45, %v1472_v49  ;;  %4950 = vmatmul.msk.bf16.gmra.mxu0 %vm736_vm3, %v3987_v20  ;;  %v4712_v49 = vrot.slane %v4696_v50, 9  ;;  %v6038_v50 = vld [vmem:[%s5174_s27 + $0x5c] sm:$0x1]  ;;  %v3303_v40 = vor.u32 %v3302_v33, %v6029_v51  ;;  %v3294_v30 = vrot.slane %v3293_v5, 4 }
 0x1a9   : > { %v1427_v32 = vpop.f32.mrf.mxu2  ;;  %4727 = vmatmul.msk.bf16.gmra.mxu1 %vm736_vm3, %v2641_v57  ;;  %v6027_v20 = vadd.f32 %v2371_v12, %v1765_v42  ;;  %v3873_v57 = vsel %vm5368_vm7, %v3871_v48, %v3872_v19  ;;  %v2530_v15 = vsel %vm5368_vm7, %v4712_v49, %v2529_v28  ;;  %v3587_v12 = vpack.c.b16 %v3560_v24, %v3559_v61  ;;  %v6046_v49 = vld [vmem:[%s5174_s27 + $0x64] sm:$0xf] }
 0x1aa   : > { %v1473_v14 = vadd.f32 %v1427_v32, %v1076_v41  ;;  %v3961_v62 = vunpack.c.l.b16 %v3873_v57  ;;  %v1079_v28 = vadd.f32 %v1078_v37, %v5494_v63  ;;  %v2615_v41 = vunpack.c.l.b16 %v2530_v15  ;;  %v4869_v32 = vld [vmem:[%s5174_s27 + $0x60] sm:$0xf] }
 0x1ab   : > { %v2616_v48 = vunpack.c.l.b16 %v2533_v6  ;;  %v3306_v19 = vshll.u32 %v6038_v50, 16  ;;  %v3876_v63 = vrot.slane %v6006_v26, 5  ;;  %v3311_v54 = vshrl.u32 %v4869_v32, 16 }
 0x1ac   : > { %v2373_v45 = vpop.f32.mrf.mxu0  ;;  %v3988_v61 = vpack.c.b16 %v3961_v62, %v3960_v13  ;;  %v3314_v33 = vshll.u32 %v4869_v32, 16  ;;  %v3320_v57 = vshll.u32 %v6046_v49, 16  ;;  %v3324_v15 = vshrl.u32 %v6046_v49, 16  ;;  %v5074_v62 = vld [vmem:[%s5174_s27 + $0x5c] sm:$0x1] }
 0x1ad   : > { %v3308_v24 = vrot.slane %v3306_v19, 5  ;;  %v2539_v5 = vrot.slane %v5074_v62, 5  ;;  %v3879_v26 = vrot.slane %v6038_v50, 5  ;;  %v3878_v19 = vrot.slane %v3876_v63, 4 }
 0x1ae   : > { %v1720_v7 = vpop.f32.mrf.mxu3  ;;  %4839 = vmatmul.msk.bf16.gmra.mxu2 %vm736_vm3, %v5002_v36  ;;  %v1080_v31 = vpop.f32.mrf.mxu1  ;;  %v2642_v36 = vpack.c.b16 %v2616_v48, %v2615_v41  ;;  %v3299_v41 = vsel %vm5193_vm4, %v3294_v30, %v6029_v51  ;;  %v3316_v32 = vrot.slane %v3314_v33, 5  ;;  %v3322_v50 = vrot.slane %v3320_v57, 5  ;;  %v6071_v30 = vld [vmem:[%s5174_s27 + $0x68] sm:$0x1] }
 0x1af   : > { %v1766_v42 = vadd.f32 %v1720_v7, %v1473_v14  ;;  %v3304_v14 = vrot.slane %v3303_v40, 4  ;;  %v3561_v62 = vunpack.c.l.b16 %v3299_v41 }
 0x1b1   : > { %v1430_v11 = vpop.f32.mrf.mxu2  ;;  %v6051_v37 = vadd.f32 %v2373_v45, %v1766_v42  ;;  %v4697_v45 = vld [vmem:[%s5174_s27 + $0x54] sm:$0xe]  ;;  %v1081_v42 = vadd.f32 %v1080_v31, %v5513_v25  ;;  %v3309_v48 = vsel %vm5193_vm4, %v3304_v14, %v3308_v24 }
 0x1b2   : > { %v1474_v21 = vadd.f32 %v1430_v11, %v1079_v28  ;;  %v4936_v28 = vrot.slane %v4920_v17, 9  ;;  %v3326_v17 = vrot.slane %v3324_v15, 4  ;;  %v3562_v51 = vunpack.c.l.b16 %v3309_v48 }
 0x1b3   : > { %4903 = vmatmul.msk.bf16.gmra.mxu3 %vm736_vm3, %v3587_v12  ;;  %6565 = vst [vmem:[#allocation4_spill] sm:$0xff] %v6051_v37  ;;  %v5073_v12 = vld [vmem:[%s5174_s27 + $0x58] sm:$0xf] }
 0x1b4   : > { %v2376_v23 = vpop.f32.mrf.mxu0  ;;  %v2536_v13 = vrot.slane %v5073_v12, 5  ;;  %v4713_v12 = vrot.slane %v4697_v45, 9  ;;  %v3877_v14 = vsel %vm5368_vm7, %v4936_v28, %v3876_v63  ;;  %v3327_v15 = vor.u32 %v3326_v17, %v3322_v50 }
 0x1b5   : > { %v3588_v28 = vpack.c.b16 %v3562_v51, %v3561_v62  ;;  %v3962_v45 = vunpack.c.l.b16 %v3877_v14 }
 0x1b6   : > { %v1723_v6 = vpop.f32.mrf.mxu3  ;;  %v1083_v7 = vpop.f32.mrf.mxu1  ;;  %v2538_v25 = vrot.slane %v2536_v13, 4 }
 0x1b7   : > { %v1767_v40 = vadd.f32 %v1723_v6, %v1474_v21  ;;  %4951 = vmatmul.msk.bf16.gmra.mxu0 %vm736_vm3, %v3988_v61  ;;  %v3313_v21 = vrot.slane %v3311_v54, 4  ;;  %v5003_v61 = vld [vmem:[%s5174_s27 + $0x54] sm:$0xff] }
 0x1b8   : > { %v2540_v57 = vsel %vm5368_vm7, %v2538_v25, %v2539_v5  ;;  %v3883_v25 = vrot.slane %v6046_v49, 5  ;;  %v5076_v49 = vld [vmem:[%s5174_s27 + $0x68] sm:$0x1] }
 0x1b9   : > { %v1432_v11 = vpop.f32.mrf.mxu2  ;;  %4728 = vmatmul.msk.bf16.gmra.mxu1 %vm736_vm3, %v2642_v36  ;;  %v6068_v31 = vadd.f32 %v2376_v23, %v1767_v40  ;;  %v3880_v36 = vsel %vm5368_vm7, %v3878_v19, %v3879_v26  ;;  %v3317_v24 = vor.u32 %v3316_v32, %v3313_v21  ;;  %v2537_v23 = vsel %vm5368_vm7, %v4713_v12, %v2536_v13  ;;  %v4872_v32 = vld [vmem:[%s5174_s27 + $0x6c] sm:$0xf]  ;;  %v4921_v12 = vld [vmem:[%s5174_s27 + $0x60] sm:$0xe] }
 0x1ba   : > { %v1475_v6 = vadd.f32 %v1432_v11, %v1081_v42  ;;  %v3330_v40 = vshll.u32 %v6071_v30, 16  ;;  %v1084_v26 = vadd.f32 %v1083_v7, %v5534_v60  ;;  %v3963_v42 = vunpack.c.l.b16 %v3880_v36 }
 0x1bb   : > { %v2617_v48 = vunpack.c.l.b16 %v2537_v23  ;;  %v2618_v19 = vunpack.c.l.b16 %v2540_v57  ;;  %v3318_v13 = vrot.slane %v3317_v24, 4  ;;  %v3328_v21 = vrot.slane %v3327_v15, 4  ;;  %v5075_v24 = vld [vmem:[%s5174_s27 + $0x64] sm:$0xf] }
 0x1bc   : > { %v2378_v37 = vpop.f32.mrf.mxu0  ;;  %v3332_v5 = vrot.slane %v3330_v40, 5  ;;  %v3989_v17 = vpack.c.b16 %v3963_v42, %v3962_v45  ;;  %v3335_v23 = vshrl.u32 %v4872_v32, 16  ;;  %v3338_v15 = vshll.u32 %v4872_v32, 16 }
 0x1bd   : > { %v2643_v7 = vpack.c.b16 %v2618_v19, %v2617_v48  ;;  %v3323_v14 = vsel %vm5193_vm4, %v3318_v13, %v3322_v50  ;;  %v3885_v48 = vrot.slane %v3883_v25, 4  ;;  %v3886_v19 = vrot.slane %v6071_v30, 5  ;;  %v5004_v13 = vld [vmem:[%s5174_s27 + $0x60] sm:$0xff] }
 0x1be   : > { %v1725_v54 = vpop.f32.mrf.mxu3  ;;  %4840 = vmatmul.msk.bf16.gmra.mxu2 %vm736_vm3, %v5003_v61  ;;  %v1085_v33 = vpop.f32.mrf.mxu1  ;;  %v3333_v36 = vsel %vm5193_vm4, %v3328_v21, %v3332_v5  ;;  %v3563_v42 = vunpack.c.l.b16 %v3323_v14 }
 0x1bf   : > { %v1768_v63 = vadd.f32 %v1725_v54, %v1475_v6  ;;  %v6087_v6 = vld [vmem:[%s5174_s27 + $0x70] sm:$0xf]  ;;  %v2543_v54 = vrot.slane %v5075_v24, 5  ;;  %v1086_v50 = vadd.f32 %v1085_v33, %v5552_v18  ;;  %v6112_v33 = vld [vmem:[%s5174_s27 + $0x74] sm:$0x1]  ;;  %v3887_v30 = vsel %vm5368_vm7, %v3885_v48, %v3886_v19 }
 0x1c0   : > { %v3344_v40 = vshll.u32 %v6087_v6, 16 }
 0x1c1   : > { %v1435_v41 = vpop.f32.mrf.mxu2  ;;  %v6089_v61 = vadd.f32 %v2378_v37, %v1768_v63  ;;  %v4698_v37 = vld [vmem:[%s5174_s27 + $0x60] sm:$0xe]  ;;  %v3348_v63 = vshrl.u32 %v6087_v6, 16  ;;  %v2545_v5 = vrot.slane %v2543_v54, 4 }
 0x1c2   : > { %v1476_v11 = vadd.f32 %v1435_v41, %v1084_v26  ;;  %v4937_v26 = vrot.slane %v4921_v12, 9  ;;  %v3564_v41 = vunpack.c.l.b16 %v3333_v36  ;;  %v4714_v21 = vrot.slane %v4698_v37, 9 }
 0x1c3   : > { %4904 = vmatmul.msk.bf16.gmra.mxu3 %vm736_vm3, %v3588_v28  ;;  %v2546_v28 = vrot.slane %v5076_v49, 5  ;;  %v6109_v24 = vrot.slane %v3344_v40, 5  ;;  %v3350_v18 = vrot.slane %v3348_v63, 4  ;;  %v3354_v40 = vshll.u32 %v6112_v33, 16 }
 0x1c4   : > { %v2381_v60 = vpop.f32.mrf.mxu0 }
 0x1c5   : > { %v3356_v19 = vrot.slane %v3354_v40, 5 }
 0x1c6   : > { %v1728_v62 = vpop.f32.mrf.mxu3  ;;  %v1088_v51 = vpop.f32.mrf.mxu1 }
 0x1c7   : > { %v1769_v57 = vadd.f32 %v1728_v62, %v1476_v11  ;;  %4952 = vmatmul.msk.bf16.gmra.mxu0 %vm736_vm3, %v3989_v17  ;;  %v3337_v62 = vrot.slane %v3335_v23, 4  ;;  %v3340_v17 = vrot.slane %v3338_v15, 5  ;;  %v2544_v23 = vsel %vm5368_vm7, %v4714_v21, %v2543_v54  ;;  %v4875_v54 = vld [vmem:[%s5174_s27 + $0x78] sm:$0xf] }
 0x1c8   : > { %v1089_v63 = vadd.f32 %v1088_v51, %v5571_v58  ;;  %v3890_v21 = vrot.slane %v6087_v6, 5 }
 0x1c9   : > { %v1437_v45 = vpop.f32.mrf.mxu2  ;;  %4729 = vmatmul.msk.bf16.gmra.mxu1 %vm736_vm3, %v2643_v7  ;;  %v6107_v32 = vadd.f32 %v2381_v60, %v1769_v57  ;;  %v3884_v7 = vsel %vm5368_vm7, %v4937_v26, %v3883_v25  ;;  %v3589_v60 = vpack.c.b16 %v3564_v41, %v3563_v42  ;;  %v2547_v57 = vsel %vm5368_vm7, %v2545_v5, %v2546_v28 }
 0x1ca   : > { %v1477_v11 = vadd.f32 %v1437_v45, %v1086_v50  ;;  %v3341_v15 = vor.u32 %v3340_v17, %v3337_v62  ;;  %v3351_v25 = vor.u32 %v3350_v18, %v6109_v24  ;;  %v3964_v49 = vunpack.c.l.b16 %v3884_v7  ;;  %v6133_v62 = vld [vmem:[%s5174_s27 + $0x7c] sm:$0xf] }
 0x1cb   : > { %v3965_v50 = vunpack.c.l.b16 %v3887_v30  ;;  %v2619_v45 = vunpack.c.l.b16 %v2544_v23  ;;  %v2620_v42 = vunpack.c.l.b16 %v2547_v57  ;;  %v3359_v17 = vshrl.u32 %v4875_v54, 16  ;;  %v5077_v23 = vld [vmem:[%s5174_s27 + $0x70] sm:$0xf] }
 0x1cc   : > { %v2383_v12 = vpop.f32.mrf.mxu0  ;;  %v3342_v28 = vrot.slane %v3341_v15, 4  ;;  %v3352_v48 = vrot.slane %v3351_v25, 4  ;;  %v3362_v18 = vshll.u32 %v4875_v54, 16  ;;  %v2550_v57 = vrot.slane %v5077_v23, 5 }
 0x1cd   : > { %v2644_v5 = vpack.c.b16 %v2620_v42, %v2619_v45  ;;  %v3892_v40 = vrot.slane %v3890_v21, 4 }
 0x1ce   : > { %v1730_v14 = vpop.f32.mrf.mxu3  ;;  %4841 = vmatmul.msk.bf16.gmra.mxu2 %vm736_vm3, %v5004_v13  ;;  %v1090_v36 = vpop.f32.mrf.mxu1  ;;  %v3990_v13 = vpack.c.b16 %v3965_v50, %v3964_v49  ;;  %v3347_v6 = vsel %vm5193_vm4, %v3342_v28, %v6109_v24  ;;  %v3372_v49 = vshrl.u32 %v6133_v62, 16  ;;  %v3361_v24 = vrot.slane %v3359_v17, 4  ;;  %v6157_v17 = vld [vmem:[%s5174_s27 + $0x80] sm:$0x1] }
 0x1cf   : > { %v1770_v37 = vadd.f32 %v1730_v14, %v1477_v11  ;;  %v4922_v11 = vld [vmem:[%s5174_s27 + $0x6c] sm:$0xe]  ;;  %v1091_v25 = vadd.f32 %v1090_v36, %v5594_v8  ;;  %v3364_v45 = vrot.slane %v3362_v18, 5  ;;  %v2552_v54 = vrot.slane %v2550_v57, 4 }
 0x1d0   : > { %v4938_v14 = vrot.slane %v4922_v11, 9  ;;  %v3565_v8 = vunpack.c.l.b16 %v3347_v6 }
 0x1d1   : > { %v1440_v26 = vpop.f32.mrf.mxu2  ;;  %v6130_v58 = vadd.f32 %v2383_v12, %v1770_v37  ;;  %v3357_v12 = vsel %vm5193_vm4, %v3352_v48, %v3356_v19  ;;  %v3893_v37 = vrot.slane %v6112_v33, 5  ;;  %v5078_v33 = vld [vmem:[%s5174_s27 + $0x74] sm:$0x1]  ;;  %v3365_v18 = vor.u32 %v3364_v45, %v3361_v24  ;;  %v4923_v45 = vld [vmem:[%s5174_s27 + $0x78] sm:$0xe] }
 0x1d2   : > { %v1478_v41 = vadd.f32 %v1440_v26, %v1089_v63  ;;  %v3368_v63 = vshll.u32 %v6133_v62, 16  ;;  %v2553_v28 = vrot.slane %v5078_v33, 5  ;;  %v3566_v36 = vunpack.c.l.b16 %v3357_v12  ;;  %v6171_v33 = vld [vmem:[%s5174_s27 + $0x88] sm:$0xf] }
 0x1d3   : > { %4905 = vmatmul.msk.bf16.gmra.mxu3 %vm736_vm3, %v3589_v60  ;;  %v4699_v60 = vld [vmem:[%s5174_s27 + $0x6c] sm:$0xe]  ;;  %v3891_v19 = vsel %vm5368_vm7, %v4938_v14, %v3890_v21  ;;  %v3894_v11 = vsel %vm5368_vm7, %v3892_v40, %v3893_v37  ;;  %v3378_v40 = vshll.u32 %v6157_v17, 16  ;;  %v3366_v24 = vrot.slane %v3365_v18, 4 }
 0x1d4   : > { %v2386_v51 = vpop.f32.mrf.mxu0  ;;  %v4715_v26 = vrot.slane %v4699_v60, 9  ;;  %v2554_v21 = vsel %vm5368_vm7, %v2552_v54, %v2553_v28  ;;  %v3966_v6 = vunpack.c.l.b16 %v3891_v19  ;;  %v3967_v12 = vunpack.c.l.b16 %v3894_v11 }
 0x1d6   : > { %v1733_v7 = vpop.f32.mrf.mxu3  ;;  %v1093_v30 = vpop.f32.mrf.mxu1  ;;  %v2551_v23 = vsel %vm5368_vm7, %v4715_v26, %v2550_v57  ;;  %v4878_v57 = vld [vmem:[%s5174_s27 + $0x84] sm:$0xf]  ;;  %v3991_v26 = vpack.c.b16 %v3967_v12, %v3966_v6 }
 0x1d7   : > { %v1771_v15 = vadd.f32 %v1733_v7, %v1478_v41  ;;  %4953 = vmatmul.msk.bf16.gmra.mxu0 %vm736_vm3, %v3990_v13  ;;  %v5005_v41 = vld [vmem:[%s5174_s27 + $0x6c] sm:$0xff]  ;;  %v3370_v13 = vrot.slane %v3368_v63, 5  ;;  %v1094_v37 = vadd.f32 %v1093_v30, %v5613_v9  ;;  %v3380_v9 = vrot.slane %v3378_v40, 5 }
 0x1d8   : > { %v4939_v30 = vrot.slane %v4923_v45, 9  ;;  %v3383_v11 = vshrl.u32 %v4878_v57, 16  ;;  %v5006_v45 = vld [vmem:[%s5174_s27 + $0x78] sm:$0xff] }
 0x1d9   : > { %v1442_v50 = vpop.f32.mrf.mxu2  ;;  %4730 = vmatmul.msk.bf16.gmra.mxu1 %vm736_vm3, %v2644_v5  ;;  %v6150_v48 = vadd.f32 %v2386_v51, %v1771_v15  ;;  %v3374_v5 = vrot.slane %v3372_v49, 4  ;;  %v3590_v15 = vpack.c.b16 %v3566_v36, %v3565_v8  ;;  %v2621_v49 = vunpack.c.l.b16 %v2551_v23 }
 0x1da   : > { %v1479_v42 = vadd.f32 %v1442_v50, %v1091_v25  ;;  %v2622_v50 = vunpack.c.l.b16 %v2554_v21  ;;  %v3371_v19 = vsel %vm5193_vm4, %v3366_v24, %v3370_v13  ;;  %v3900_v23 = vrot.slane %v6157_v17, 5  ;;  %v4700_v21 = vld [vmem:[%s5174_s27 + $0x78] sm:$0xe] }
 0x1db   : > { %v3375_v25 = vor.u32 %v3374_v5, %v3370_v13  ;;  %v3386_v5 = vshll.u32 %v4878_v57, 16  ;;  %v5080_v57 = vld [vmem:[%s5174_s27 + $0x80] sm:$0x1] }
 0x1dc   : > { %v2388_v7 = vpop.f32.mrf.mxu0  ;;  %v2645_v36 = vpack.c.b16 %v2622_v50, %v2621_v49  ;;  %v3385_v49 = vrot.slane %v3383_v11, 4 }
 0x1dd   : > { %v3376_v54 = vrot.slane %v3375_v25, 4  ;;  %v3567_v25 = vunpack.c.l.b16 %v3371_v19  ;;  %v3388_v50 = vrot.slane %v3386_v5, 5  ;;  %v4880_v19 = vld [vmem:[%s5174_s27 + $0x8c] sm:$0x1] }
 0x1de   : > { %v1735_v60 = vpop.f32.mrf.mxu3  ;;  %4842 = vmatmul.msk.bf16.gmra.mxu2 %vm736_vm3, %v5005_v41  ;;  %v1095_v51 = vpop.f32.mrf.mxu1 }
 0x1df   : > { %v1772_v14 = vadd.f32 %v1735_v60, %v1479_v42  ;;  %v3897_v42 = vrot.slane %v6133_v62, 5  ;;  %v5079_v62 = vld [vmem:[%s5174_s27 + $0x7c] sm:$0xf]  ;;  %v1096_v13 = vadd.f32 %v1095_v51, %v5630_v47 }
 0x1e1   : > { %v1445_v63 = vpop.f32.mrf.mxu2  ;;  %v6173_v28 = vadd.f32 %v2388_v7, %v1772_v14  ;;  %v3899_v12 = vrot.slane %v3897_v42, 4  ;;  %v3392_v7 = vshll.u32 %v6171_v33, 16  ;;  %v3396_v14 = vshrl.u32 %v6171_v33, 16 }
 0x1e2   : > { %v1480_v41 = vadd.f32 %v1445_v63, %v1094_v37  ;;  %v3381_v37 = vsel %vm5193_vm4, %v3376_v54, %v3380_v9  ;;  %v3898_v40 = vsel %vm5368_vm7, %v4939_v30, %v3897_v42  ;;  %v4716_v63 = vrot.slane %v4700_v21, 9 }
 0x1e3   : > { %4906 = vmatmul.msk.bf16.gmra.mxu3 %vm736_vm3, %v3590_v15  ;;  %v2557_v15 = vrot.slane %v5079_v62, 5  ;;  %v3568_v51 = vunpack.c.l.b16 %v3381_v37  ;;  %v3901_v54 = vsel %vm5368_vm7, %v3899_v12, %v3900_v23  ;;  %v6195_v9 = vrot.slane %v3392_v7, 5 }
 0x1e4   : > { %v2391_v8 = vpop.f32.mrf.mxu0  ;;  %v3968_v30 = vunpack.c.l.b16 %v3898_v40  ;;  %v3969_v5 = vunpack.c.l.b16 %v3901_v54  ;;  %v3389_v21 = vor.u32 %v3388_v50, %v3385_v49  ;;  %v3402_v7 = vshll.u32 %v4880_v19, 16  ;;  %v6209_v54 = vld [vmem:[%s5174_s27 + $0x94] sm:$0xf] }
 0x1e6   : > { %v1738_v18 = vpop.f32.mrf.mxu3  ;;  %v2717_v60 = vpop.f32.mrf.mxu1  ;;  %v3404_v50 = vrot.slane %v3402_v7, 5 }
 0x1e7   : > { %v1773_v6 = vadd.f32 %v1738_v18, %v1480_v41  ;;  %4954 = vmatmul.msk.bf16.gmra.mxu0 %vm736_vm3, %v3991_v26  ;;  %v2559_v41 = vrot.slane %v2557_v15, 4  ;;  %v2560_v26 = vrot.slane %v5080_v57, 5  ;;  %v2797_v37 = vadd.f32 %v2717_v60, %v5647_v59  ;;  %v4881_v57 = vld [vmem:[%s5174_s27 + $0x90] sm:$0xf] }
 0x1e8   : > { %v3407_v59 = vshrl.u32 %v4881_v57, 16 }
 0x1e9   : > { %v1447_v17 = vpop.f32.mrf.mxu2  ;;  %4731 = vmatmul.msk.bf16.gmra.mxu1 %vm736_vm3, %v2645_v36  ;;  %v6191_v47 = vadd.f32 %v2391_v8, %v1773_v6  ;;  %v3398_v36 = vrot.slane %v3396_v14, 4  ;;  %v2558_v8 = vsel %vm5368_vm7, %v4716_v63, %v2557_v15  ;;  %v2561_v23 = vsel %vm5368_vm7, %v2559_v41, %v2560_v26  ;;  %v4924_v14 = vld [vmem:[%s5174_s27 + $0x84] sm:$0xe] }
 0x1ea   : > { %v1481_v24 = vadd.f32 %v1447_v17, %v1096_v13  ;;  %v3591_v6 = vpack.c.b16 %v3568_v51, %v3567_v25  ;;  %v3904_v13 = vrot.slane %v6171_v33, 5  ;;  %v2623_v40 = vunpack.c.l.b16 %v2558_v8  ;;  %v5081_v8 = vld [vmem:[%s5174_s27 + $0x88] sm:$0xf] }
 0x1eb   : > { %v3399_v12 = vor.u32 %v3398_v36, %v6195_v9  ;;  %v3992_v15 = vpack.c.b16 %v3969_v5, %v3968_v30  ;;  %v3390_v63 = vrot.slane %v3389_v21, 4  ;;  %v3907_v33 = vrot.slane %v4880_v19, 5  ;;  %v6221_v19 = vld [vmem:[%s6557_s2] ss:$0 sm:$0xff] }
 0x1ec   : > { %v2393_v42 = vpop.f32.mrf.mxu0  ;;  %v3906_v41 = vrot.slane %v3904_v13, 4  ;;  %v3410_v36 = vshll.u32 %v4881_v57, 16  ;;  %v3416_v30 = vshll.u32 %v6209_v54, 16  ;;  %v3420_v21 = vshrl.u32 %v6209_v54, 16 }
 0x1ed   : > { %v3400_v49 = vrot.slane %v3399_v12, 4 }
 0x1ee   : > { %v1740_v11 = vpop.f32.mrf.mxu3  ;;  %4843 = vmatmul.msk.bf16.gmra.mxu2 %vm736_vm3, %v5006_v45  ;;  %v2719_v18 = vpop.f32.mrf.mxu1  ;;  %v2624_v45 = vunpack.c.l.b16 %v2561_v23  ;;  %v2564_v23 = vrot.slane %v5081_v8, 5  ;;  %v6236_v57 = vrot.slane %v3416_v30, 5 }
 0x1ef   : > { %v1774_v62 = vadd.f32 %v1740_v11, %v1481_v24  ;;  %v4940_v24 = vrot.slane %v4924_v14, 9  ;;  %v3405_v12 = vsel %vm5193_vm4, %v3400_v49, %v3404_v50  ;;  %v3908_v14 = vsel %vm5368_vm7, %v3906_v41, %v3907_v33  ;;  %v6247_v33 = vld [vmem:[%s5174_s27 + $0x98] sm:$0x1] }
 0x1f0   : > { %v2646_v51 = vpack.c.b16 %v2624_v45, %v2623_v40  ;;  %v2798_v40 = vadd.f32 %v2719_v18, %v5660_v46  ;;  %v3422_v50 = vrot.slane %v3420_v21, 4  ;;  %v3570_v41 = vunpack.c.l.b16 %v3405_v12 }
 0x1f1   : > { %v3006_v17 = vpop.f32.mrf.mxu2  ;;  %v6212_v60 = vadd.f32 %v2393_v42, %v1774_v62  ;;  %v3395_v42 = vsel %vm5193_vm4, %v3390_v63, %v6195_v9  ;;  %v4701_v62 = vld [vmem:[%s5174_s27 + $0x84] sm:$0xe]  ;;  %v3905_v7 = vsel %vm5368_vm7, %v4940_v24, %v3904_v13  ;;  %v3412_v9 = vrot.slane %v3410_v36, 5 }
 0x1f2   : > { %v3086_v25 = vadd.f32 %v3006_v17, %v2797_v37  ;;  %v3409_v37 = vrot.slane %v3407_v59, 4  ;;  %v5007_v13 = vld [vmem:[%s5174_s27 + $0x84] sm:$0xff]  ;;  %v2566_v63 = vrot.slane %v2564_v23, 4  ;;  %v3569_v24 = vunpack.c.l.b16 %v3395_v42 }
 0x1f3   : > { %4907 = vmatmul.msk.bf16.gmra.mxu3 %vm736_vm3, %v3591_v6  ;;  %v3426_v12 = vshll.u32 %v6247_v33, 16 }
 0x1f4   : > { %v4060_v26 = vpop.f32.mrf.mxu0  ;;  %v3413_v21 = vor.u32 %v3412_v9, %v3409_v37 }
 0x1f6   : > { %v3663_v11 = vpop.f32.mrf.mxu3  ;;  %v2722_v5 = vpop.f32.mrf.mxu1 }
 0x1f7   : > { %v3743_v6 = vadd.f32 %v3663_v11, %v3086_v25  ;;  %4955 = vmatmul.msk.bf16.gmra.mxu0 %vm736_vm3, %v3992_v15  ;;  %v4717_v15 = vrot.slane %v4701_v62, 9  ;;  %v5082_v25 = vld [vmem:[%s5174_s27 + $0x8c] sm:$0x1]  ;;  %v3592_v62 = vpack.c.b16 %v3570_v41, %v3569_v24 }
 0x1f8   : > { %v2567_v49 = vrot.slane %v5082_v25, 5 }
 0x1f9   : > { %v4140_v17 = vadd.f32 %v4060_v26, %v3743_v6  ;;  %v3008_v45 = vpop.f32.mrf.mxu2  ;;  %4732 = vmatmul.msk.bf16.gmra.mxu1 %vm736_vm3, %v2646_v51  ;;  %v3970_v26 = vunpack.c.l.b16 %v3905_v7  ;;  %v3971_v51 = vunpack.c.l.b16 %v3908_v14  ;;  %v2565_v11 = vsel %vm5368_vm7, %v4717_v15, %v2564_v23  ;;  %v6260_v23 = vld [vmem:[%s5174_s27 + $0xa0] sm:$0xf] }
 0x1fa   : > { %v3087_v18 = vadd.f32 %v3008_v45, %v2798_v40  ;;  %v2568_v8 = vsel %vm5368_vm7, %v2566_v63, %v2567_v49  ;;  %v3423_v6 = vor.u32 %v3422_v50, %v6236_v57  ;;  %v2799_v14 = vadd.f32 %v2722_v5, %v5673_v29  ;;  %v4925_v50 = vld [vmem:[%s5174_s27 + $0x90] sm:$0xe] }
 0x1fb   : > { %v4176_v46 = vadd.f32 %v6221_v19, %v4140_v17  ;;  %v2625_v40 = vunpack.c.l.b16 %v2565_v11  ;;  %v2626_v45 = vunpack.c.l.b16 %v2568_v8  ;;  %v3993_v15 = vpack.c.b16 %v3971_v51, %v3970_v26  ;;  %v5083_v8 = vld [vmem:[%s5174_s27 + $0x94] sm:$0xf] }
 0x1fc   : > { %v4062_v59 = vpop.f32.mrf.mxu0  ;;  %v3414_v63 = vrot.slane %v3413_v21, 4  ;;  %v3424_v37 = vrot.slane %v3423_v6, 4  ;;  %v3428_v49 = vrot.slane %v3426_v12, 5  ;;  %v3911_v29 = vrot.slane %v6209_v54, 5  ;;  %v4702_v12 = vld [vmem:[%s5174_s27 + $0x90] sm:$0xe] }
 0x1fd   : > { %4208 = vst [vmem:[%s6241_s19] sm:$0xff] %v4176_v46  ;;  %v3444_v24 = vshrl.u32 %v6260_v23, 16  ;;  %v3914_v11 = vrot.slane %v6247_v33, 5  ;;  %v2571_v21 = vrot.slane %v5083_v8, 5 }
 0x1fe   : > { %v3665_v36 = vpop.f32.mrf.mxu3  ;;  %4844 = vmatmul.msk.bf16.gmra.mxu2 %vm736_vm3, %v5007_v13  ;;  %v2724_v30 = vpop.f32.mrf.mxu1  ;;  %v4884_v13 = vld [vmem:[%s5174_s27 + $0x9c] sm:$0xf]  ;;  %v3419_v6 = vsel %vm5193_vm4, %v3414_v63, %v6236_v57  ;;  %v6283_v57 = vld [vmem:[%s5174_s27 + $0xa4] sm:$0x1]  ;;  %v5008_v63 = vld [vmem:[%s5174_s27 + $0x90] sm:$0xff] }
 0x1ff   : > { %v3744_v42 = vadd.f32 %v3665_v36, %v3087_v18  ;;  %v3431_v5 = vshrl.u32 %v4884_v13, 16  ;;  %v3434_v46 = vshll.u32 %v4884_v13, 16  ;;  %v3440_v18 = vshll.u32 %v6260_v23, 16 }
 0x200   : > { %v4941_v36 = vrot.slane %v4925_v50, 9 }
 0x201   : > { %v4141_v7 = vadd.f32 %v4062_v59, %v3744_v42  ;;  %v3011_v17 = vpop.f32.mrf.mxu2  ;;  %v2647_v59 = vpack.c.b16 %v2626_v45, %v2625_v40  ;;  %v3429_v42 = vsel %vm5193_vm4, %v3424_v37, %v3428_v49  ;;  %v6278_v33 = vrot.slane %v3440_v18, 5  ;;  %v5084_v49 = vld [vmem:[%s5174_s27 + $0x98] sm:$0x1] }
 0x202   : > { %v3088_v25 = vadd.f32 %v3011_v17, %v2799_v14  ;;  %v3436_v14 = vrot.slane %v3434_v46, 5  ;;  %v3446_v17 = vrot.slane %v3444_v24, 4  ;;  %v2800_v45 = vadd.f32 %v2724_v30, %v5686_v35 }
 0x203   : > { %v4177_v9 = vadd.f32 %v6221_v19, %v4141_v7  ;;  %4908 = vmatmul.msk.bf16.gmra.mxu3 %vm736_vm3, %v3592_v62  ;;  %v3913_v62 = vrot.slane %v3911_v29, 4  ;;  %v3433_v7 = vrot.slane %v3431_v5, 4  ;;  %v3571_v37 = vunpack.c.l.b16 %v3419_v6 }
 0x204   : > { %v4065_v41 = vpop.f32.mrf.mxu0  ;;  %v3572_v46 = vunpack.c.l.b16 %v3429_v42  ;;  %v3912_v18 = vsel %vm5368_vm7, %v4941_v36, %v3911_v29  ;;  %v3447_v24 = vor.u32 %v3446_v17, %v6278_v33 }
 0x205   : > { %4209 = vst [vmem:[%s6241_s19 + $0x8] sm:$0xff] %v4177_v9  ;;  %v4718_v9 = vrot.slane %v4702_v12, 9  ;;  %v3915_v35 = vsel %vm5368_vm7, %v3913_v62, %v3914_v11  ;;  %v3437_v30 = vor.u32 %v3436_v14, %v3433_v7  ;;  %v3972_v6 = vunpack.c.l.b16 %v3912_v18 }
 0x206   : > { %v3668_v26 = vpop.f32.mrf.mxu3  ;;  %v2727_v51 = vpop.f32.mrf.mxu1  ;;  %v3593_v11 = vpack.c.b16 %v3572_v46, %v3571_v37  ;;  %v3973_v42 = vunpack.c.l.b16 %v3915_v35  ;;  %v3448_v12 = vrot.slane %v3447_v24, 4  ;;  %v3918_v14 = vrot.slane %v6260_v23, 5 }
 0x207   : > { %v3745_v54 = vadd.f32 %v3668_v26, %v3088_v25  ;;  %4956 = vmatmul.msk.bf16.gmra.mxu0 %vm736_vm3, %v3993_v15  ;;  %v2573_v25 = vrot.slane %v2571_v21, 4  ;;  %v2574_v15 = vrot.slane %v5084_v49, 5  ;;  %v3438_v62 = vrot.slane %v3437_v30, 4 }
 0x208   : > { %v3994_v49 = vpack.c.b16 %v3973_v42, %v3972_v6  ;;  %v3920_v46 = vrot.slane %v3918_v14, 4  ;;  %v3921_v18 = vrot.slane %v6283_v57, 5 }
 0x209   : > { %v4142_v40 = vadd.f32 %v4065_v41, %v3745_v54  ;;  %v3013_v13 = vpop.f32.mrf.mxu2  ;;  %4733 = vmatmul.msk.bf16.gmra.mxu1 %vm736_vm3, %v2647_v59  ;;  %v3450_v41 = vshll.u32 %v6283_v57, 16  ;;  %v2572_v54 = vsel %vm5368_vm7, %v4718_v9, %v2571_v21  ;;  %v2575_v29 = vsel %vm5368_vm7, %v2573_v25, %v2574_v15  ;;  %v4887_v9 = vld [vmem:[%s5174_s27 + $0xa8] sm:$0xf]  ;;  %v6312_v15 = vld [vmem:[%s5174_s27 + $0xac] sm:$0xf] }
 0x20a   : > { %v3089_v5 = vadd.f32 %v3013_v13, %v2800_v45  ;;  %v2627_v21 = vunpack.c.l.b16 %v2572_v54  ;;  %v2628_v13 = vunpack.c.l.b16 %v2575_v29  ;;  %v3443_v23 = vsel %vm5193_vm4, %v3438_v62, %v6278_v33  ;;  %v4703_v54 = vld [vmem:[%s5174_s27 + $0x9c] sm:$0xe] }
 0x20b   : > { %v4178_v50 = vadd.f32 %v6221_v19, %v4142_v40  ;;  %v3452_v7 = vrot.slane %v3450_v41, 5  ;;  %v2801_v40 = vadd.f32 %v2727_v51, %v5699_v3  ;;  %v3455_v35 = vshrl.u32 %v4887_v9, 16  ;;  %v5085_v41 = vld [vmem:[%s5174_s27 + $0xa0] sm:$0xf] }
 0x20c   : > { %v4067_v59 = vpop.f32.mrf.mxu0  ;;  %v3458_v33 = vshll.u32 %v4887_v9, 16  ;;  %v3464_v29 = vshll.u32 %v6312_v15, 16 }
 0x20d   : > { %4210 = vst [vmem:[%s6241_s19 + $0x10] sm:$0xff] %v4178_v50  ;;  %v3453_v3 = vsel %vm5193_vm4, %v3448_v12, %v3452_v7  ;;  %v3922_v7 = vsel %vm5368_vm7, %v3920_v46, %v3921_v18 }
 0x20e   : > { %v3670_v26 = vpop.f32.mrf.mxu3  ;;  %4845 = vmatmul.msk.bf16.gmra.mxu2 %vm736_vm3, %v5008_v63  ;;  %v2729_v8 = vpop.f32.mrf.mxu1  ;;  %v4926_v63 = vld [vmem:[%s5174_s27 + $0x9c] sm:$0xe]  ;;  %v3574_v6 = vunpack.c.l.b16 %v3453_v3  ;;  %v3460_v9 = vrot.slane %v3458_v33, 5 }
 0x20f   : > { %v3746_v36 = vadd.f32 %v3670_v26, %v3089_v5  ;;  %v4942_v51 = vrot.slane %v4926_v63, 9  ;;  %v2648_v5 = vpack.c.b16 %v2628_v13, %v2627_v21  ;;  %v2802_v62 = vadd.f32 %v2729_v8, %v5712_v10  ;;  %v5086_v13 = vld [vmem:[%s5174_s27 + $0xa4] sm:$0x1]  ;;  %v6333_v8 = vld [vmem:[%s5174_s27 + $0xb0] sm:$0x1] }
 0x210   : > { %v2581_v63 = vrot.slane %v5086_v13, 5  ;;  %v3474_v33 = vshll.u32 %v6333_v8, 16 }
 0x211   : > { %v4143_v17 = vadd.f32 %v4067_v59, %v3746_v36  ;;  %v3016_v45 = vpop.f32.mrf.mxu2  ;;  %v2578_v59 = vrot.slane %v5085_v41, 5  ;;  %v3468_v36 = vshrl.u32 %v6312_v15, 16  ;;  %v3919_v57 = vsel %vm5368_vm7, %v4942_v51, %v3918_v14 }
 0x212   : > { %v3090_v37 = vadd.f32 %v3016_v45, %v2801_v40  ;;  %v5009_v40 = vld [vmem:[%s5174_s27 + $0x9c] sm:$0xff]  ;;  %v4719_v45 = vrot.slane %v4703_v54, 9  ;;  %v3975_v51 = vunpack.c.l.b16 %v3922_v7 }
 0x213   : > { %v4179_v25 = vadd.f32 %v6221_v19, %v4143_v17  ;;  %4909 = vmatmul.msk.bf16.gmra.mxu3 %vm736_vm3, %v3593_v11  ;;  %v3573_v11 = vunpack.c.l.b16 %v3443_v23  ;;  %v3457_v17 = vrot.slane %v3455_v35, 4  ;;  %v2580_v21 = vrot.slane %v2578_v59, 4 }
 0x214   : > { %v4070_v50 = vpop.f32.mrf.mxu0  ;;  %v3470_v10 = vrot.slane %v3468_v36, 4  ;;  %v3974_v23 = vunpack.c.l.b16 %v3919_v57 }
 0x215   : > { %4211 = vst [vmem:[%s6241_s19 + $0x18] sm:$0xff] %v4179_v25  ;;  %v2582_v46 = vsel %vm5368_vm7, %v2580_v21, %v2581_v63  ;;  %v3461_v18 = vor.u32 %v3460_v9, %v3457_v17  ;;  %v3476_v17 = vrot.slane %v3474_v33, 5  ;;  %v3925_v9 = vrot.slane %v6312_v15, 5 }
 0x216   : > { %v3673_v30 = vpop.f32.mrf.mxu3  ;;  %v2732_v24 = vpop.f32.mrf.mxu1  ;;  %v2630_v57 = vunpack.c.l.b16 %v2582_v46  ;;  %v4704_v46 = vld [vmem:[%s5174_s27 + $0xa8] sm:$0xe] }
 0x217   : > { %v3747_v26 = vadd.f32 %v3673_v30, %v3090_v37  ;;  %4957 = vmatmul.msk.bf16.gmra.mxu0 %vm736_vm3, %v3994_v49  ;;  %v6330_v37 = vrot.slane %v3464_v29, 5  ;;  %v3594_v30 = vpack.c.b16 %v3574_v6, %v3573_v11  ;;  %v2803_v54 = vadd.f32 %v2732_v24, %v5724_v44 }
 0x219   : > { %v4144_v42 = vadd.f32 %v4070_v50, %v3747_v26  ;;  %v3018_v12 = vpop.f32.mrf.mxu2  ;;  %4734 = vmatmul.msk.bf16.gmra.mxu1 %vm736_vm3, %v2648_v5  ;;  %v2579_v5 = vsel %vm5368_vm7, %v4719_v45, %v2578_v59  ;;  %v3471_v41 = vor.u32 %v3470_v10, %v6330_v37  ;;  %v6346_v59 = vld [vmem:[%s5174_s27 + $0xb8] sm:$0xf]  ;;  %v5087_v10 = vld [vmem:[%s5174_s27 + $0xac] sm:$0xf] }
 0x21a   : > { %v3091_v25 = vadd.f32 %v3018_v12, %v2802_v62  ;;  %v2629_v36 = vunpack.c.l.b16 %v2579_v5  ;;  %v3995_v62 = vpack.c.b16 %v3975_v51, %v3974_v23  ;;  %v3462_v12 = vrot.slane %v3461_v18, 4 }
 0x21b   : > { %v4180_v14 = vadd.f32 %v6221_v19, %v4144_v42  ;;  %v4890_v42 = vld [vmem:[%s5174_s27 + $0xb4] sm:$0xf]  ;;  %v3472_v6 = vrot.slane %v3471_v41, 4  ;;  %v3488_v24 = vshll.u32 %v6346_v59, 16  ;;  %v3492_v21 = vshrl.u32 %v6346_v59, 16 }
 0x21c   : > { %v4072_v49 = vpop.f32.mrf.mxu0  ;;  %v3479_v45 = vshrl.u32 %v4890_v42, 16  ;;  %v3482_v44 = vshll.u32 %v4890_v42, 16  ;;  %v2649_v63 = vpack.c.b16 %v2630_v57, %v2629_v36  ;;  %v5010_v36 = vld [vmem:[%s5174_s27 + $0xa8] sm:$0xff]  ;;  %v4720_v57 = vrot.slane %v4704_v46, 9 }
 0x21d   : > { %4212 = vst [vmem:[%s6241_s19 + $0x20] sm:$0xff] %v4180_v14  ;;  %v3477_v51 = vsel %vm5193_vm4, %v3472_v6, %v3476_v17 }
 0x21e   : > { %v3675_v3 = vpop.f32.mrf.mxu3  ;;  %4846 = vmatmul.msk.bf16.gmra.mxu2 %vm736_vm3, %v5009_v40  ;;  %v2734_v50 = vpop.f32.mrf.mxu1  ;;  %v4927_v40 = vld [vmem:[%s5174_s27 + $0xa8] sm:$0xe]  ;;  %v3481_v15 = vrot.slane %v3479_v45, 4  ;;  %v3484_v18 = vrot.slane %v3482_v44, 5  ;;  %v3576_v17 = vunpack.c.l.b16 %v3477_v51 }
 0x21f   : > { %v3748_v35 = vadd.f32 %v3675_v3, %v3091_v25  ;;  %v3467_v3 = vsel %vm5193_vm4, %v3462_v12, %v6330_v37  ;;  %v4943_v5 = vrot.slane %v4927_v40, 9  ;;  %v2804_v33 = vadd.f32 %v2734_v50, %v5737_v55 }
 0x220   : > { %v3927_v37 = vrot.slane %v3925_v9, 4  ;;  %v3575_v6 = vunpack.c.l.b16 %v3467_v3  ;;  %v3485_v50 = vor.u32 %v3484_v18, %v3481_v15 }
 0x221   : > { %v4145_v26 = vadd.f32 %v4072_v49, %v3748_v35  ;;  %v3021_v29 = vpop.f32.mrf.mxu2  ;;  %v2585_v49 = vrot.slane %v5087_v10, 5  ;;  %v6363_v35 = vrot.slane %v3488_v24, 5  ;;  %v3926_v55 = vsel %vm5368_vm7, %v4943_v5, %v3925_v9 }
 0x222   : > { %v3092_v11 = vadd.f32 %v3021_v29, %v2803_v54  ;;  %v3928_v54 = vrot.slane %v6333_v8, 5  ;;  %v6369_v29 = vld [vmem:[%s5174_s27 + $0xbc] sm:$0x1]  ;;  %v3976_v10 = vunpack.c.l.b16 %v3926_v55  ;;  %v3486_v3 = vrot.slane %v3485_v50, 4  ;;  %v4705_v50 = vld [vmem:[%s5174_s27 + $0xb4] sm:$0xe] }
 0x223   : > { %v4181_v7 = vadd.f32 %v6221_v19, %v4145_v26  ;;  %4910 = vmatmul.msk.bf16.gmra.mxu3 %vm736_vm3, %v3594_v30  ;;  %v3494_v30 = vrot.slane %v3492_v21, 4  ;;  %v2587_v42 = vrot.slane %v2585_v49, 4  ;;  %v3498_v8 = vshll.u32 %v6369_v29, 16 }
 0x224   : > { %v4075_v13 = vpop.f32.mrf.mxu0  ;;  %v3929_v44 = vsel %vm5368_vm7, %v3927_v37, %v3928_v54  ;;  %v3932_v54 = vrot.slane %v6346_v59, 5 }
 0x225   : > { %4213 = vst [vmem:[%s6241_s19 + $0x28] sm:$0xff] %v4181_v7  ;;  %v3495_v40 = vor.u32 %v3494_v30, %v6363_v35  ;;  %v3500_v5 = vrot.slane %v3498_v8, 5 }
 0x226   : > { %v3678_v14 = vpop.f32.mrf.mxu3  ;;  %v2737_v25 = vpop.f32.mrf.mxu1 }
 0x227   : > { %v3749_v23 = vadd.f32 %v3678_v14, %v3092_v11  ;;  %4958 = vmatmul.msk.bf16.gmra.mxu0 %vm736_vm3, %v3995_v62  ;;  %v5088_v62 = vld [vmem:[%s5174_s27 + $0xb0] sm:$0x1]  ;;  %v3595_v14 = vpack.c.b16 %v3576_v17, %v3575_v6  ;;  %v3496_v51 = vrot.slane %v3495_v40, 4  ;;  %v2805_v15 = vadd.f32 %v2737_v25, %v5751_v4  ;;  %v5089_v6 = vld [vmem:[%s5174_s27 + $0xb8] sm:$0xf] }
 0x228   : > { %v2588_v12 = vrot.slane %v5088_v62, 5  ;;  %v3491_v25 = vsel %vm5193_vm4, %v3486_v3, %v6363_v35  ;;  %v4928_v62 = vld [vmem:[%s5174_s27 + $0xb4] sm:$0xe]  ;;  %v2592_v17 = vrot.slane %v5089_v6, 5  ;;  %v4721_v3 = vrot.slane %v4705_v50, 9 }
 0x229   : > { %v4146_v41 = vadd.f32 %v4075_v13, %v3749_v23  ;;  %v3023_v26 = vpop.f32.mrf.mxu2  ;;  %4735 = vmatmul.msk.bf16.gmra.mxu1 %vm736_vm3, %v2649_v63  ;;  %v2586_v13 = vsel %vm5368_vm7, %v4720_v57, %v2585_v49  ;;  %v3977_v23 = vunpack.c.l.b16 %v3929_v44  ;;  %v4893_v49 = vld [vmem:[%s5174_s27 + $0xc0] sm:$0xf]  ;;  %v3577_v35 = vunpack.c.l.b16 %v3491_v25 }
 0x22a   : > { %v3093_v11 = vadd.f32 %v3023_v26, %v2804_v33  ;;  %v2589_v63 = vsel %vm5368_vm7, %v2587_v42, %v2588_v12  ;;  %v2631_v30 = vunpack.c.l.b16 %v2586_v13  ;;  %v3501_v42 = vsel %vm5193_vm4, %v3496_v51, %v3500_v5  ;;  %v5090_v5 = vld [vmem:[%s5174_s27 + $0xbc] sm:$0x1] }
 0x22b   : > { %v4182_v7 = vadd.f32 %v6221_v19, %v4146_v41  ;;  %v2632_v41 = vunpack.c.l.b16 %v2589_v63  ;;  %v3996_v37 = vpack.c.b16 %v3977_v23, %v3976_v10  ;;  %v3503_v12 = vshrl.u32 %v4893_v49, 16  ;;  %v5011_v23 = vld [vmem:[%s5174_s27 + $0xb4] sm:$0xff] }
 0x22c   : > { %v4077_v45 = vpop.f32.mrf.mxu0  ;;  %v3506_v55 = vshll.u32 %v4893_v49, 16  ;;  %v4944_v44 = vrot.slane %v4928_v62, 9  ;;  %v2594_v51 = vrot.slane %v2592_v17, 4 }
 0x22d   : > { %4214 = vst [vmem:[%s6241_s19 + $0x30] sm:$0xff] %v4182_v7  ;;  %v2650_v4 = vpack.c.b16 %v2632_v41, %v2631_v30  ;;  %v3505_v10 = vrot.slane %v3503_v12, 4 }
 0x22e   : > { %v3680_v24 = vpop.f32.mrf.mxu3  ;;  %4847 = vmatmul.msk.bf16.gmra.mxu2 %vm736_vm3, %v5010_v36  ;;  %v2739_v21 = vpop.f32.mrf.mxu1  ;;  %v6392_v36 = vld [vmem:[%s5174_s27 + $0xc4] sm:$0xf] }
 0x22f   : > { %v3750_v9 = vadd.f32 %v3680_v24, %v3093_v11  ;;  %v3512_v40 = vshll.u32 %v6392_v36, 16  ;;  %v3516_v8 = vshrl.u32 %v6392_v36, 16  ;;  %v3934_v24 = vrot.slane %v3932_v54, 4 }
 0x230   : > { %v2806_v63 = vadd.f32 %v2739_v21, %v5764_v0  ;;  %v3933_v21 = vsel %vm5368_vm7, %v4944_v44, %v3932_v54 }
 0x231   : > { %v4147_v46 = vadd.f32 %v4077_v45, %v3750_v9  ;;  %v3026_v18 = vpop.f32.mrf.mxu2  ;;  %v3578_v45 = vunpack.c.l.b16 %v3501_v42  ;;  %v3514_v41 = vrot.slane %v3512_v40, 5  ;;  %v3518_v49 = vrot.slane %v3516_v8, 4 }
 0x232   : > { %v3094_v26 = vadd.f32 %v3026_v18, %v2805_v15  ;;  %v3508_v15 = vrot.slane %v3506_v55, 5 }
 0x233   : > { %v4183_v33 = vadd.f32 %v6221_v19, %v4147_v46  ;;  %4911 = vmatmul.msk.bf16.gmra.mxu3 %vm736_vm3, %v3595_v14  ;;  %v3935_v14 = vrot.slane %v6369_v29, 5  ;;  %v2595_v46 = vrot.slane %v5090_v5, 5  ;;  %v3596_v62 = vpack.c.b16 %v3578_v45, %v3577_v35 }
 0x234   : > { %v4080_v57 = vpop.f32.mrf.mxu0  ;;  %v3509_v25 = vor.u32 %v3508_v15, %v3505_v10  ;;  %v3519_v12 = vor.u32 %v3518_v49, %v3514_v41  ;;  %v6434_v10 = vld [vmem:[%s5174_s27 + $0xd0] sm:$0xf]  ;;  %v4706_v49 = vld [vmem:[%s5174_s27 + $0xc0] sm:$0xe] }
 0x235   : > { %4215 = vst [vmem:[%s6241_s19 + $0x38] sm:$0xff] %v4183_v33  ;;  %v6413_v33 = vld [vmem:[%s5174_s27 + $0xc8] sm:$0x1]  ;;  %v3936_v29 = vsel %vm5368_vm7, %v3934_v24, %v3935_v14  ;;  %v4896_v14 = vld [vmem:[%s5174_s27 + $0xcc] sm:$0xf] }
 0x236   : > { %v3683_v7 = vpop.f32.mrf.mxu3  ;;  %v2742_v11 = vpop.f32.mrf.mxu1  ;;  %v3522_v54 = vshll.u32 %v6413_v33, 16  ;;  %v3979_v6 = vunpack.c.l.b16 %v3936_v29  ;;  %v3510_v8 = vrot.slane %v3509_v25, 4  ;;  %v3520_v45 = vrot.slane %v3519_v12, 4 }
 0x237   : > { %v3751_v59 = vadd.f32 %v3683_v7, %v3094_v26  ;;  %4959 = vmatmul.msk.bf16.gmra.mxu0 %vm736_vm3, %v3996_v37  ;;  %v3978_v7 = vunpack.c.l.b16 %v3933_v21  ;;  %v3536_v21 = vshll.u32 %v6434_v10, 16  ;;  %v3540_v29 = vshrl.u32 %v6434_v10, 16 }
 0x238   : > { %v3524_v24 = vrot.slane %v3522_v54, 5  ;;  %v3515_v15 = vsel %vm5193_vm4, %v3510_v8, %v3514_v41  ;;  %v4722_v54 = vrot.slane %v4706_v49, 9 }
 0x239   : > { %v4148_v13 = vadd.f32 %v4080_v57, %v3751_v59  ;;  %v3028_v9 = vpop.f32.mrf.mxu2  ;;  %4736 = vmatmul.msk.bf16.gmra.mxu1 %vm736_vm3, %v2650_v4  ;;  %v2593_v57 = vsel %vm5368_vm7, %v4721_v3, %v2592_v17  ;;  %v2596_v4 = vsel %vm5368_vm7, %v2594_v51, %v2595_v46  ;;  %v2807_v59 = vadd.f32 %v2742_v11, %v5780_v53  ;;  %v5091_v51 = vld [vmem:[%s5174_s27 + $0xc4] sm:$0xf] }
 0x23a   : > { %v3095_v30 = vadd.f32 %v3028_v9, %v2806_v63  ;;  %v2633_v17 = vunpack.c.l.b16 %v2593_v57  ;;  %v2634_v40 = vunpack.c.l.b16 %v2596_v4  ;;  %v4929_v63 = vld [vmem:[%s5174_s27 + $0xc0] sm:$0xe]  ;;  %v3939_v11 = vrot.slane %v6392_v36, 5 }
 0x23b   : > { %v4184_v18 = vadd.f32 %v6221_v19, %v4148_v13  ;;  %v3997_v13 = vpack.c.b16 %v3979_v6, %v3978_v7  ;;  %v2599_v5 = vrot.slane %v5091_v51, 5  ;;  %v3527_v36 = vshrl.u32 %v4896_v14, 16  ;;  %v6566_v57 = vld [vmem:[#allocation2_spill] sm:$0xff]  ;;  %v5092_v6 = vld [vmem:[%s5174_s27 + $0xc8] sm:$0x1] }
 0x23c   : > { %v4082_v0 = vpop.f32.mrf.mxu0  ;;  %v2651_v53 = vpack.c.b16 %v2634_v40, %v2633_v17  ;;  %v3941_v41 = vrot.slane %v3939_v11, 4  ;;  %v3579_v12 = vunpack.c.l.b16 %v3515_v15 }
 0x23d   : > { %4216 = vst [vmem:[%s6241_s19 + $0x40] sm:$0xff] %v4184_v18  ;;  %v3525_v18 = vsel %vm5193_vm4, %v3520_v45, %v3524_v24  ;;  %v2601_v7 = vrot.slane %v2599_v5, 4  ;;  %v3529_v40 = vrot.slane %v3527_v36, 4  ;;  %v4898_v24 = vld [vmem:[%s5174_s27 + $0xd4] sm:$0x1] }
 0x23e   : > { %v3685_v26 = vpop.f32.mrf.mxu3  ;;  %4848 = vmatmul.msk.bf16.gmra.mxu2 %vm736_vm3, %v5011_v23  ;;  %v2744_v37 = vpop.f32.mrf.mxu1  ;;  %v3580_v17 = vunpack.c.l.b16 %v3525_v18  ;;  %v3546_v18 = vshll.u32 %v4898_v24, 16 }
 0x23f   : > { %v3752_v42 = vadd.f32 %v3685_v26, %v3095_v30  ;;  %v4945_v30 = vrot.slane %v4929_v63, 9  ;;  %v2808_v4 = vadd.f32 %v2744_v37, %v6566_v57 }
 0x241   : > { %v4149_v55 = vadd.f32 %v4082_v0, %v3752_v42  ;;  %v3031_v50 = vpop.f32.mrf.mxu2  ;;  %v3530_v0 = vshll.u32 %v4896_v14, 16  ;;  %v3942_v42 = vrot.slane %v6413_v33, 5  ;;  %v3940_v37 = vsel %vm5368_vm7, %v4945_v30, %v3939_v11 }
 0x242   : > { %v3096_v35 = vadd.f32 %v3031_v50, %v2807_v59  ;;  %v3597_v14 = vpack.c.b16 %v3580_v17, %v3579_v12  ;;  %v3946_v12 = vrot.slane %v6434_v10, 5 }
 0x243   : > { %v4185_v44 = vadd.f32 %v6221_v19, %v4149_v55  ;;  %4912 = vmatmul.msk.bf16.gmra.mxu3 %vm736_vm3, %v3596_v62  ;;  %v5012_v62 = vld [vmem:[%s5174_s27 + $0xc0] sm:$0xff]  ;;  %v2602_v55 = vrot.slane %v5092_v6, 5  ;;  %v3532_v8 = vrot.slane %v3530_v0, 5  ;;  %v3943_v45 = vsel %vm5368_vm7, %v3941_v41, %v3942_v42 }
 0x244   : > { %v4085_v9 = vpop.f32.mrf.mxu0  ;;  %v3981_v51 = vunpack.c.l.b16 %v3943_v45  ;;  %v3948_v10 = vrot.slane %v3946_v12, 4 }
 0x245   : > { %4217 = vst [vmem:[%s6241_s19 + $0x48] sm:$0xff] %v4185_v44  ;;  %v3538_v44 = vrot.slane %v3536_v21, 5 }
 0x246   : > { %v3688_v23 = vpop.f32.mrf.mxu3  ;;  %v2747_v3 = vpop.f32.mrf.mxu1 }
 0x247   : > { %v3753_v46 = vadd.f32 %v3688_v23, %v3096_v35  ;;  %4960 = vmatmul.msk.bf16.gmra.mxu0 %vm736_vm3, %v3997_v13  ;;  %v3542_v35 = vrot.slane %v3540_v29, 4  ;;  %v3980_v23 = vunpack.c.l.b16 %v3940_v37  ;;  %v2809_v49 = vadd.f32 %v2747_v3, %v5816_v1 }
 0x248   : > { %v3949_v37 = vrot.slane %v4898_v24, 5 }
 0x249   : > { %v4150_v26 = vadd.f32 %v4085_v9, %v3753_v46  ;;  %v3033_v25 = vpop.f32.mrf.mxu2  ;;  %4737 = vmatmul.msk.bf16.gmra.mxu1 %vm736_vm3, %v2651_v53  ;;  %v2600_v9 = vsel %vm5368_vm7, %v4722_v54, %v2599_v5  ;;  %v2603_v53 = vsel %vm5368_vm7, %v2601_v7, %v2602_v55  ;;  %v3533_v46 = vor.u32 %v3532_v8, %v3529_v40  ;;  %v5013_v40 = vld [vmem:[%s5174_s27 + $0xcc] sm:$0xff] }
 0x24a   : > { %v3097_v50 = vadd.f32 %v3033_v25, %v2808_v4  ;;  %v3543_v15 = vor.u32 %v3542_v35, %v3538_v44  ;;  %v2635_v0 = vunpack.c.l.b16 %v2600_v9  ;;  %v2636_v21 = vunpack.c.l.b16 %v2603_v53 }
 0x24b   : > { %v4186_v59 = vadd.f32 %v6221_v19, %v4150_v26  ;;  %v3998_v26 = vpack.c.b16 %v3981_v51, %v3980_v23  ;;  %v3534_v57 = vrot.slane %v3533_v46, 4  ;;  %v3548_v25 = vrot.slane %v3546_v18, 5 }
 0x24c   : > { %v4087_v33 = vpop.f32.mrf.mxu0  ;;  %v3544_v4 = vrot.slane %v3543_v15, 4  ;;  %v2652_v42 = vpack.c.b16 %v2636_v21, %v2635_v0  ;;  %v6567_v21 = vld [vmem:[#allocation3_spill] sm:$0xff] }
 0x24d   : > { %4218 = vst [vmem:[%s6241_s19 + $0x50] sm:$0xff] %v4186_v59  ;;  %v3539_v7 = vsel %vm5193_vm4, %v3534_v57, %v3538_v44 }
 0x24e   : > { %v3690_v13 = vpop.f32.mrf.mxu3  ;;  %4849 = vmatmul.msk.bf16.gmra.mxu2 %vm736_vm3, %v5012_v62  ;;  %v2749_v63 = vpop.f32.mrf.mxu1  ;;  %v4930_v62 = vld [vmem:[%s5174_s27 + $0xcc] sm:$0xe]  ;;  %v3549_v6 = vsel %vm5193_vm4, %v3544_v4, %v3548_v25 }
 0x24f   : > { %v3754_v11 = vadd.f32 %v3690_v13, %v3097_v50  ;;  %v4946_v55 = vrot.slane %v4930_v62, 9  ;;  %v2810_v50 = vadd.f32 %v2749_v63, %v5836_v27  ;;  %v3582_v45 = vunpack.c.l.b16 %v3549_v6 }
 0x250   : > { %v3950_v27 = vsel %vm5368_vm7, %v3948_v10, %v3949_v37 }
 0x251   : > { %v4151_v30 = vadd.f32 %v4087_v33, %v3754_v11  ;;  %v3036_v36 = vpop.f32.mrf.mxu2  ;;  %v3581_v33 = vunpack.c.l.b16 %v3539_v7  ;;  %v3947_v38 = vsel %vm5368_vm7, %v4946_v55, %v3946_v12  ;;  %v3983_v11 = vunpack.c.l.b16 %v3950_v27 }
 0x252   : > { %v3098_v29 = vadd.f32 %v3036_v36, %v2809_v49  ;;  %v3982_v53 = vunpack.c.l.b16 %v3947_v38 }
 0x253   : > { %v4187_v5 = vadd.f32 %v6221_v19, %v4151_v30  ;;  %4913 = vmatmul.msk.bf16.gmra.mxu3 %vm736_vm3, %v3597_v14  ;;  %v3598_v9 = vpack.c.b16 %v3582_v45, %v3581_v33 }
 0x254   : > { %v4090_v41 = vpop.f32.mrf.mxu0  ;;  %v3999_v15 = vpack.c.b16 %v3983_v11, %v3982_v53 }
 0x255   : > { %4219 = vst [vmem:[%s6241_s19 + $0x58] sm:$0xff] %v4187_v5 }
 0x256   : > { %v3693_v1 = vpop.f32.mrf.mxu3  ;;  %v2752_v3 = vpop.f32.mrf.mxu1 }
 0x257   : > { %v3755_v54 = vadd.f32 %v3693_v1, %v3098_v29  ;;  %4961 = vmatmul.msk.bf16.gmra.mxu0 %vm736_vm3, %v3998_v26  ;;  %v2811_v23 = vadd.f32 %v2752_v3, %v5855_v43 }
 0x259   : > { %v4152_v59 = vadd.f32 %v4090_v41, %v3755_v54  ;;  %v3038_v17 = vpop.f32.mrf.mxu2  ;;  %4738 = vmatmul.msk.bf16.gmra.mxu1 %vm736_vm3, %v2652_v42 }
 0x25a   : > { %v3099_v35 = vadd.f32 %v3038_v17, %v2810_v50 }
 0x25b   : > { %v4188_v8 = vadd.f32 %v6221_v19, %v4152_v59 }
 0x25c   : > { %v4092_v44 = vpop.f32.mrf.mxu0 }
 0x25d   : > { %4220 = vst [vmem:[%s6241_s19 + $0x60] sm:$0xff] %v4188_v8 }
 0x25e   : > { %v3695_v13 = vpop.f32.mrf.mxu3  ;;  %4850 = vmatmul.msk.bf16.gmra.mxu2 %vm736_vm3, %v5013_v40  ;;  %v2754_v63 = vpop.f32.mrf.mxu1 }
 0x25f   : > { %v3756_v24 = vadd.f32 %v3695_v13, %v3099_v35  ;;  %v2812_v5 = vadd.f32 %v2754_v63, %v6567_v21 }
 0x261   : > { %v4153_v14 = vadd.f32 %v4092_v44, %v3756_v24  ;;  %v3041_v51 = vpop.f32.mrf.mxu2 }
 0x262   : > { %v3100_v22 = vadd.f32 %v3041_v51, %v2811_v23 }
 0x263   : > { %v4189_v46 = vadd.f32 %v6221_v19, %v4153_v14  ;;  %4914 = vmatmul.msk.bf16.gmra.mxu3 %vm736_vm3, %v3598_v9 }
 0x264   : > { %v4095_v18 = vpop.f32.mrf.mxu0 }
 0x265   : > { %4221 = vst [vmem:[%s6241_s19 + $0x68] sm:$0xff] %v4189_v46 }
 0x266   : > { %v3698_v30 = vpop.f32.mrf.mxu3  ;;  %v2757_v49 = vpop.f32.mrf.mxu1 }
 0x267   : > { %v3757_v36 = vadd.f32 %v3698_v30, %v3100_v22  ;;  %4962 = vmatmul.msk.bf16.gmra.mxu0 %vm736_vm3, %v3999_v15  ;;  %v2813_v62 = vadd.f32 %v2757_v49, %v5898_v16 }
 0x269   : > { %v4154_v0 = vadd.f32 %v4095_v18, %v3757_v36  ;;  %v3043_v43 = vpop.f32.mrf.mxu2 }
 0x26a   : > { %v3101_v26 = vadd.f32 %v3043_v43, %v2812_v5 }
 0x26b   : > { %v4190_v29 = vadd.f32 %v6221_v19, %v4154_v0 }
 0x26c   : > { %v4097_v57 = vpop.f32.mrf.mxu0 }
 0x26d   : > { %4222 = vst [vmem:[%s6241_s19 + $0x70] sm:$0xff] %v4190_v29 }
 0x26e   : > { %v3700_v4 = vpop.f32.mrf.mxu3  ;;  %v2759_v25 = vpop.f32.mrf.mxu1 }
 0x26f   : > { %v3758_v41 = vadd.f32 %v3700_v4, %v3101_v26  ;;  %v2814_v50 = vadd.f32 %v2759_v25, %v5922_v39 }
 0x271   : > { %v4155_v42 = vadd.f32 %v4097_v57, %v3758_v41  ;;  %v3046_v12 = vpop.f32.mrf.mxu2 }
 0x272   : > { %v3102_v3 = vadd.f32 %v3046_v12, %v2813_v62 }
 0x273   : > { %v4191_v1 = vadd.f32 %v6221_v19, %v4155_v42 }
 0x274   : > { %v4100_v54 = vpop.f32.mrf.mxu0 }
 0x275   : > { %4223 = vst [vmem:[%s6241_s19 + $0x78] sm:$0xff] %v4191_v1 }
 0x276   : > { %v3703_v7 = vpop.f32.mrf.mxu3  ;;  %v2762_v6 = vpop.f32.mrf.mxu1 }
 0x277   : > { %v3759_v55 = vadd.f32 %v3703_v7, %v3102_v3  ;;  %v2815_v45 = vadd.f32 %v2762_v6, %v5941_v34 }
 0x279   : > { %v4156_v59 = vadd.f32 %v4100_v54, %v3759_v55  ;;  %v3048_v17 = vpop.f32.mrf.mxu2 }
 0x27a   : > { %v3103_v37 = vadd.f32 %v3048_v17, %v2814_v50  ;;  %v6568_v50 = vld [vmem:[#allocation4_spill] sm:$0xff] }
 0x27b   : > { %v4192_v10 = vadd.f32 %v6221_v19, %v4156_v59 }
 0x27c   : > { %v4102_v40 = vpop.f32.mrf.mxu0 }
 0x27d   : > { %4224 = vst [vmem:[%s6241_s19 + $0x80] sm:$0xff] %v4192_v10 }
 0x27e   : > { %v3705_v16 = vpop.f32.mrf.mxu3  ;;  %v2764_v8 = vpop.f32.mrf.mxu1 }
 0x27f   : > { %v3760_v35 = vadd.f32 %v3705_v16, %v3103_v37  ;;  %v2816_v53 = vadd.f32 %v2764_v8, %v5965_v52  ;;  %v6516_v37 = vld [vmem:[%s6557_s2] ss:$0 sm:$0xff] }
 0x281   : > { %v4157_v33 = vadd.f32 %v4102_v40, %v3760_v35  ;;  %v3051_v44 = vpop.f32.mrf.mxu2 }
 0x282   : > { %v3104_v27 = vadd.f32 %v3051_v44, %v2815_v45 }
 0x283   : > { %v4193_v38 = vadd.f32 %v6221_v19, %v4157_v33 }
 0x284   : > { %v4105_v13 = vpop.f32.mrf.mxu0 }
 0x285   : > { %4225 = vst [vmem:[%s6241_s19 + $0x88] sm:$0xff] %v4193_v38 }
 0x286   : > { %v3708_v39 = vpop.f32.mrf.mxu3  ;;  %v2767_v63 = vpop.f32.mrf.mxu1 }
 0x287   : > { %v3761_v24 = vadd.f32 %v3708_v39, %v3104_v27  ;;  %v2817_v18 = vadd.f32 %v2767_v63, %v5984_v2 }
 0x289   : > { %v4158_v9 = vadd.f32 %v4105_v13, %v3761_v24  ;;  %v3053_v11 = vpop.f32.mrf.mxu2 }
 0x28a   : > { %v3105_v23 = vadd.f32 %v3053_v11, %v2816_v53 }
 0x28b   : > { %v4194_v14 = vadd.f32 %v6221_v19, %v4158_v9 }
 0x28c   : > { %v4107_v51 = vpop.f32.mrf.mxu0 }
 0x28d   : > { %4226 = vst [vmem:[%s6241_s19 + $0x90] sm:$0xff] %v4194_v14 }
 0x28e   : > { %v3710_v34 = vpop.f32.mrf.mxu3  ;;  %v2769_v46 = vpop.f32.mrf.mxu1 }
 0x28f   : > { %v3762_v22 = vadd.f32 %v3710_v34, %v3105_v23  ;;  %v2818_v29 = vadd.f32 %v2769_v46, %v6008_v56 }
 0x291   : > { %v4159_v15 = vadd.f32 %v4107_v51, %v3762_v22  ;;  %v3056_v30 = vpop.f32.mrf.mxu2 }
 0x292   : > { %v3106_v36 = vadd.f32 %v3056_v30, %v2817_v18 }
 0x293   : > { %v4195_v49 = vadd.f32 %v6221_v19, %v4159_v15 }
 0x294   : > { %v4110_v0 = vpop.f32.mrf.mxu0 }
 0x295   : > { %4227 = vst [vmem:[%s6241_s19 + $0x98] sm:$0xff] %v4195_v49 }
 0x296   : > { %v3713_v52 = vpop.f32.mrf.mxu3  ;;  %v2772_v21 = vpop.f32.mrf.mxu1 }
 0x297   : > { %v3763_v5 = vadd.f32 %v3713_v52, %v3106_v36  ;;  %v2819_v12 = vadd.f32 %v2772_v21, %v6027_v20 }
 0x299   : > { %v4160_v43 = vadd.f32 %v4110_v0, %v3763_v5  ;;  %v3058_v26 = vpop.f32.mrf.mxu2 }
 0x29a   : > { %v3107_v4 = vadd.f32 %v3058_v26, %v2818_v29 }
 0x29b   : > { %v4196_v57 = vadd.f32 %v6221_v19, %v4160_v43 }
 0x29c   : > { %v4112_v25 = vpop.f32.mrf.mxu0 }
 0x29d   : > { %4228 = vst [vmem:[%s6241_s19 + $0xa0] sm:$0xff] %v4196_v57 }
 0x29e   : > { %v3715_v2 = vpop.f32.mrf.mxu3  ;;  %v2774_v41 = vpop.f32.mrf.mxu1 }
 0x29f   : > { %v3764_v42 = vadd.f32 %v3715_v2, %v3107_v4  ;;  %v2820_v17 = vadd.f32 %v2774_v41, %v6568_v50 }
 0x2a1   : > { %v4161_v62 = vadd.f32 %v4112_v25, %v3764_v42  ;;  %v3061_v1 = vpop.f32.mrf.mxu2 }
 0x2a2   : > { %v3108_v54 = vadd.f32 %v3061_v1, %v2819_v12 }
 0x2a3   : > { %v4197_v3 = vadd.f32 %v6221_v19, %v4161_v62 }
 0x2a4   : > { %v4115_v7 = vpop.f32.mrf.mxu0 }
 0x2a5   : > { %4229 = vst [vmem:[%s6241_s19 + $0xa8] sm:$0xff] %v4197_v3 }
 0x2a6   : > { %v3718_v56 = vpop.f32.mrf.mxu3  ;;  %v2777_v6 = vpop.f32.mrf.mxu1 }
 0x2a7   : > { %v3765_v55 = vadd.f32 %v3718_v56, %v3108_v54  ;;  %v2821_v45 = vadd.f32 %v2777_v6, %v6068_v31 }
 0x2a9   : > { %v4162_v59 = vadd.f32 %v4115_v7, %v3765_v55  ;;  %v3063_v10 = vpop.f32.mrf.mxu2 }
 0x2aa   : > { %v3109_v40 = vadd.f32 %v3063_v10, %v2820_v17 }
 0x2ab   : > { %v4198_v20 = vadd.f32 %v6516_v37, %v4162_v59 }
 0x2ac   : > { %v4117_v19 = vpop.f32.mrf.mxu0 }
 0x2ad   : > { %4230 = vst [vmem:[%s6241_s19 + $0xb0] sm:$0xff] %v4198_v20 }
 0x2ae   : > { %v3720_v16 = vpop.f32.mrf.mxu3  ;;  %v2779_v8 = vpop.f32.mrf.mxu1 }
 0x2af   : > { %v3766_v35 = vadd.f32 %v3720_v16, %v3109_v40  ;;  %v2822_v53 = vadd.f32 %v2779_v8, %v6089_v61 }
 0x2b1   : > { %v4163_v33 = vadd.f32 %v4117_v19, %v3766_v35  ;;  %v3066_v44 = vpop.f32.mrf.mxu2 }
 0x2b2   : > { %v3110_v27 = vadd.f32 %v3066_v44, %v2821_v45 }
 0x2b3   : > { %v4199_v38 = vadd.f32 %v6516_v37, %v4163_v33 }
 0x2b4   : > { %v4120_v13 = vpop.f32.mrf.mxu0 }
 0x2b5   : > { %4231 = vst [vmem:[%s6241_s19 + $0xb8] sm:$0xff] %v4199_v38 }
 0x2b6   : > { %v3723_v39 = vpop.f32.mrf.mxu3  ;;  %v2782_v63 = vpop.f32.mrf.mxu1 }
 0x2b7   : > { %v3767_v24 = vadd.f32 %v3723_v39, %v3110_v27  ;;  %v2823_v15 = vadd.f32 %v2782_v63, %v6107_v32 }
 0x2b9   : > { %v4164_v9 = vadd.f32 %v4120_v13, %v3767_v24  ;;  %v3068_v11 = vpop.f32.mrf.mxu2 }
 0x2ba   : > { %v3111_v23 = vadd.f32 %v3068_v11, %v2822_v53 }
 0x2bb   : > { %v4200_v14 = vadd.f32 %v6516_v37, %v4164_v9 }
 0x2bc   : > { %v4122_v51 = vpop.f32.mrf.mxu0 }
 0x2bd   : > { %4232 = vst [vmem:[%s6241_s19 + $0xc0] sm:$0xff] %v4200_v14 }
 0x2be   : > { %v3725_v31 = vpop.f32.mrf.mxu3  ;;  %v2784_v34 = vpop.f32.mrf.mxu1 }
 0x2bf   : > { %v3768_v46 = vadd.f32 %v3725_v31, %v3111_v23  ;;  %v2824_v5 = vadd.f32 %v2784_v34, %v6130_v58 }
 0x2c1   : > { %v4165_v22 = vadd.f32 %v4122_v51, %v3768_v46  ;;  %v3071_v18 = vpop.f32.mrf.mxu2 }
 0x2c2   : > { %v3112_v49 = vadd.f32 %v3071_v18, %v2823_v15 }
 0x2c3   : > { %v4201_v30 = vadd.f32 %v6516_v37, %v4165_v22 }
 0x2c4   : > { %v4125_v36 = vpop.f32.mrf.mxu0 }
 0x2c5   : > { %4233 = vst [vmem:[%s6241_s19 + $0xc8] sm:$0xff] %v4201_v30 }
 0x2c6   : > { %v3728_v61 = vpop.f32.mrf.mxu3  ;;  %v2787_v52 = vpop.f32.mrf.mxu1 }
 0x2c7   : > { %v3769_v0 = vadd.f32 %v3728_v61, %v3112_v49  ;;  %v2825_v2 = vadd.f32 %v2787_v52, %v6150_v48 }
 0x2c9   : > { %v4166_v21 = vadd.f32 %v4125_v36, %v3769_v0  ;;  %v3073_v43 = vpop.f32.mrf.mxu2 }
 0x2ca   : > { %v3113_v26 = vadd.f32 %v3073_v43, %v2824_v5 }
 0x2cb   : > { %v4202_v29 = vadd.f32 %v6516_v37, %v4166_v21 }
 0x2cc   : > { %v4127_v57 = vpop.f32.mrf.mxu0 }
 0x2cd   : > { %4234 = vst [vmem:[%s6241_s19 + $0xd0] sm:$0xff] %v4202_v29 }
 0x2ce   : > { %v3730_v32 = vpop.f32.mrf.mxu3  ;;  %v2789_v42 = vpop.f32.mrf.mxu1 }
 0x2cf   : > { %v3770_v4 = vadd.f32 %v3730_v32, %v3113_v26  ;;  %v2826_v7 = vadd.f32 %v2789_v42, %v6173_v28 }
 0x2d1   : > { %v4167_v25 = vadd.f32 %v4127_v57, %v3770_v4  ;;  %v3076_v41 = vpop.f32.mrf.mxu2 }
 0x2d2   : > { %v3114_v12 = vadd.f32 %v3076_v41, %v2825_v2 }
 0x2d3   : > { %v4203_v62 = vadd.f32 %v6516_v37, %v4167_v25 }
 0x2d4   : > { %v4130_v1 = vpop.f32.mrf.mxu0 }
 0x2d5   : > { %4235 = vst [vmem:[%s6241_s19 + $0xd8] sm:$0xff] %v4203_v62 }
 0x2d6   : > { %v3733_v58 = vpop.f32.mrf.mxu3  ;;  %v2792_v59 = vpop.f32.mrf.mxu1 }
 0x2d7   : > { %v3771_v3 = vadd.f32 %v3733_v58, %v3114_v12  ;;  %v2827_v20 = vadd.f32 %v2792_v59, %v6191_v47 }
 0x2d9   : > { %v4168_v54 = vadd.f32 %v4130_v1, %v3771_v3  ;;  %v3078_v56 = vpop.f32.mrf.mxu2 }
 0x2da   : > { %v3115_v55 = vadd.f32 %v3078_v56, %v2826_v7 }
 0x2db   : > { %v4204_v6 = vadd.f32 %v6516_v37, %v4168_v54 }
 0x2dc   : > { %v4132_v48 = vpop.f32.mrf.mxu0 }
 0x2dd   : > { %4236 = vst [vmem:[%s6241_s19 + $0xe0] sm:$0xff] %v4204_v6 }
 0x2de   : > { %v3735_v50 = vpop.f32.mrf.mxu3  ;;  %v2794_v28 = vpop.f32.mrf.mxu1 }
 0x2df   : > { %v3772_v17 = vadd.f32 %v3735_v50, %v3115_v55  ;;  %v2828_v44 = vadd.f32 %v2794_v28, %v6212_v60 }
 0x2e1   : > { %v4169_v10 = vadd.f32 %v4132_v48, %v3772_v17  ;;  %v3081_v40 = vpop.f32.mrf.mxu2 }
 0x2e2   : > { %v3116_v16 = vadd.f32 %v3081_v40, %v2827_v20 }
 0x2e3   : > { %v4205_v19 = vadd.f32 %v6516_v37, %v4169_v10 }
 0x2e4   : > { %v4135_v8 = vpop.f32.mrf.mxu0 }
 0x2e5   : > { %4237 = vst [vmem:[%s6241_s19 + $0xe8] sm:$0xff] %v4205_v19 }
 0x2e6   : > { %v3738_v35 = vpop.f32.mrf.mxu3 }
 0x2e7   : > { %v3773_v33 = vadd.f32 %v3738_v35, %v3116_v16 }
 0x2e9   : > { %v4170_v45 = vadd.f32 %v4135_v8, %v3773_v33  ;;  %v3083_v38 = vpop.f32.mrf.mxu2 }
 0x2ea   : > { %v3117_v13 = vadd.f32 %v3083_v38, %v2828_v44 }
 0x2eb   : > { %v4206_v27 = vadd.f32 %v6516_v37, %v4170_v45 }
 0x2ec   : > { %v4137_v63 = vpop.f32.mrf.mxu0 }
 0x2ed   : > { %4238 = vst [vmem:[%s6241_s19 + $0xf0] sm:$0xff] %v4206_v27 }
 0x2ee   : > { %v3740_v39 = vpop.f32.mrf.mxu3 }
 0x2ef   : > { %v3774_v47 = vadd.f32 %v3740_v39, %v3117_v13 }
 0x2f1   : > { %v4171_v24 = vadd.f32 %v4137_v63, %v3774_v47 }
 0x2f3   : > { %v4207_v9 = vadd.f32 %v6516_v37, %v4171_v24 }
 0x2f5   : > { %4239 = vst [vmem:[%s6241_s19 + $0xf8] sm:$0xff] %v4207_v9 }
 0x2f6 PF: > { %s13_s14 = sadd.s32 1, %s5116_s14   ;;  %s6569_s12 = smov %s5112_s13 }
 0x2f7   : > { %p10_p5 = scmp.ge.s32.totalorder %s13_s14, 4   ;;  %s6570_s13 = smov %s6572_s15 }
 0x2f9   :  { %12 = sbr.rel (!%p10_p5) target bundleno = 2 (0x2), region = 71 }

</bundles_post_ra>
